<compile_context>
chip_gen: v5e
topology: v5e:2x2
jax: 0.10.0
libtpu: 0.0.40
codegen_flags: <defaults>
</compile_context>

<pallas_src>
import math
import jax
import jax.numpy as jnp
from jax.experimental import pallas as pl
from jax.experimental.pallas import tpu as pltpu


def _lstm_chunk_kernel(x_ref, w_in_ref, b_in_ref, w_ih_ref, b_g_ref, w_hh_ref,
                       w_out_ref, b_out_ref, out_ref,
                       h_scr, c_scr, gx_scr, h_hist):
    """One grid step = one time chunk of Tc steps. h/c carried across chunks in VMEM."""
    tc, B, nx = x_ref.shape
    H = h_scr.shape[-1]
    ny = out_ref.shape[-1]
    f32 = jnp.float32

    @pl.when(pl.program_id(0) == 0)
    def _():
        h_scr[...] = jnp.zeros_like(h_scr)
        c_scr[...] = jnp.zeros_like(c_scr)

    # ---- Batched prologue (once per chunk): linearIn + ReLU, then input half of the gates.
    xc = x_ref[...].reshape(tc * B, nx)                                   # [Tc*B, nx]
    x0 = jnp.maximum(
        jnp.dot(xc, w_in_ref[...], preferred_element_type=f32) + b_in_ref[...], 0.0)
    # Per-gate precompute (i, f, g, o): gx_k = x0 @ W_ih_k + (b_ih_k + b_hh_k).
    for k in range(4):                                                    # static unroll
        gx_scr[k] = (jnp.dot(x0, w_ih_ref[k], preferred_element_type=f32)
                     + b_g_ref[k]).reshape(tc, B, H)

    # ---- Serial recurrence: only the h @ W_hh_k dots remain on the critical path.
    whh = [w_hh_ref[k] for k in range(4)]                                 # hoist weight loads

    def step(t, carry):
        h, c = carry
        zi = gx_scr[0, t] + jnp.dot(h, whh[0], preferred_element_type=f32)
        zf = gx_scr[1, t] + jnp.dot(h, whh[1], preferred_element_type=f32)
        zg = gx_scr[2, t] + jnp.dot(h, whh[2], preferred_element_type=f32)
        zo = gx_scr[3, t] + jnp.dot(h, whh[3], preferred_element_type=f32)
        i_g = jax.nn.sigmoid(zi)
        f_g = jax.nn.sigmoid(zf)
        g_g = jnp.tanh(zg)
        o_g = jax.nn.sigmoid(zo)
        c_n = f_g * c + i_g * g_g
        h_n = o_g * jnp.tanh(c_n)
        h_hist[t] = h_n
        return h_n, c_n

    h_fin, c_fin = jax.lax.fori_loop(0, tc, step, (h_scr[...], c_scr[...]), unroll=True)
    h_scr[...] = h_fin
    c_scr[...] = c_fin

    # ---- Batched epilogue (once per chunk): linearOut over the whole chunk, one store.
    h_all = h_hist[...].reshape(tc * B, H)
    out = jnp.dot(h_all, w_out_ref[...], preferred_element_type=f32) + b_out_ref[...]
    out_ref[...] = out.reshape(tc, B, ny)


def _const_spec(shape):
    n = len(shape)
    return pl.BlockSpec(shape, lambda i, _n=n: (0,) * _n)


def cudnn_lstm_model_forward(x, params, *, tc=8):
    """x: [T, B, nx] float32. Returns out: [T, B, ny] float32."""
    T, B, nx = x.shape
    H = params["w_ih"].shape[1] // 4
    ny = params["w_out"].shape[1]

    # Pad T up to a multiple of the chunk size; padded (zero) tail steps only affect padded
    # outputs, which are sliced off below.
    n_chunks = pl.cdiv(T, tc)
    T_pad = n_chunks * tc
    if T_pad != T:
        x = jnp.pad(x, ((0, T_pad - T), (0, 0), (0, 0)))

    # Pre-transposed weights ([fan_in, fan_out]); recurrent/gate weights pre-split per gate
    # (i, f, g, o) so the kernel never lane-sub-slices a [B, 4H] gate vector.
    w_in = params["w_in"]                                                  # [nx, H]
    b_in = params["b_in"]                                                  # [1, H]
    w_ih4 = params["w_ih"].reshape(H, 4, H).transpose(1, 0, 2)             # [4, H, H]
    w_hh4 = params["w_hh"].reshape(H, 4, H).transpose(1, 0, 2)             # [4, H, H]
    b_g4 = params["b_g"].reshape(4, 1, H)                                  # [4, 1, H]
    w_out = params["w_out"]                                                # [H, ny]
    b_out = params["b_out"]                                                # [1, ny]

    out = pl.pallas_call(
        _lstm_chunk_kernel,
        out_shape=jax.ShapeDtypeStruct((T_pad, B, ny), jnp.float32),
        grid=(n_chunks,),
        in_specs=[
            pl.BlockSpec((tc, B, nx), lambda i: (i, 0, 0)),                # x chunk
            _const_spec((nx, H)),                                          # w_in
            _const_spec((1, H)),                                           # b_in
            _const_spec((4, H, H)),                                        # w_ih (per gate)
            _const_spec((4, 1, H)),                                        # b_ih + b_hh (per gate)
            _const_spec((4, H, H)),                                        # w_hh (per gate)
            _const_spec((H, ny)),                                          # w_out
            _const_spec((1, ny)),                                          # b_out
        ],
        out_specs=pl.BlockSpec((tc, B, ny), lambda i: (i, 0, 0)),
        scratch_shapes=[
            pltpu.VMEM((B, H), jnp.float32),          # h carry
            pltpu.VMEM((B, H), jnp.float32),          # c carry
            pltpu.VMEM((4, tc, B, H), jnp.float32),   # precomputed input-gate halves
            pltpu.VMEM((tc, B, H), jnp.float32),      # h history within the chunk
        ],
        compiler_params=pltpu.CompilerParams(
            dimension_semantics=("arbitrary",),       # sequential recurrence over time chunks
        ),
    )(x, w_in, b_in, w_ih4, b_g4, w_hh4, w_out, b_out)

    return out[:T] if T_pad != T else out


def init_params(key, nx, ny, hidden):
    """Deterministic synthetic init mirroring the module's parameter shapes."""
    ks = jax.random.split(key, 8)
    u = lambda k, shape, s: jax.random.uniform(k, shape, jnp.float32, -s, s)
    s_in = 1.0 / math.sqrt(nx)
    s_h = 1.0 / math.sqrt(hidden)
    # Stored already transposed ([fan_in, fan_out]) for the kernel.
    return {
        "w_in": u(ks[0], (nx, hidden), s_in),
        "b_in": u(ks[1], (1, hidden), s_in),
        "w_ih": u(ks[2], (hidden, 4 * hidden), s_h),
        "w_hh": u(ks[3], (hidden, 4 * hidden), s_h),
        "b_g": u(ks[4], (1, 4 * hidden), s_h) + u(ks[5], (1, 4 * hidden), s_h),  # b_ih + b_hh
        "w_out": u(ks[6], (hidden, ny), s_h),
        "b_out": u(ks[7], (1, ny), s_h),
    }


def reference_forward(x, params):
    """Pure-JAX reference for correctness checking (matches the PyTorch forward)."""
    H = params["w_ih"].shape[1] // 4
    x0 = jnp.maximum(x @ params["w_in"] + params["b_in"], 0.0)   # [T, B, H]
    B = x.shape[1]

    def step(carry, xt):
        h, c = carry
        gates = xt @ params["w_ih"] + h @ params["w_hh"] + params["b_g"]
        i = jax.nn.sigmoid(gates[:, 0 * H:1 * H])
        f = jax.nn.sigmoid(gates[:, 1 * H:2 * H])
        g = jnp.tanh(gates[:, 2 * H:3 * H])
        o = jax.nn.sigmoid(gates[:, 3 * H:4 * H])
        c_new = f * c + i * g
        h_new = o * jnp.tanh(c_new)
        return (h_new, c_new), h_new

    h0 = jnp.zeros((B, H), jnp.float32)
    c0 = jnp.zeros((B, H), jnp.float32)
    _, hs = jax.lax.scan(step, (h0, c0), x0)
    return hs @ params["w_out"] + params["b_out"]


if __name__ == "__main__":
    # Small shapes consistent with the module; T=32 with Tc=8 exercises chunked recurrence.
    T, B, NX, H, NY, TC = 32, 16, 4, 32, 2, 8

    key = jax.random.PRNGKey(0)
    kx, kp = jax.random.split(key)
    x = jax.random.normal(kx, (T, B, NX), dtype=jnp.float32)
    params = init_params(kp, NX, NY, H)

    out = jax.block_until_ready(cudnn_lstm_model_forward(x, params, tc=TC))
    ref = jax.block_until_ready(reference_forward(x, params))
    assert out.shape == (T, B, NY)
    assert jnp.allclose(out, ref, atol=1e-4, rtol=1e-4), "mismatch vs reference (T % Tc == 0)"

    # Ragged T (not a multiple of the chunk size) exercises the padding path.
    x_odd = x[:29]
    out_odd = jax.block_until_ready(cudnn_lstm_model_forward(x_odd, params, tc=TC))
    ref_odd = reference_forward(x_odd, params)
    assert out_odd.shape == (29, B, NY)
    assert jnp.allclose(out_odd, ref_odd, atol=1e-4, rtol=1e-4), "mismatch vs reference (ragged T)"

    print("KERNEL_OK")
</pallas_src>

<mosaic_0001>
module attributes {stable_mosaic.version = 11 : i64} {
  func.func @_lstm_chunk_kernel(%arg0: i32, %arg1: memref<8x16x4xf32, #tpu.memory_space<vmem>>, %arg2: memref<4x32xf32, #tpu.memory_space<vmem>>, %arg3: memref<1x32xf32, #tpu.memory_space<vmem>>, %arg4: memref<4x32x32xf32, #tpu.memory_space<vmem>>, %arg5: memref<4x1x32xf32, #tpu.memory_space<vmem>>, %arg6: memref<4x32x32xf32, #tpu.memory_space<vmem>>, %arg7: memref<32x2xf32, #tpu.memory_space<vmem>>, %arg8: memref<1x2xf32, #tpu.memory_space<vmem>>, %arg9: memref<8x16x2xf32, #tpu.memory_space<vmem>>, %arg10: memref<16x32xf32, #tpu.memory_space<vmem>>, %arg11: memref<16x32xf32, #tpu.memory_space<vmem>>, %arg12: memref<4x8x16x32xf32, #tpu.memory_space<vmem>>, %arg13: memref<8x16x32xf32, #tpu.memory_space<vmem>>) attributes {dimension_semantics = [#tpu.dimension_semantics<arbitrary>], iteration_bounds = array<i64: 4>, scalar_prefetch = 0 : i64, scratch_operands = 4 : i64, tpu.core_type = #tpu.core_type<tc>, window_params = [{transform_indices = @transform_0, window_bounds = array<i64: 8, 16, 4>}, {pipeline_mode = #tpu.pipeline_mode<synchronous>, transform_indices = @transform_1, window_bounds = array<i64: 4, 32>}, {pipeline_mode = #tpu.pipeline_mode<synchronous>, transform_indices = @transform_2, window_bounds = array<i64: 1, 32>}, {pipeline_mode = #tpu.pipeline_mode<synchronous>, transform_indices = @transform_3, window_bounds = array<i64: 4, 32, 32>}, {pipeline_mode = #tpu.pipeline_mode<synchronous>, transform_indices = @transform_4, window_bounds = array<i64: 4, 1, 32>}, {pipeline_mode = #tpu.pipeline_mode<synchronous>, transform_indices = @transform_5, window_bounds = array<i64: 4, 32, 32>}, {pipeline_mode = #tpu.pipeline_mode<synchronous>, transform_indices = @transform_6, window_bounds = array<i64: 32, 2>}, {pipeline_mode = #tpu.pipeline_mode<synchronous>, transform_indices = @transform_7, window_bounds = array<i64: 1, 2>}, {transform_indices = @transform_8, window_bounds = array<i64: 8, 16, 2>}]} {
    %c0_i32 = arith.constant 0 : i32
    %0 = arith.cmpi eq, %arg0, %c0_i32 : i32
    %1 = arith.extui %0 : i1 to i32
    %c0_i32_0 = arith.constant 0 : i32
    %2 = arith.cmpi ne, %1, %c0_i32_0 : i32
    scf.if %2 {
      %cst_249 = arith.constant 0.000000e+00 : f32
      %437 = vector.broadcast %cst_249 : f32 to vector<16x32xf32>
      %c0_250 = arith.constant 0 : index
      %c0_251 = arith.constant 0 : index
      %438 = vector.load %arg10[%c0_250, %c0_251] : memref<16x32xf32, #tpu.memory_space<vmem>>, vector<16x32xf32>
      tpu.vector_store %arg10[%c0_250, %c0_251], %437 {strides = array<i32>} : memref<16x32xf32, #tpu.memory_space<vmem>>, vector<16x32xf32>,
      %cst_252 = arith.constant 0.000000e+00 : f32
      %439 = vector.broadcast %cst_252 : f32 to vector<16x32xf32>
      %c0_253 = arith.constant 0 : index
      %c0_254 = arith.constant 0 : index
      %440 = vector.load %arg11[%c0_253, %c0_254] : memref<16x32xf32, #tpu.memory_space<vmem>>, vector<16x32xf32>
      tpu.vector_store %arg11[%c0_253, %c0_254], %439 {strides = array<i32>} : memref<16x32xf32, #tpu.memory_space<vmem>>, vector<16x32xf32>,
    } else {
    }
    %c0 = arith.constant 0 : index
    %c0_1 = arith.constant 0 : index
    %c0_2 = arith.constant 0 : index
    %3 = vector.load %arg1[%c0, %c0_1, %c0_2] : memref<8x16x4xf32, #tpu.memory_space<vmem>>, vector<8x16x4xf32>
    %4 = vector.shape_cast %3 : vector<8x16x4xf32> to vector<128x4xf32>
    %c0_3 = arith.constant 0 : index
    %c0_4 = arith.constant 0 : index
    %5 = vector.load %arg2[%c0_3, %c0_4] : memref<4x32xf32, #tpu.memory_space<vmem>>, vector<4x32xf32>
    %cst = arith.constant dense<0.000000e+00> : vector<128x32xf32>
    %6 = tpu.matmul %4, %5, %cst {dimension_numbers = #tpu.dot_dimension_numbers<[1], [0], [0], [1], [0, 0, 1, 1], [], []>} : vector<128x4xf32>, vector<4x32xf32>, vector<128x32xf32> -> vector<128x32xf32>
    %c0_5 = arith.constant 0 : index
    %c0_6 = arith.constant 0 : index
    %7 = vector.load %arg3[%c0_5, %c0_6] : memref<1x32xf32, #tpu.memory_space<vmem>>, vector<1x32xf32>
    %8 = vector.broadcast %7 : vector<1x32xf32> to vector<128x32xf32>
    %9 = arith.addf %6, %8 : vector<128x32xf32>
    %cst_7 = arith.constant 0.000000e+00 : f32
    %10 = vector.broadcast %cst_7 : f32 to vector<128x32xf32>
    %11 = arith.maximumf %9, %10 : vector<128x32xf32>
    %c0_8 = arith.constant 0 : index
    %c0_9 = arith.constant 0 : index
    %c0_10 = arith.constant 0 : index
    %12 = vector.load %arg4[%c0_8, %c0_9, %c0_10] : memref<4x32x32xf32, #tpu.memory_space<vmem>>, vector<1x32x32xf32>
    %13 = vector.shape_cast %12 : vector<1x32x32xf32> to vector<32x32xf32>
    %cst_11 = arith.constant dense<0.000000e+00> : vector<128x32xf32>
    %14 = tpu.matmul %11, %13, %cst_11 {dimension_numbers = #tpu.dot_dimension_numbers<[1], [0], [0], [1], [0, 0, 1, 1], [], []>} : vector<128x32xf32>, vector<32x32xf32>, vector<128x32xf32> -> vector<128x32xf32>
    %c0_12 = arith.constant 0 : index
    %c0_13 = arith.constant 0 : index
    %c0_14 = arith.constant 0 : index
    %15 = vector.load %arg5[%c0_12, %c0_13, %c0_14] : memref<4x1x32xf32, #tpu.memory_space<vmem>>, vector<1x1x32xf32>
    %16 = vector.shape_cast %15 : vector<1x1x32xf32> to vector<1x32xf32>
    %17 = vector.broadcast %16 : vector<1x32xf32> to vector<128x32xf32>
    %18 = arith.addf %14, %17 : vector<128x32xf32>
    %19 = vector.shape_cast %18 : vector<128x32xf32> to vector<8x16x32xf32>
    %c0_15 = arith.constant 0 : index
    %c0_16 = arith.constant 0 : index
    %c0_17 = arith.constant 0 : index
    %c0_18 = arith.constant 0 : index
    %20 = vector.load %arg12[%c0_15, %c0_16, %c0_17, %c0_18] : memref<4x8x16x32xf32, #tpu.memory_space<vmem>>, vector<1x8x16x32xf32>
    %21 = vector.shape_cast %20 : vector<1x8x16x32xf32> to vector<8x16x32xf32>
    %22 = vector.shape_cast %19 : vector<8x16x32xf32> to vector<1x8x16x32xf32>
    tpu.vector_store %arg12[%c0_15, %c0_16, %c0_17, %c0_18], %22 {strides = array<i32>} : memref<4x8x16x32xf32, #tpu.memory_space<vmem>>, vector<1x8x16x32xf32>,
    %c1 = arith.constant 1 : index
    %c0_19 = arith.constant 0 : index
    %c0_20 = arith.constant 0 : index
    %23 = vector.load %arg4[%c1, %c0_19, %c0_20] : memref<4x32x32xf32, #tpu.memory_space<vmem>>, vector<1x32x32xf32>
    %24 = vector.shape_cast %23 : vector<1x32x32xf32> to vector<32x32xf32>
    %cst_21 = arith.constant dense<0.000000e+00> : vector<128x32xf32>
    %25 = tpu.matmul %11, %24, %cst_21 {dimension_numbers = #tpu.dot_dimension_numbers<[1], [0], [0], [1], [0, 0, 1, 1], [], []>} : vector<128x32xf32>, vector<32x32xf32>, vector<128x32xf32> -> vector<128x32xf32>
    %c1_22 = arith.constant 1 : index
    %c0_23 = arith.constant 0 : index
    %c0_24 = arith.constant 0 : index
    %26 = vector.load %arg5[%c1_22, %c0_23, %c0_24] : memref<4x1x32xf32, #tpu.memory_space<vmem>>, vector<1x1x32xf32>
    %27 = vector.shape_cast %26 : vector<1x1x32xf32> to vector<1x32xf32>
    %28 = vector.broadcast %27 : vector<1x32xf32> to vector<128x32xf32>
    %29 = arith.addf %25, %28 : vector<128x32xf32>
    %30 = vector.shape_cast %29 : vector<128x32xf32> to vector<8x16x32xf32>
    %c1_25 = arith.constant 1 : index
    %c0_26 = arith.constant 0 : index
    %c0_27 = arith.constant 0 : index
    %c0_28 = arith.constant 0 : index
    %31 = vector.load %arg12[%c1_25, %c0_26, %c0_27, %c0_28] : memref<4x8x16x32xf32, #tpu.memory_space<vmem>>, vector<1x8x16x32xf32>
    %32 = vector.shape_cast %31 : vector<1x8x16x32xf32> to vector<8x16x32xf32>
    %33 = vector.shape_cast %30 : vector<8x16x32xf32> to vector<1x8x16x32xf32>
    tpu.vector_store %arg12[%c1_25, %c0_26, %c0_27, %c0_28], %33 {strides = array<i32>} : memref<4x8x16x32xf32, #tpu.memory_space<vmem>>, vector<1x8x16x32xf32>,
    %c2 = arith.constant 2 : index
    %c0_29 = arith.constant 0 : index
    %c0_30 = arith.constant 0 : index
    %34 = vector.load %arg4[%c2, %c0_29, %c0_30] : memref<4x32x32xf32, #tpu.memory_space<vmem>>, vector<1x32x32xf32>
    %35 = vector.shape_cast %34 : vector<1x32x32xf32> to vector<32x32xf32>
    %cst_31 = arith.constant dense<0.000000e+00> : vector<128x32xf32>
    %36 = tpu.matmul %11, %35, %cst_31 {dimension_numbers = #tpu.dot_dimension_numbers<[1], [0], [0], [1], [0, 0, 1, 1], [], []>} : vector<128x32xf32>, vector<32x32xf32>, vector<128x32xf32> -> vector<128x32xf32>
    %c2_32 = arith.constant 2 : index
    %c0_33 = arith.constant 0 : index
    %c0_34 = arith.constant 0 : index
    %37 = vector.load %arg5[%c2_32, %c0_33, %c0_34] : memref<4x1x32xf32, #tpu.memory_space<vmem>>, vector<1x1x32xf32>
    %38 = vector.shape_cast %37 : vector<1x1x32xf32> to vector<1x32xf32>
    %39 = vector.broadcast %38 : vector<1x32xf32> to vector<128x32xf32>
    %40 = arith.addf %36, %39 : vector<128x32xf32>
    %41 = vector.shape_cast %40 : vector<128x32xf32> to vector<8x16x32xf32>
    %c2_35 = arith.constant 2 : index
    %c0_36 = arith.constant 0 : index
    %c0_37 = arith.constant 0 : index
    %c0_38 = arith.constant 0 : index
    %42 = vector.load %arg12[%c2_35, %c0_36, %c0_37, %c0_38] : memref<4x8x16x32xf32, #tpu.memory_space<vmem>>, vector<1x8x16x32xf32>
    %43 = vector.shape_cast %42 : vector<1x8x16x32xf32> to vector<8x16x32xf32>
    %44 = vector.shape_cast %41 : vector<8x16x32xf32> to vector<1x8x16x32xf32>
    tpu.vector_store %arg12[%c2_35, %c0_36, %c0_37, %c0_38], %44 {strides = array<i32>} : memref<4x8x16x32xf32, #tpu.memory_space<vmem>>, vector<1x8x16x32xf32>,
    %c3 = arith.constant 3 : index
    %c0_39 = arith.constant 0 : index
    %c0_40 = arith.constant 0 : index
    %45 = vector.load %arg4[%c3, %c0_39, %c0_40] : memref<4x32x32xf32, #tpu.memory_space<vmem>>, vector<1x32x32xf32>
    %46 = vector.shape_cast %45 : vector<1x32x32xf32> to vector<32x32xf32>
    %cst_41 = arith.constant dense<0.000000e+00> : vector<128x32xf32>
    %47 = tpu.matmul %11, %46, %cst_41 {dimension_numbers = #tpu.dot_dimension_numbers<[1], [0], [0], [1], [0, 0, 1, 1], [], []>} : vector<128x32xf32>, vector<32x32xf32>, vector<128x32xf32> -> vector<128x32xf32>
    %c3_42 = arith.constant 3 : index
    %c0_43 = arith.constant 0 : index
    %c0_44 = arith.constant 0 : index
    %48 = vector.load %arg5[%c3_42, %c0_43, %c0_44] : memref<4x1x32xf32, #tpu.memory_space<vmem>>, vector<1x1x32xf32>
    %49 = vector.shape_cast %48 : vector<1x1x32xf32> to vector<1x32xf32>
    %50 = vector.broadcast %49 : vector<1x32xf32> to vector<128x32xf32>
    %51 = arith.addf %47, %50 : vector<128x32xf32>
    %52 = vector.shape_cast %51 : vector<128x32xf32> to vector<8x16x32xf32>
    %c3_45 = arith.constant 3 : index
    %c0_46 = arith.constant 0 : index
    %c0_47 = arith.constant 0 : index
    %c0_48 = arith.constant 0 : index
    %53 = vector.load %arg12[%c3_45, %c0_46, %c0_47, %c0_48] : memref<4x8x16x32xf32, #tpu.memory_space<vmem>>, vector<1x8x16x32xf32>
    %54 = vector.shape_cast %53 : vector<1x8x16x32xf32> to vector<8x16x32xf32>
    %55 = vector.shape_cast %52 : vector<8x16x32xf32> to vector<1x8x16x32xf32>
    tpu.vector_store %arg12[%c3_45, %c0_46, %c0_47, %c0_48], %55 {strides = array<i32>} : memref<4x8x16x32xf32, #tpu.memory_space<vmem>>, vector<1x8x16x32xf32>,
    %c0_49 = arith.constant 0 : index
    %c0_50 = arith.constant 0 : index
    %c0_51 = arith.constant 0 : index
    %56 = vector.load %arg6[%c0_49, %c0_50, %c0_51] : memref<4x32x32xf32, #tpu.memory_space<vmem>>, vector<1x32x32xf32>
    %57 = vector.shape_cast %56 : vector<1x32x32xf32> to vector<32x32xf32>
    %c1_52 = arith.constant 1 : index
    %c0_53 = arith.constant 0 : index
    %c0_54 = arith.constant 0 : index
    %58 = vector.load %arg6[%c1_52, %c0_53, %c0_54] : memref<4x32x32xf32, #tpu.memory_space<vmem>>, vector<1x32x32xf32>
    %59 = vector.shape_cast %58 : vector<1x32x32xf32> to vector<32x32xf32>
    %c2_55 = arith.constant 2 : index
    %c0_56 = arith.constant 0 : index
    %c0_57 = arith.constant 0 : index
    %60 = vector.load %arg6[%c2_55, %c0_56, %c0_57] : memref<4x32x32xf32, #tpu.memory_space<vmem>>, vector<1x32x32xf32>
    %61 = vector.shape_cast %60 : vector<1x32x32xf32> to vector<32x32xf32>
    %c3_58 = arith.constant 3 : index
    %c0_59 = arith.constant 0 : index
    %c0_60 = arith.constant 0 : index
    %62 = vector.load %arg6[%c3_58, %c0_59, %c0_60] : memref<4x32x32xf32, #tpu.memory_space<vmem>>, vector<1x32x32xf32>
    %63 = vector.shape_cast %62 : vector<1x32x32xf32> to vector<32x32xf32>
    %c0_61 = arith.constant 0 : index
    %c0_62 = arith.constant 0 : index
    %64 = vector.load %arg10[%c0_61, %c0_62] : memref<16x32xf32, #tpu.memory_space<vmem>>, vector<16x32xf32>
    %c0_63 = arith.constant 0 : index
    %c0_64 = arith.constant 0 : index
    %65 = vector.load %arg11[%c0_63, %c0_64] : memref<16x32xf32, #tpu.memory_space<vmem>>, vector<16x32xf32>
    %c0_i32_65 = arith.constant 0 : i32
    %c0_66 = arith.constant 0 : index
    %66 = arith.index_cast %c0_i32_65 : i32 to index
    %c0_67 = arith.constant 0 : index
    %c0_68 = arith.constant 0 : index
    %67 = vector.load %arg12[%c0_66, %66, %c0_67, %c0_68] : memref<4x8x16x32xf32, #tpu.memory_space<vmem>>, vector<1x1x16x32xf32>
    %68 = vector.shape_cast %67 : vector<1x1x16x32xf32> to vector<16x32xf32>
    %cst_69 = arith.constant dense<0.000000e+00> : vector<16x32xf32>
    %69 = tpu.matmul %64, %57, %cst_69 {dimension_numbers = #tpu.dot_dimension_numbers<[1], [0], [0], [1], [0, 0, 1, 1], [], []>} : vector<16x32xf32>, vector<32x32xf32>, vector<16x32xf32> -> vector<16x32xf32>
    %70 = arith.addf %68, %69 : vector<16x32xf32>
    %c1_70 = arith.constant 1 : index
    %71 = arith.index_cast %c0_i32_65 : i32 to index
    %c0_71 = arith.constant 0 : index
    %c0_72 = arith.constant 0 : index
    %72 = vector.load %arg12[%c1_70, %71, %c0_71, %c0_72] : memref<4x8x16x32xf32, #tpu.memory_space<vmem>>, vector<1x1x16x32xf32>
    %73 = vector.shape_cast %72 : vector<1x1x16x32xf32> to vector<16x32xf32>
    %cst_73 = arith.constant dense<0.000000e+00> : vector<16x32xf32>
    %74 = tpu.matmul %64, %59, %cst_73 {dimension_numbers = #tpu.dot_dimension_numbers<[1], [0], [0], [1], [0, 0, 1, 1], [], []>} : vector<16x32xf32>, vector<32x32xf32>, vector<16x32xf32> -> vector<16x32xf32>
    %75 = arith.addf %73, %74 : vector<16x32xf32>
    %c2_74 = arith.constant 2 : index
    %76 = arith.index_cast %c0_i32_65 : i32 to index
    %c0_75 = arith.constant 0 : index
    %c0_76 = arith.constant 0 : index
    %77 = vector.load %arg12[%c2_74, %76, %c0_75, %c0_76] : memref<4x8x16x32xf32, #tpu.memory_space<vmem>>, vector<1x1x16x32xf32>
    %78 = vector.shape_cast %77 : vector<1x1x16x32xf32> to vector<16x32xf32>
    %cst_77 = arith.constant dense<0.000000e+00> : vector<16x32xf32>
    %79 = tpu.matmul %64, %61, %cst_77 {dimension_numbers = #tpu.dot_dimension_numbers<[1], [0], [0], [1], [0, 0, 1, 1], [], []>} : vector<16x32xf32>, vector<32x32xf32>, vector<16x32xf32> -> vector<16x32xf32>
    %80 = arith.addf %78, %79 : vector<16x32xf32>
    %c3_78 = arith.constant 3 : index
    %81 = arith.index_cast %c0_i32_65 : i32 to index
    %c0_79 = arith.constant 0 : index
    %c0_80 = arith.constant 0 : index
    %82 = vector.load %arg12[%c3_78, %81, %c0_79, %c0_80] : memref<4x8x16x32xf32, #tpu.memory_space<vmem>>, vector<1x1x16x32xf32>
    %83 = vector.shape_cast %82 : vector<1x1x16x32xf32> to vector<16x32xf32>
    %cst_81 = arith.constant dense<0.000000e+00> : vector<16x32xf32>
    %84 = tpu.matmul %64, %63, %cst_81 {dimension_numbers = #tpu.dot_dimension_numbers<[1], [0], [0], [1], [0, 0, 1, 1], [], []>} : vector<16x32xf32>, vector<32x32xf32>, vector<16x32xf32> -> vector<16x32xf32>
    %85 = arith.addf %83, %84 : vector<16x32xf32>
    %86 = arith.negf %70 : vector<16x32xf32>
    %87 = math.exp %86 : vector<16x32xf32>
    %cst_82 = arith.constant 1.000000e+00 : f32
    %88 = vector.broadcast %cst_82 : f32 to vector<16x32xf32>
    %89 = arith.addf %88, %87 : vector<16x32xf32>
    %90 = arith.divf %88, %89 : vector<16x32xf32>
    %91 = arith.negf %75 : vector<16x32xf32>
    %92 = math.exp %91 : vector<16x32xf32>
    %cst_83 = arith.constant 1.000000e+00 : f32
    %93 = vector.broadcast %cst_83 : f32 to vector<16x32xf32>
    %94 = arith.addf %93, %92 : vector<16x32xf32>
    %95 = arith.divf %93, %94 : vector<16x32xf32>
    %96 = math.tanh %80 : vector<16x32xf32>
    %97 = arith.negf %85 : vector<16x32xf32>
    %98 = math.exp %97 : vector<16x32xf32>
    %cst_84 = arith.constant 1.000000e+00 : f32
    %99 = vector.broadcast %cst_84 : f32 to vector<16x32xf32>
    %100 = arith.addf %99, %98 : vector<16x32xf32>
    %101 = arith.divf %99, %100 : vector<16x32xf32>
    %102 = arith.mulf %95, %65 : vector<16x32xf32>
    %103 = arith.mulf %90, %96 : vector<16x32xf32>
    %104 = arith.addf %102, %103 : vector<16x32xf32>
    %105 = math.tanh %104 : vector<16x32xf32>
    %106 = arith.mulf %101, %105 : vector<16x32xf32>
    %107 = arith.index_cast %c0_i32_65 : i32 to index
    %c0_85 = arith.constant 0 : index
    %c0_86 = arith.constant 0 : index
    %108 = vector.load %arg13[%107, %c0_85, %c0_86] : memref<8x16x32xf32, #tpu.memory_space<vmem>>, vector<1x16x32xf32>
    %109 = vector.shape_cast %108 : vector<1x16x32xf32> to vector<16x32xf32>
    %110 = vector.shape_cast %106 : vector<16x32xf32> to vector<1x16x32xf32>
    tpu.vector_store %arg13[%107, %c0_85, %c0_86], %110 {strides = array<i32>} : memref<8x16x32xf32, #tpu.memory_space<vmem>>, vector<1x16x32xf32>,
    %c1_i32 = arith.constant 1 : i32
    %c0_87 = arith.constant 0 : index
    %111 = arith.index_cast %c1_i32 : i32 to index
    %c0_88 = arith.constant 0 : index
    %c0_89 = arith.constant 0 : index
    %112 = vector.load %arg12[%c0_87, %111, %c0_88, %c0_89] : memref<4x8x16x32xf32, #tpu.memory_space<vmem>>, vector<1x1x16x32xf32>
    %113 = vector.shape_cast %112 : vector<1x1x16x32xf32> to vector<16x32xf32>
    %cst_90 = arith.constant dense<0.000000e+00> : vector<16x32xf32>
    %114 = tpu.matmul %106, %57, %cst_90 {dimension_numbers = #tpu.dot_dimension_numbers<[1], [0], [0], [1], [0, 0, 1, 1], [], []>} : vector<16x32xf32>, vector<32x32xf32>, vector<16x32xf32> -> vector<16x32xf32>
    %115 = arith.addf %113, %114 : vector<16x32xf32>
    %c1_91 = arith.constant 1 : index
    %116 = arith.index_cast %c1_i32 : i32 to index
    %c0_92 = arith.constant 0 : index
    %c0_93 = arith.constant 0 : index
    %117 = vector.load %arg12[%c1_91, %116, %c0_92, %c0_93] : memref<4x8x16x32xf32, #tpu.memory_space<vmem>>, vector<1x1x16x32xf32>
    %118 = vector.shape_cast %117 : vector<1x1x16x32xf32> to vector<16x32xf32>
    %cst_94 = arith.constant dense<0.000000e+00> : vector<16x32xf32>
    %119 = tpu.matmul %106, %59, %cst_94 {dimension_numbers = #tpu.dot_dimension_numbers<[1], [0], [0], [1], [0, 0, 1, 1], [], []>} : vector<16x32xf32>, vector<32x32xf32>, vector<16x32xf32> -> vector<16x32xf32>
    %120 = arith.addf %118, %119 : vector<16x32xf32>
    %c2_95 = arith.constant 2 : index
    %121 = arith.index_cast %c1_i32 : i32 to index
    %c0_96 = arith.constant 0 : index
    %c0_97 = arith.constant 0 : index
    %122 = vector.load %arg12[%c2_95, %121, %c0_96, %c0_97] : memref<4x8x16x32xf32, #tpu.memory_space<vmem>>, vector<1x1x16x32xf32>
    %123 = vector.shape_cast %122 : vector<1x1x16x32xf32> to vector<16x32xf32>
    %cst_98 = arith.constant dense<0.000000e+00> : vector<16x32xf32>
    %124 = tpu.matmul %106, %61, %cst_98 {dimension_numbers = #tpu.dot_dimension_numbers<[1], [0], [0], [1], [0, 0, 1, 1], [], []>} : vector<16x32xf32>, vector<32x32xf32>, vector<16x32xf32> -> vector<16x32xf32>
    %125 = arith.addf %123, %124 : vector<16x32xf32>
    %c3_99 = arith.constant 3 : index
    %126 = arith.index_cast %c1_i32 : i32 to index
    %c0_100 = arith.constant 0 : index
    %c0_101 = arith.constant 0 : index
    %127 = vector.load %arg12[%c3_99, %126, %c0_100, %c0_101] : memref<4x8x16x32xf32, #tpu.memory_space<vmem>>, vector<1x1x16x32xf32>
    %128 = vector.shape_cast %127 : vector<1x1x16x32xf32> to vector<16x32xf32>
    %cst_102 = arith.constant dense<0.000000e+00> : vector<16x32xf32>
    %129 = tpu.matmul %106, %63, %cst_102 {dimension_numbers = #tpu.dot_dimension_numbers<[1], [0], [0], [1], [0, 0, 1, 1], [], []>} : vector<16x32xf32>, vector<32x32xf32>, vector<16x32xf32> -> vector<16x32xf32>
    %130 = arith.addf %128, %129 : vector<16x32xf32>
    %131 = arith.negf %115 : vector<16x32xf32>
    %132 = math.exp %131 : vector<16x32xf32>
    %cst_103 = arith.constant 1.000000e+00 : f32
    %133 = vector.broadcast %cst_103 : f32 to vector<16x32xf32>
    %134 = arith.addf %133, %132 : vector<16x32xf32>
    %135 = arith.divf %133, %134 : vector<16x32xf32>
    %136 = arith.negf %120 : vector<16x32xf32>
    %137 = math.exp %136 : vector<16x32xf32>
    %cst_104 = arith.constant 1.000000e+00 : f32
    %138 = vector.broadcast %cst_104 : f32 to vector<16x32xf32>
    %139 = arith.addf %138, %137 : vector<16x32xf32>
    %140 = arith.divf %138, %139 : vector<16x32xf32>
    %141 = math.tanh %125 : vector<16x32xf32>
    %142 = arith.negf %130 : vector<16x32xf32>
    %143 = math.exp %142 : vector<16x32xf32>
    %cst_105 = arith.constant 1.000000e+00 : f32
    %144 = vector.broadcast %cst_105 : f32 to vector<16x32xf32>
    %145 = arith.addf %144, %143 : vector<16x32xf32>
    %146 = arith.divf %144, %145 : vector<16x32xf32>
    %147 = arith.mulf %140, %104 : vector<16x32xf32>
    %148 = arith.mulf %135, %141 : vector<16x32xf32>
    %149 = arith.addf %147, %148 : vector<16x32xf32>
    %150 = math.tanh %149 : vector<16x32xf32>
    %151 = arith.mulf %146, %150 : vector<16x32xf32>
    %152 = arith.index_cast %c1_i32 : i32 to index
    %c0_106 = arith.constant 0 : index
    %c0_107 = arith.constant 0 : index
    %153 = vector.load %arg13[%152, %c0_106, %c0_107] : memref<8x16x32xf32, #tpu.memory_space<vmem>>, vector<1x16x32xf32>
    %154 = vector.shape_cast %153 : vector<1x16x32xf32> to vector<16x32xf32>
    %155 = vector.shape_cast %151 : vector<16x32xf32> to vector<1x16x32xf32>
    tpu.vector_store %arg13[%152, %c0_106, %c0_107], %155 {strides = array<i32>} : memref<8x16x32xf32, #tpu.memory_space<vmem>>, vector<1x16x32xf32>,
    %c2_i32 = arith.constant 2 : i32
    %c0_108 = arith.constant 0 : index
    %156 = arith.index_cast %c2_i32 : i32 to index
    %c0_109 = arith.constant 0 : index
    %c0_110 = arith.constant 0 : index
    %157 = vector.load %arg12[%c0_108, %156, %c0_109, %c0_110] : memref<4x8x16x32xf32, #tpu.memory_space<vmem>>, vector<1x1x16x32xf32>
    %158 = vector.shape_cast %157 : vector<1x1x16x32xf32> to vector<16x32xf32>
    %cst_111 = arith.constant dense<0.000000e+00> : vector<16x32xf32>
    %159 = tpu.matmul %151, %57, %cst_111 {dimension_numbers = #tpu.dot_dimension_numbers<[1], [0], [0], [1], [0, 0, 1, 1], [], []>} : vector<16x32xf32>, vector<32x32xf32>, vector<16x32xf32> -> vector<16x32xf32>
    %160 = arith.addf %158, %159 : vector<16x32xf32>
    %c1_112 = arith.constant 1 : index
    %161 = arith.index_cast %c2_i32 : i32 to index
    %c0_113 = arith.constant 0 : index
    %c0_114 = arith.constant 0 : index
    %162 = vector.load %arg12[%c1_112, %161, %c0_113, %c0_114] : memref<4x8x16x32xf32, #tpu.memory_space<vmem>>, vector<1x1x16x32xf32>
    %163 = vector.shape_cast %162 : vector<1x1x16x32xf32> to vector<16x32xf32>
    %cst_115 = arith.constant dense<0.000000e+00> : vector<16x32xf32>
    %164 = tpu.matmul %151, %59, %cst_115 {dimension_numbers = #tpu.dot_dimension_numbers<[1], [0], [0], [1], [0, 0, 1, 1], [], []>} : vector<16x32xf32>, vector<32x32xf32>, vector<16x32xf32> -> vector<16x32xf32>
    %165 = arith.addf %163, %164 : vector<16x32xf32>
    %c2_116 = arith.constant 2 : index
    %166 = arith.index_cast %c2_i32 : i32 to index
    %c0_117 = arith.constant 0 : index
    %c0_118 = arith.constant 0 : index
    %167 = vector.load %arg12[%c2_116, %166, %c0_117, %c0_118] : memref<4x8x16x32xf32, #tpu.memory_space<vmem>>, vector<1x1x16x32xf32>
    %168 = vector.shape_cast %167 : vector<1x1x16x32xf32> to vector<16x32xf32>
    %cst_119 = arith.constant dense<0.000000e+00> : vector<16x32xf32>
    %169 = tpu.matmul %151, %61, %cst_119 {dimension_numbers = #tpu.dot_dimension_numbers<[1], [0], [0], [1], [0, 0, 1, 1], [], []>} : vector<16x32xf32>, vector<32x32xf32>, vector<16x32xf32> -> vector<16x32xf32>
    %170 = arith.addf %168, %169 : vector<16x32xf32>
    %c3_120 = arith.constant 3 : index
    %171 = arith.index_cast %c2_i32 : i32 to index
    %c0_121 = arith.constant 0 : index
    %c0_122 = arith.constant 0 : index
    %172 = vector.load %arg12[%c3_120, %171, %c0_121, %c0_122] : memref<4x8x16x32xf32, #tpu.memory_space<vmem>>, vector<1x1x16x32xf32>
    %173 = vector.shape_cast %172 : vector<1x1x16x32xf32> to vector<16x32xf32>
    %cst_123 = arith.constant dense<0.000000e+00> : vector<16x32xf32>
    %174 = tpu.matmul %151, %63, %cst_123 {dimension_numbers = #tpu.dot_dimension_numbers<[1], [0], [0], [1], [0, 0, 1, 1], [], []>} : vector<16x32xf32>, vector<32x32xf32>, vector<16x32xf32> -> vector<16x32xf32>
    %175 = arith.addf %173, %174 : vector<16x32xf32>
    %176 = arith.negf %160 : vector<16x32xf32>
    %177 = math.exp %176 : vector<16x32xf32>
    %cst_124 = arith.constant 1.000000e+00 : f32
    %178 = vector.broadcast %cst_124 : f32 to vector<16x32xf32>
    %179 = arith.addf %178, %177 : vector<16x32xf32>
    %180 = arith.divf %178, %179 : vector<16x32xf32>
    %181 = arith.negf %165 : vector<16x32xf32>
    %182 = math.exp %181 : vector<16x32xf32>
    %cst_125 = arith.constant 1.000000e+00 : f32
    %183 = vector.broadcast %cst_125 : f32 to vector<16x32xf32>
    %184 = arith.addf %183, %182 : vector<16x32xf32>
    %185 = arith.divf %183, %184 : vector<16x32xf32>
    %186 = math.tanh %170 : vector<16x32xf32>
    %187 = arith.negf %175 : vector<16x32xf32>
    %188 = math.exp %187 : vector<16x32xf32>
    %cst_126 = arith.constant 1.000000e+00 : f32
    %189 = vector.broadcast %cst_126 : f32 to vector<16x32xf32>
    %190 = arith.addf %189, %188 : vector<16x32xf32>
    %191 = arith.divf %189, %190 : vector<16x32xf32>
    %192 = arith.mulf %185, %149 : vector<16x32xf32>
    %193 = arith.mulf %180, %186 : vector<16x32xf32>
    %194 = arith.addf %192, %193 : vector<16x32xf32>
    %195 = math.tanh %194 : vector<16x32xf32>
    %196 = arith.mulf %191, %195 : vector<16x32xf32>
    %197 = arith.index_cast %c2_i32 : i32 to index
    %c0_127 = arith.constant 0 : index
    %c0_128 = arith.constant 0 : index
    %198 = vector.load %arg13[%197, %c0_127, %c0_128] : memref<8x16x32xf32, #tpu.memory_space<vmem>>, vector<1x16x32xf32>
    %199 = vector.shape_cast %198 : vector<1x16x32xf32> to vector<16x32xf32>
    %200 = vector.shape_cast %196 : vector<16x32xf32> to vector<1x16x32xf32>
    tpu.vector_store %arg13[%197, %c0_127, %c0_128], %200 {strides = array<i32>} : memref<8x16x32xf32, #tpu.memory_space<vmem>>, vector<1x16x32xf32>,
    %c3_i32 = arith.constant 3 : i32
    %c0_129 = arith.constant 0 : index
    %201 = arith.index_cast %c3_i32 : i32 to index
    %c0_130 = arith.constant 0 : index
    %c0_131 = arith.constant 0 : index
    %202 = vector.load %arg12[%c0_129, %201, %c0_130, %c0_131] : memref<4x8x16x32xf32, #tpu.memory_space<vmem>>, vector<1x1x16x32xf32>
    %203 = vector.shape_cast %202 : vector<1x1x16x32xf32> to vector<16x32xf32>
    %cst_132 = arith.constant dense<0.000000e+00> : vector<16x32xf32>
    %204 = tpu.matmul %196, %57, %cst_132 {dimension_numbers = #tpu.dot_dimension_numbers<[1], [0], [0], [1], [0, 0, 1, 1], [], []>} : vector<16x32xf32>, vector<32x32xf32>, vector<16x32xf32> -> vector<16x32xf32>
    %205 = arith.addf %203, %204 : vector<16x32xf32>
    %c1_133 = arith.constant 1 : index
    %206 = arith.index_cast %c3_i32 : i32 to index
    %c0_134 = arith.constant 0 : index
    %c0_135 = arith.constant 0 : index
    %207 = vector.load %arg12[%c1_133, %206, %c0_134, %c0_135] : memref<4x8x16x32xf32, #tpu.memory_space<vmem>>, vector<1x1x16x32xf32>
    %208 = vector.shape_cast %207 : vector<1x1x16x32xf32> to vector<16x32xf32>
    %cst_136 = arith.constant dense<0.000000e+00> : vector<16x32xf32>
    %209 = tpu.matmul %196, %59, %cst_136 {dimension_numbers = #tpu.dot_dimension_numbers<[1], [0], [0], [1], [0, 0, 1, 1], [], []>} : vector<16x32xf32>, vector<32x32xf32>, vector<16x32xf32> -> vector<16x32xf32>
    %210 = arith.addf %208, %209 : vector<16x32xf32>
    %c2_137 = arith.constant 2 : index
    %211 = arith.index_cast %c3_i32 : i32 to index
    %c0_138 = arith.constant 0 : index
    %c0_139 = arith.constant 0 : index
    %212 = vector.load %arg12[%c2_137, %211, %c0_138, %c0_139] : memref<4x8x16x32xf32, #tpu.memory_space<vmem>>, vector<1x1x16x32xf32>
    %213 = vector.shape_cast %212 : vector<1x1x16x32xf32> to vector<16x32xf32>
    %cst_140 = arith.constant dense<0.000000e+00> : vector<16x32xf32>
    %214 = tpu.matmul %196, %61, %cst_140 {dimension_numbers = #tpu.dot_dimension_numbers<[1], [0], [0], [1], [0, 0, 1, 1], [], []>} : vector<16x32xf32>, vector<32x32xf32>, vector<16x32xf32> -> vector<16x32xf32>
    %215 = arith.addf %213, %214 : vector<16x32xf32>
    %c3_141 = arith.constant 3 : index
    %216 = arith.index_cast %c3_i32 : i32 to index
    %c0_142 = arith.constant 0 : index
    %c0_143 = arith.constant 0 : index
    %217 = vector.load %arg12[%c3_141, %216, %c0_142, %c0_143] : memref<4x8x16x32xf32, #tpu.memory_space<vmem>>, vector<1x1x16x32xf32>
    %218 = vector.shape_cast %217 : vector<1x1x16x32xf32> to vector<16x32xf32>
    %cst_144 = arith.constant dense<0.000000e+00> : vector<16x32xf32>
    %219 = tpu.matmul %196, %63, %cst_144 {dimension_numbers = #tpu.dot_dimension_numbers<[1], [0], [0], [1], [0, 0, 1, 1], [], []>} : vector<16x32xf32>, vector<32x32xf32>, vector<16x32xf32> -> vector<16x32xf32>
    %220 = arith.addf %218, %219 : vector<16x32xf32>
    %221 = arith.negf %205 : vector<16x32xf32>
    %222 = math.exp %221 : vector<16x32xf32>
    %cst_145 = arith.constant 1.000000e+00 : f32
    %223 = vector.broadcast %cst_145 : f32 to vector<16x32xf32>
    %224 = arith.addf %223, %222 : vector<16x32xf32>
    %225 = arith.divf %223, %224 : vector<16x32xf32>
    %226 = arith.negf %210 : vector<16x32xf32>
    %227 = math.exp %226 : vector<16x32xf32>
    %cst_146 = arith.constant 1.000000e+00 : f32
    %228 = vector.broadcast %cst_146 : f32 to vector<16x32xf32>
    %229 = arith.addf %228, %227 : vector<16x32xf32>
    %230 = arith.divf %228, %229 : vector<16x32xf32>
    %231 = math.tanh %215 : vector<16x32xf32>
    %232 = arith.negf %220 : vector<16x32xf32>
    %233 = math.exp %232 : vector<16x32xf32>
    %cst_147 = arith.constant 1.000000e+00 : f32
    %234 = vector.broadcast %cst_147 : f32 to vector<16x32xf32>
    %235 = arith.addf %234, %233 : vector<16x32xf32>
    %236 = arith.divf %234, %235 : vector<16x32xf32>
    %237 = arith.mulf %230, %194 : vector<16x32xf32>
    %238 = arith.mulf %225, %231 : vector<16x32xf32>
    %239 = arith.addf %237, %238 : vector<16x32xf32>
    %240 = math.tanh %239 : vector<16x32xf32>
    %241 = arith.mulf %236, %240 : vector<16x32xf32>
    %242 = arith.index_cast %c3_i32 : i32 to index
    %c0_148 = arith.constant 0 : index
    %c0_149 = arith.constant 0 : index
    %243 = vector.load %arg13[%242, %c0_148, %c0_149] : memref<8x16x32xf32, #tpu.memory_space<vmem>>, vector<1x16x32xf32>
    %244 = vector.shape_cast %243 : vector<1x16x32xf32> to vector<16x32xf32>
    %245 = vector.shape_cast %241 : vector<16x32xf32> to vector<1x16x32xf32>
    tpu.vector_store %arg13[%242, %c0_148, %c0_149], %245 {strides = array<i32>} : memref<8x16x32xf32, #tpu.memory_space<vmem>>, vector<1x16x32xf32>,
    %c4_i32 = arith.constant 4 : i32
    %c0_150 = arith.constant 0 : index
    %246 = arith.index_cast %c4_i32 : i32 to index
    %c0_151 = arith.constant 0 : index
    %c0_152 = arith.constant 0 : index
    %247 = vector.load %arg12[%c0_150, %246, %c0_151, %c0_152] : memref<4x8x16x32xf32, #tpu.memory_space<vmem>>, vector<1x1x16x32xf32>
    %248 = vector.shape_cast %247 : vector<1x1x16x32xf32> to vector<16x32xf32>
    %cst_153 = arith.constant dense<0.000000e+00> : vector<16x32xf32>
    %249 = tpu.matmul %241, %57, %cst_153 {dimension_numbers = #tpu.dot_dimension_numbers<[1], [0], [0], [1], [0, 0, 1, 1], [], []>} : vector<16x32xf32>, vector<32x32xf32>, vector<16x32xf32> -> vector<16x32xf32>
    %250 = arith.addf %248, %249 : vector<16x32xf32>
    %c1_154 = arith.constant 1 : index
    %251 = arith.index_cast %c4_i32 : i32 to index
    %c0_155 = arith.constant 0 : index
    %c0_156 = arith.constant 0 : index
    %252 = vector.load %arg12[%c1_154, %251, %c0_155, %c0_156] : memref<4x8x16x32xf32, #tpu.memory_space<vmem>>, vector<1x1x16x32xf32>
    %253 = vector.shape_cast %252 : vector<1x1x16x32xf32> to vector<16x32xf32>
    %cst_157 = arith.constant dense<0.000000e+00> : vector<16x32xf32>
    %254 = tpu.matmul %241, %59, %cst_157 {dimension_numbers = #tpu.dot_dimension_numbers<[1], [0], [0], [1], [0, 0, 1, 1], [], []>} : vector<16x32xf32>, vector<32x32xf32>, vector<16x32xf32> -> vector<16x32xf32>
    %255 = arith.addf %253, %254 : vector<16x32xf32>
    %c2_158 = arith.constant 2 : index
    %256 = arith.index_cast %c4_i32 : i32 to index
    %c0_159 = arith.constant 0 : index
    %c0_160 = arith.constant 0 : index
    %257 = vector.load %arg12[%c2_158, %256, %c0_159, %c0_160] : memref<4x8x16x32xf32, #tpu.memory_space<vmem>>, vector<1x1x16x32xf32>
    %258 = vector.shape_cast %257 : vector<1x1x16x32xf32> to vector<16x32xf32>
    %cst_161 = arith.constant dense<0.000000e+00> : vector<16x32xf32>
    %259 = tpu.matmul %241, %61, %cst_161 {dimension_numbers = #tpu.dot_dimension_numbers<[1], [0], [0], [1], [0, 0, 1, 1], [], []>} : vector<16x32xf32>, vector<32x32xf32>, vector<16x32xf32> -> vector<16x32xf32>
    %260 = arith.addf %258, %259 : vector<16x32xf32>
    %c3_162 = arith.constant 3 : index
    %261 = arith.index_cast %c4_i32 : i32 to index
    %c0_163 = arith.constant 0 : index
    %c0_164 = arith.constant 0 : index
    %262 = vector.load %arg12[%c3_162, %261, %c0_163, %c0_164] : memref<4x8x16x32xf32, #tpu.memory_space<vmem>>, vector<1x1x16x32xf32>
    %263 = vector.shape_cast %262 : vector<1x1x16x32xf32> to vector<16x32xf32>
    %cst_165 = arith.constant dense<0.000000e+00> : vector<16x32xf32>
    %264 = tpu.matmul %241, %63, %cst_165 {dimension_numbers = #tpu.dot_dimension_numbers<[1], [0], [0], [1], [0, 0, 1, 1], [], []>} : vector<16x32xf32>, vector<32x32xf32>, vector<16x32xf32> -> vector<16x32xf32>
    %265 = arith.addf %263, %264 : vector<16x32xf32>
    %266 = arith.negf %250 : vector<16x32xf32>
    %267 = math.exp %266 : vector<16x32xf32>
    %cst_166 = arith.constant 1.000000e+00 : f32
    %268 = vector.broadcast %cst_166 : f32 to vector<16x32xf32>
    %269 = arith.addf %268, %267 : vector<16x32xf32>
    %270 = arith.divf %268, %269 : vector<16x32xf32>
    %271 = arith.negf %255 : vector<16x32xf32>
    %272 = math.exp %271 : vector<16x32xf32>
    %cst_167 = arith.constant 1.000000e+00 : f32
    %273 = vector.broadcast %cst_167 : f32 to vector<16x32xf32>
    %274 = arith.addf %273, %272 : vector<16x32xf32>
    %275 = arith.divf %273, %274 : vector<16x32xf32>
    %276 = math.tanh %260 : vector<16x32xf32>
    %277 = arith.negf %265 : vector<16x32xf32>
    %278 = math.exp %277 : vector<16x32xf32>
    %cst_168 = arith.constant 1.000000e+00 : f32
    %279 = vector.broadcast %cst_168 : f32 to vector<16x32xf32>
    %280 = arith.addf %279, %278 : vector<16x32xf32>
    %281 = arith.divf %279, %280 : vector<16x32xf32>
    %282 = arith.mulf %275, %239 : vector<16x32xf32>
    %283 = arith.mulf %270, %276 : vector<16x32xf32>
    %284 = arith.addf %282, %283 : vector<16x32xf32>
    %285 = math.tanh %284 : vector<16x32xf32>
    %286 = arith.mulf %281, %285 : vector<16x32xf32>
    %287 = arith.index_cast %c4_i32 : i32 to index
    %c0_169 = arith.constant 0 : index
    %c0_170 = arith.constant 0 : index
    %288 = vector.load %arg13[%287, %c0_169, %c0_170] : memref<8x16x32xf32, #tpu.memory_space<vmem>>, vector<1x16x32xf32>
    %289 = vector.shape_cast %288 : vector<1x16x32xf32> to vector<16x32xf32>
    %290 = vector.shape_cast %286 : vector<16x32xf32> to vector<1x16x32xf32>
    tpu.vector_store %arg13[%287, %c0_169, %c0_170], %290 {strides = array<i32>} : memref<8x16x32xf32, #tpu.memory_space<vmem>>, vector<1x16x32xf32>,
    %c5_i32 = arith.constant 5 : i32
    %c0_171 = arith.constant 0 : index
    %291 = arith.index_cast %c5_i32 : i32 to index
    %c0_172 = arith.constant 0 : index
    %c0_173 = arith.constant 0 : index
    %292 = vector.load %arg12[%c0_171, %291, %c0_172, %c0_173] : memref<4x8x16x32xf32, #tpu.memory_space<vmem>>, vector<1x1x16x32xf32>
    %293 = vector.shape_cast %292 : vector<1x1x16x32xf32> to vector<16x32xf32>
    %cst_174 = arith.constant dense<0.000000e+00> : vector<16x32xf32>
    %294 = tpu.matmul %286, %57, %cst_174 {dimension_numbers = #tpu.dot_dimension_numbers<[1], [0], [0], [1], [0, 0, 1, 1], [], []>} : vector<16x32xf32>, vector<32x32xf32>, vector<16x32xf32> -> vector<16x32xf32>
    %295 = arith.addf %293, %294 : vector<16x32xf32>
    %c1_175 = arith.constant 1 : index
    %296 = arith.index_cast %c5_i32 : i32 to index
    %c0_176 = arith.constant 0 : index
    %c0_177 = arith.constant 0 : index
    %297 = vector.load %arg12[%c1_175, %296, %c0_176, %c0_177] : memref<4x8x16x32xf32, #tpu.memory_space<vmem>>, vector<1x1x16x32xf32>
    %298 = vector.shape_cast %297 : vector<1x1x16x32xf32> to vector<16x32xf32>
    %cst_178 = arith.constant dense<0.000000e+00> : vector<16x32xf32>
    %299 = tpu.matmul %286, %59, %cst_178 {dimension_numbers = #tpu.dot_dimension_numbers<[1], [0], [0], [1], [0, 0, 1, 1], [], []>} : vector<16x32xf32>, vector<32x32xf32>, vector<16x32xf32> -> vector<16x32xf32>
    %300 = arith.addf %298, %299 : vector<16x32xf32>
    %c2_179 = arith.constant 2 : index
    %301 = arith.index_cast %c5_i32 : i32 to index
    %c0_180 = arith.constant 0 : index
    %c0_181 = arith.constant 0 : index
    %302 = vector.load %arg12[%c2_179, %301, %c0_180, %c0_181] : memref<4x8x16x32xf32, #tpu.memory_space<vmem>>, vector<1x1x16x32xf32>
    %303 = vector.shape_cast %302 : vector<1x1x16x32xf32> to vector<16x32xf32>
    %cst_182 = arith.constant dense<0.000000e+00> : vector<16x32xf32>
    %304 = tpu.matmul %286, %61, %cst_182 {dimension_numbers = #tpu.dot_dimension_numbers<[1], [0], [0], [1], [0, 0, 1, 1], [], []>} : vector<16x32xf32>, vector<32x32xf32>, vector<16x32xf32> -> vector<16x32xf32>
    %305 = arith.addf %303, %304 : vector<16x32xf32>
    %c3_183 = arith.constant 3 : index
    %306 = arith.index_cast %c5_i32 : i32 to index
    %c0_184 = arith.constant 0 : index
    %c0_185 = arith.constant 0 : index
    %307 = vector.load %arg12[%c3_183, %306, %c0_184, %c0_185] : memref<4x8x16x32xf32, #tpu.memory_space<vmem>>, vector<1x1x16x32xf32>
    %308 = vector.shape_cast %307 : vector<1x1x16x32xf32> to vector<16x32xf32>
    %cst_186 = arith.constant dense<0.000000e+00> : vector<16x32xf32>
    %309 = tpu.matmul %286, %63, %cst_186 {dimension_numbers = #tpu.dot_dimension_numbers<[1], [0], [0], [1], [0, 0, 1, 1], [], []>} : vector<16x32xf32>, vector<32x32xf32>, vector<16x32xf32> -> vector<16x32xf32>
    %310 = arith.addf %308, %309 : vector<16x32xf32>
    %311 = arith.negf %295 : vector<16x32xf32>
    %312 = math.exp %311 : vector<16x32xf32>
    %cst_187 = arith.constant 1.000000e+00 : f32
    %313 = vector.broadcast %cst_187 : f32 to vector<16x32xf32>
    %314 = arith.addf %313, %312 : vector<16x32xf32>
    %315 = arith.divf %313, %314 : vector<16x32xf32>
    %316 = arith.negf %300 : vector<16x32xf32>
    %317 = math.exp %316 : vector<16x32xf32>
    %cst_188 = arith.constant 1.000000e+00 : f32
    %318 = vector.broadcast %cst_188 : f32 to vector<16x32xf32>
    %319 = arith.addf %318, %317 : vector<16x32xf32>
    %320 = arith.divf %318, %319 : vector<16x32xf32>
    %321 = math.tanh %305 : vector<16x32xf32>
    %322 = arith.negf %310 : vector<16x32xf32>
    %323 = math.exp %322 : vector<16x32xf32>
    %cst_189 = arith.constant 1.000000e+00 : f32
    %324 = vector.broadcast %cst_189 : f32 to vector<16x32xf32>
    %325 = arith.addf %324, %323 : vector<16x32xf32>
    %326 = arith.divf %324, %325 : vector<16x32xf32>
    %327 = arith.mulf %320, %284 : vector<16x32xf32>
    %328 = arith.mulf %315, %321 : vector<16x32xf32>
    %329 = arith.addf %327, %328 : vector<16x32xf32>
    %330 = math.tanh %329 : vector<16x32xf32>
    %331 = arith.mulf %326, %330 : vector<16x32xf32>
    %332 = arith.index_cast %c5_i32 : i32 to index
    %c0_190 = arith.constant 0 : index
    %c0_191 = arith.constant 0 : index
    %333 = vector.load %arg13[%332, %c0_190, %c0_191] : memref<8x16x32xf32, #tpu.memory_space<vmem>>, vector<1x16x32xf32>
    %334 = vector.shape_cast %333 : vector<1x16x32xf32> to vector<16x32xf32>
    %335 = vector.shape_cast %331 : vector<16x32xf32> to vector<1x16x32xf32>
    tpu.vector_store %arg13[%332, %c0_190, %c0_191], %335 {strides = array<i32>} : memref<8x16x32xf32, #tpu.memory_space<vmem>>, vector<1x16x32xf32>,
    %c6_i32 = arith.constant 6 : i32
    %c0_192 = arith.constant 0 : index
    %336 = arith.index_cast %c6_i32 : i32 to index
    %c0_193 = arith.constant 0 : index
    %c0_194 = arith.constant 0 : index
    %337 = vector.load %arg12[%c0_192, %336, %c0_193, %c0_194] : memref<4x8x16x32xf32, #tpu.memory_space<vmem>>, vector<1x1x16x32xf32>
    %338 = vector.shape_cast %337 : vector<1x1x16x32xf32> to vector<16x32xf32>
    %cst_195 = arith.constant dense<0.000000e+00> : vector<16x32xf32>
    %339 = tpu.matmul %331, %57, %cst_195 {dimension_numbers = #tpu.dot_dimension_numbers<[1], [0], [0], [1], [0, 0, 1, 1], [], []>} : vector<16x32xf32>, vector<32x32xf32>, vector<16x32xf32> -> vector<16x32xf32>
    %340 = arith.addf %338, %339 : vector<16x32xf32>
    %c1_196 = arith.constant 1 : index
    %341 = arith.index_cast %c6_i32 : i32 to index
    %c0_197 = arith.constant 0 : index
    %c0_198 = arith.constant 0 : index
    %342 = vector.load %arg12[%c1_196, %341, %c0_197, %c0_198] : memref<4x8x16x32xf32, #tpu.memory_space<vmem>>, vector<1x1x16x32xf32>
    %343 = vector.shape_cast %342 : vector<1x1x16x32xf32> to vector<16x32xf32>
    %cst_199 = arith.constant dense<0.000000e+00> : vector<16x32xf32>
    %344 = tpu.matmul %331, %59, %cst_199 {dimension_numbers = #tpu.dot_dimension_numbers<[1], [0], [0], [1], [0, 0, 1, 1], [], []>} : vector<16x32xf32>, vector<32x32xf32>, vector<16x32xf32> -> vector<16x32xf32>
    %345 = arith.addf %343, %344 : vector<16x32xf32>
    %c2_200 = arith.constant 2 : index
    %346 = arith.index_cast %c6_i32 : i32 to index
    %c0_201 = arith.constant 0 : index
    %c0_202 = arith.constant 0 : index
    %347 = vector.load %arg12[%c2_200, %346, %c0_201, %c0_202] : memref<4x8x16x32xf32, #tpu.memory_space<vmem>>, vector<1x1x16x32xf32>
    %348 = vector.shape_cast %347 : vector<1x1x16x32xf32> to vector<16x32xf32>
    %cst_203 = arith.constant dense<0.000000e+00> : vector<16x32xf32>
    %349 = tpu.matmul %331, %61, %cst_203 {dimension_numbers = #tpu.dot_dimension_numbers<[1], [0], [0], [1], [0, 0, 1, 1], [], []>} : vector<16x32xf32>, vector<32x32xf32>, vector<16x32xf32> -> vector<16x32xf32>
    %350 = arith.addf %348, %349 : vector<16x32xf32>
    %c3_204 = arith.constant 3 : index
    %351 = arith.index_cast %c6_i32 : i32 to index
    %c0_205 = arith.constant 0 : index
    %c0_206 = arith.constant 0 : index
    %352 = vector.load %arg12[%c3_204, %351, %c0_205, %c0_206] : memref<4x8x16x32xf32, #tpu.memory_space<vmem>>, vector<1x1x16x32xf32>
    %353 = vector.shape_cast %352 : vector<1x1x16x32xf32> to vector<16x32xf32>
    %cst_207 = arith.constant dense<0.000000e+00> : vector<16x32xf32>
    %354 = tpu.matmul %331, %63, %cst_207 {dimension_numbers = #tpu.dot_dimension_numbers<[1], [0], [0], [1], [0, 0, 1, 1], [], []>} : vector<16x32xf32>, vector<32x32xf32>, vector<16x32xf32> -> vector<16x32xf32>
    %355 = arith.addf %353, %354 : vector<16x32xf32>
    %356 = arith.negf %340 : vector<16x32xf32>
    %357 = math.exp %356 : vector<16x32xf32>
    %cst_208 = arith.constant 1.000000e+00 : f32
    %358 = vector.broadcast %cst_208 : f32 to vector<16x32xf32>
    %359 = arith.addf %358, %357 : vector<16x32xf32>
    %360 = arith.divf %358, %359 : vector<16x32xf32>
    %361 = arith.negf %345 : vector<16x32xf32>
    %362 = math.exp %361 : vector<16x32xf32>
    %cst_209 = arith.constant 1.000000e+00 : f32
    %363 = vector.broadcast %cst_209 : f32 to vector<16x32xf32>
    %364 = arith.addf %363, %362 : vector<16x32xf32>
    %365 = arith.divf %363, %364 : vector<16x32xf32>
    %366 = math.tanh %350 : vector<16x32xf32>
    %367 = arith.negf %355 : vector<16x32xf32>
    %368 = math.exp %367 : vector<16x32xf32>
    %cst_210 = arith.constant 1.000000e+00 : f32
    %369 = vector.broadcast %cst_210 : f32 to vector<16x32xf32>
    %370 = arith.addf %369, %368 : vector<16x32xf32>
    %371 = arith.divf %369, %370 : vector<16x32xf32>
    %372 = arith.mulf %365, %329 : vector<16x32xf32>
    %373 = arith.mulf %360, %366 : vector<16x32xf32>
    %374 = arith.addf %372, %373 : vector<16x32xf32>
    %375 = math.tanh %374 : vector<16x32xf32>
    %376 = arith.mulf %371, %375 : vector<16x32xf32>
    %377 = arith.index_cast %c6_i32 : i32 to index
    %c0_211 = arith.constant 0 : index
    %c0_212 = arith.constant 0 : index
    %378 = vector.load %arg13[%377, %c0_211, %c0_212] : memref<8x16x32xf32, #tpu.memory_space<vmem>>, vector<1x16x32xf32>
    %379 = vector.shape_cast %378 : vector<1x16x32xf32> to vector<16x32xf32>
    %380 = vector.shape_cast %376 : vector<16x32xf32> to vector<1x16x32xf32>
    tpu.vector_store %arg13[%377, %c0_211, %c0_212], %380 {strides = array<i32>} : memref<8x16x32xf32, #tpu.memory_space<vmem>>, vector<1x16x32xf32>,
    %c7_i32 = arith.constant 7 : i32
    %c0_213 = arith.constant 0 : index
    %381 = arith.index_cast %c7_i32 : i32 to index
    %c0_214 = arith.constant 0 : index
    %c0_215 = arith.constant 0 : index
    %382 = vector.load %arg12[%c0_213, %381, %c0_214, %c0_215] : memref<4x8x16x32xf32, #tpu.memory_space<vmem>>, vector<1x1x16x32xf32>
    %383 = vector.shape_cast %382 : vector<1x1x16x32xf32> to vector<16x32xf32>
    %cst_216 = arith.constant dense<0.000000e+00> : vector<16x32xf32>
    %384 = tpu.matmul %376, %57, %cst_216 {dimension_numbers = #tpu.dot_dimension_numbers<[1], [0], [0], [1], [0, 0, 1, 1], [], []>} : vector<16x32xf32>, vector<32x32xf32>, vector<16x32xf32> -> vector<16x32xf32>
    %385 = arith.addf %383, %384 : vector<16x32xf32>
    %c1_217 = arith.constant 1 : index
    %386 = arith.index_cast %c7_i32 : i32 to index
    %c0_218 = arith.constant 0 : index
    %c0_219 = arith.constant 0 : index
    %387 = vector.load %arg12[%c1_217, %386, %c0_218, %c0_219] : memref<4x8x16x32xf32, #tpu.memory_space<vmem>>, vector<1x1x16x32xf32>
    %388 = vector.shape_cast %387 : vector<1x1x16x32xf32> to vector<16x32xf32>
    %cst_220 = arith.constant dense<0.000000e+00> : vector<16x32xf32>
    %389 = tpu.matmul %376, %59, %cst_220 {dimension_numbers = #tpu.dot_dimension_numbers<[1], [0], [0], [1], [0, 0, 1, 1], [], []>} : vector<16x32xf32>, vector<32x32xf32>, vector<16x32xf32> -> vector<16x32xf32>
    %390 = arith.addf %388, %389 : vector<16x32xf32>
    %c2_221 = arith.constant 2 : index
    %391 = arith.index_cast %c7_i32 : i32 to index
    %c0_222 = arith.constant 0 : index
    %c0_223 = arith.constant 0 : index
    %392 = vector.load %arg12[%c2_221, %391, %c0_222, %c0_223] : memref<4x8x16x32xf32, #tpu.memory_space<vmem>>, vector<1x1x16x32xf32>
    %393 = vector.shape_cast %392 : vector<1x1x16x32xf32> to vector<16x32xf32>
    %cst_224 = arith.constant dense<0.000000e+00> : vector<16x32xf32>
    %394 = tpu.matmul %376, %61, %cst_224 {dimension_numbers = #tpu.dot_dimension_numbers<[1], [0], [0], [1], [0, 0, 1, 1], [], []>} : vector<16x32xf32>, vector<32x32xf32>, vector<16x32xf32> -> vector<16x32xf32>
    %395 = arith.addf %393, %394 : vector<16x32xf32>
    %c3_225 = arith.constant 3 : index
    %396 = arith.index_cast %c7_i32 : i32 to index
    %c0_226 = arith.constant 0 : index
    %c0_227 = arith.constant 0 : index
    %397 = vector.load %arg12[%c3_225, %396, %c0_226, %c0_227] : memref<4x8x16x32xf32, #tpu.memory_space<vmem>>, vector<1x1x16x32xf32>
    %398 = vector.shape_cast %397 : vector<1x1x16x32xf32> to vector<16x32xf32>
    %cst_228 = arith.constant dense<0.000000e+00> : vector<16x32xf32>
    %399 = tpu.matmul %376, %63, %cst_228 {dimension_numbers = #tpu.dot_dimension_numbers<[1], [0], [0], [1], [0, 0, 1, 1], [], []>} : vector<16x32xf32>, vector<32x32xf32>, vector<16x32xf32> -> vector<16x32xf32>
    %400 = arith.addf %398, %399 : vector<16x32xf32>
    %401 = arith.negf %385 : vector<16x32xf32>
    %402 = math.exp %401 : vector<16x32xf32>
    %cst_229 = arith.constant 1.000000e+00 : f32
    %403 = vector.broadcast %cst_229 : f32 to vector<16x32xf32>
    %404 = arith.addf %403, %402 : vector<16x32xf32>
    %405 = arith.divf %403, %404 : vector<16x32xf32>
    %406 = arith.negf %390 : vector<16x32xf32>
    %407 = math.exp %406 : vector<16x32xf32>
    %cst_230 = arith.constant 1.000000e+00 : f32
    %408 = vector.broadcast %cst_230 : f32 to vector<16x32xf32>
    %409 = arith.addf %408, %407 : vector<16x32xf32>
    %410 = arith.divf %408, %409 : vector<16x32xf32>
    %411 = math.tanh %395 : vector<16x32xf32>
    %412 = arith.negf %400 : vector<16x32xf32>
    %413 = math.exp %412 : vector<16x32xf32>
    %cst_231 = arith.constant 1.000000e+00 : f32
    %414 = vector.broadcast %cst_231 : f32 to vector<16x32xf32>
    %415 = arith.addf %414, %413 : vector<16x32xf32>
    %416 = arith.divf %414, %415 : vector<16x32xf32>
    %417 = arith.mulf %410, %374 : vector<16x32xf32>
    %418 = arith.mulf %405, %411 : vector<16x32xf32>
    %419 = arith.addf %417, %418 : vector<16x32xf32>
    %420 = math.tanh %419 : vector<16x32xf32>
    %421 = arith.mulf %416, %420 : vector<16x32xf32>
    %422 = arith.index_cast %c7_i32 : i32 to index
    %c0_232 = arith.constant 0 : index
    %c0_233 = arith.constant 0 : index
    %423 = vector.load %arg13[%422, %c0_232, %c0_233] : memref<8x16x32xf32, #tpu.memory_space<vmem>>, vector<1x16x32xf32>
    %424 = vector.shape_cast %423 : vector<1x16x32xf32> to vector<16x32xf32>
    %425 = vector.shape_cast %421 : vector<16x32xf32> to vector<1x16x32xf32>
    tpu.vector_store %arg13[%422, %c0_232, %c0_233], %425 {strides = array<i32>} : memref<8x16x32xf32, #tpu.memory_space<vmem>>, vector<1x16x32xf32>,
    %c8_i32 = arith.constant 8 : i32
    %c0_234 = arith.constant 0 : index
    %c0_235 = arith.constant 0 : index
    %426 = vector.load %arg10[%c0_234, %c0_235] : memref<16x32xf32, #tpu.memory_space<vmem>>, vector<16x32xf32>
    tpu.vector_store %arg10[%c0_234, %c0_235], %421 {strides = array<i32>} : memref<16x32xf32, #tpu.memory_space<vmem>>, vector<16x32xf32>,
    %c0_236 = arith.constant 0 : index
    %c0_237 = arith.constant 0 : index
    %427 = vector.load %arg11[%c0_236, %c0_237] : memref<16x32xf32, #tpu.memory_space<vmem>>, vector<16x32xf32>
    tpu.vector_store %arg11[%c0_236, %c0_237], %419 {strides = array<i32>} : memref<16x32xf32, #tpu.memory_space<vmem>>, vector<16x32xf32>,
    %c0_238 = arith.constant 0 : index
    %c0_239 = arith.constant 0 : index
    %c0_240 = arith.constant 0 : index
    %428 = vector.load %arg13[%c0_238, %c0_239, %c0_240] : memref<8x16x32xf32, #tpu.memory_space<vmem>>, vector<8x16x32xf32>
    %429 = vector.shape_cast %428 : vector<8x16x32xf32> to vector<128x32xf32>
    %c0_241 = arith.constant 0 : index
    %c0_242 = arith.constant 0 : index
    %430 = vector.load %arg7[%c0_241, %c0_242] : memref<32x2xf32, #tpu.memory_space<vmem>>, vector<32x2xf32>
    %cst_243 = arith.constant dense<0.000000e+00> : vector<128x2xf32>
    %431 = tpu.matmul %429, %430, %cst_243 {dimension_numbers = #tpu.dot_dimension_numbers<[1], [0], [0], [1], [0, 0, 1, 1], [], []>} : vector<128x32xf32>, vector<32x2xf32>, vector<128x2xf32> -> vector<128x2xf32>
    %c0_244 = arith.constant 0 : index
    %c0_245 = arith.constant 0 : index
    %432 = vector.load %arg8[%c0_244, %c0_245] : memref<1x2xf32, #tpu.memory_space<vmem>>, vector<1x2xf32>
    %433 = vector.broadcast %432 : vector<1x2xf32> to vector<128x2xf32>
    %434 = arith.addf %431, %433 : vector<128x2xf32>
    %435 = vector.shape_cast %434 : vector<128x2xf32> to vector<8x16x2xf32>
    %c0_246 = arith.constant 0 : index
    %c0_247 = arith.constant 0 : index
    %c0_248 = arith.constant 0 : index
    %436 = vector.load %arg9[%c0_246, %c0_247, %c0_248] : memref<8x16x2xf32, #tpu.memory_space<vmem>>, vector<8x16x2xf32>
    tpu.vector_store %arg9[%c0_246, %c0_247, %c0_248], %435 {strides = array<i32>} : memref<8x16x2xf32, #tpu.memory_space<vmem>>, vector<8x16x2xf32>,
    return
  }
  func.func @transform_0(%arg0: i32) -> (i32, i32, i32) {
    %c0_i32 = arith.constant 0 : i32
    %c0_i32_0 = arith.constant 0 : i32
    %c0_i32_1 = arith.constant 0 : i32
    return %arg0, %c0_i32, %c0_i32_0 : i32, i32, i32
  }
  func.func @transform_1(%arg0: i32) -> (i32, i32) {
    %c0_i32 = arith.constant 0 : i32
    %c0_i32_0 = arith.constant 0 : i32
    %c0_i32_1 = arith.constant 0 : i32
    return %c0_i32, %c0_i32_0 : i32, i32
  }
  func.func @transform_2(%arg0: i32) -> (i32, i32) {
    %c0_i32 = arith.constant 0 : i32
    %c0_i32_0 = arith.constant 0 : i32
    %c0_i32_1 = arith.constant 0 : i32
    return %c0_i32, %c0_i32_0 : i32, i32
  }
  func.func @transform_3(%arg0: i32) -> (i32, i32, i32) {
    %c0_i32 = arith.constant 0 : i32
    %c0_i32_0 = arith.constant 0 : i32
    %c0_i32_1 = arith.constant 0 : i32
    %c0_i32_2 = arith.constant 0 : i32
    return %c0_i32, %c0_i32_0, %c0_i32_1 : i32, i32, i32
  }
  func.func @transform_4(%arg0: i32) -> (i32, i32, i32) {
    %c0_i32 = arith.constant 0 : i32
    %c0_i32_0 = arith.constant 0 : i32
    %c0_i32_1 = arith.constant 0 : i32
    %c0_i32_2 = arith.constant 0 : i32
    return %c0_i32, %c0_i32_0, %c0_i32_1 : i32, i32, i32
  }
  func.func @transform_5(%arg0: i32) -> (i32, i32, i32) {
    %c0_i32 = arith.constant 0 : i32
    %c0_i32_0 = arith.constant 0 : i32
    %c0_i32_1 = arith.constant 0 : i32
    %c0_i32_2 = arith.constant 0 : i32
    return %c0_i32, %c0_i32_0, %c0_i32_1 : i32, i32, i32
  }
  func.func @transform_6(%arg0: i32) -> (i32, i32) {
    %c0_i32 = arith.constant 0 : i32
    %c0_i32_0 = arith.constant 0 : i32
    %c0_i32_1 = arith.constant 0 : i32
    return %c0_i32, %c0_i32_0 : i32, i32
  }
  func.func @transform_7(%arg0: i32) -> (i32, i32) {
    %c0_i32 = arith.constant 0 : i32
    %c0_i32_0 = arith.constant 0 : i32
    %c0_i32_1 = arith.constant 0 : i32
    return %c0_i32, %c0_i32_0 : i32, i32
  }
  func.func @transform_8(%arg0: i32) -> (i32, i32, i32) {
    %c0_i32 = arith.constant 0 : i32
    %c0_i32_0 = arith.constant 0 : i32
    %c0_i32_1 = arith.constant 0 : i32
    return %arg0, %c0_i32, %c0_i32_0 : i32, i32, i32
  }
}

</mosaic_0001>

<bundles_post_ra>
// kernel: tpu_custom_call.1
= control target key start
LH: loop header
LB: loop body
LE: loop exit
PB: predicated region body
PF: predicated region fallthrough
CT: control target
= control target key end

     0   :  { %s3710_s27 = smov 0   ;;  %s4932_s0 = inlined_call_operand.vmem [shape: f32[32,16,4], index: 0, kind: input, shape index: {}]   ;;  %s4933_s1 = inlined_call_operand.vmem [shape: f32[4,32], index: 1, kind: input, shape index: {}]   ;;  %s4934_s2 = inlined_call_operand.vmem [shape: f32[1,32], index: 2, kind: input, shape index: {}]   ;;  %s4935_s3 = inlined_call_operand.vmem [shape: f32[4,32,32], index: 3, kind: input, shape index: {}]   ;;  %s4936_s4 = inlined_call_operand.vmem [shape: f32[4,1,32], index: 4, kind: input, shape index: {}]   ;;  %s4937_s5 = inlined_call_operand.vmem [shape: f32[4,32,32], index: 5, kind: input, shape index: {}]   ;;  %s4938_s6 = inlined_call_operand.vmem [shape: f32[32,2], index: 6, kind: input, shape index: {}]   ;;  %s4939_s7 = inlined_call_operand.vmem [shape: f32[1,2], index: 7, kind: input, shape index: {}]   ;;  %s4940_s8 = inlined_call_operand.vmem [shape: f32[32,16,2], index: 8, kind: output, shape index: {}]  }
   0x1 LB: > { %s3102_s28 = sadd.s32 4294967295, %s3662_s27   ;;  %p3106_p0 = scmp.ge.s32.totalorder %s3662_s27, 1  ;;  %s3662_s27 = sphi %s3710_s27, %s18_s27  }
   0x2   : > { %p264_p1 = scmp.lt.s32.totalorder %s3662_s27, 5 }
   0x4   : > { %p265_p2 = pnand %p3106_p0, %p264_p1 }
   0x5   : > { %s3107_s29 = sshll.u32 (!%p265_p2), %s3102_s28, 3  ;;  %p3113_p4 = scmp.ne.s32.totalorder (!%p265_p2), %s3102_s28, 0 }
   0x6   : > { %268 = sbr.rel (%p265_p2) target bundleno = 1852 (0x73c), region = 52  ;;  %p301_p3 = scmp.lt.s32.totalorder (!%p265_p2), %s3107_s29, 31 }
   0xb   : > { %s4978_s29 = smov (!%p301_p3, %s3107_s29), 31  ;;  %317 = sbr.rel (%p3113_p4) target bundleno = 21 (0x15), region = 56 }
   0xc   : > { %s3352_s30 = sshll.u32 %s4978_s29, 4 }
   0xd   : > { %s3721_s11 = scalar_lea.vmem %s4932_s0, %s3352_s30  ;;  %s3726_s14 = scalar_lea.vmem %s4940_s8, %s3352_s30 }
  0x10   : > { %vm318_vm0 = vcmask 261120   ;;  %v3664_v0 = vmov 0.0  }
  0x11   : > { %319 = vst.msk [vmem:[#allocation2] sm:$0xff] %vm318_vm0, %v3664_v0 }
  0x12   : > { %320 = vst.msk [vmem:[#allocation2 + $0x8] sm:$0xff] %vm318_vm0, %v3664_v0 }
  0x13   : > { %321 = vst.msk [vmem:[#allocation3] sm:$0xff] %vm318_vm0, %v3664_v0 }
  0x14   : > { %322 = vst.msk [vmem:[#allocation3 + $0x8] sm:$0xff] %vm318_vm0, %v3664_v0 }
  0x15 PF: > { %v339_v1 = vld [vmem:[%s4933_s1] sm:$0xf]  ;;  %vm393_vm1 = vcmask 1043456   ;;  %vm344_vm2 = vcmask 31744   ;;  %v3150_v6 = vld [vmem:[%s4935_s3 + $0x38] sm:$0xff]  ;;  %v324_v8 = vld [vmem:[%s3721_s11 + $0x8] sm:$0xff] }
  0x16   : > { %v323_v2 = vld [vmem:[%s3721_s11] sm:$0xff]  ;;  %3114 = vmatpush.msk.msra.mxu0 %vm393_vm1, %v339_v1  ;;  %3354 = vmatpush.msk.msra.mxu1 %vm393_vm1, %v339_v1  ;;  %v481_v7 = vld [vmem:[%s4935_s3 + $0x18] sm:$0xff]  ;;  %v3149_v9 = vld [vmem:[%s4935_s3 + $0x30] sm:$0xff]  ;;  %vm486_vm3 = vcmask 261120  }
  0x17   : > { %v327_v3 = vld [vmem:[%s3721_s11 + $0x20] sm:$0xff]  ;;  %3115 = vmatmul.msk.f32.vlgmr.msra.gmra.mxu0 %vm344_vm2, %v323_v2  ;;  %3355 = vmatpush.msk.msra.mxu2 %vm393_vm1, %v339_v1  ;;  %v480_v10 = vld [vmem:[%s4935_s3 + $0x10] sm:$0xff]  ;;  %v328_v11 = vld [vmem:[%s3721_s11 + $0x28] sm:$0xff] }
  0x18   : > { %3119 = vmatmul.msk.f32.vlgmr.msra.gmra.mxu1 %vm344_vm2, %v327_v3  ;;  %v331_v4 = vld [vmem:[%s3721_s11 + $0x40] sm:$0xff]  ;;  %3356 = vmatpush.msk.msra.mxu3 %vm393_vm1, %v339_v1  ;;  %v332_v12 = vld [vmem:[%s3721_s11 + $0x48] sm:$0xff]  ;;  %v3171_v13 = vld [vmem:[%s4935_s3 + $0x58] sm:$0xff] }
  0x19   : > { %3123 = vmatmul.msk.f32.vlgmr.msra.gmra.mxu2 %vm344_vm2, %v331_v4  ;;  %v335_v5 = vld [vmem:[%s3721_s11 + $0x60] sm:$0xff]  ;;  %547 = vmatpush.msrb.mxu1 %v481_v7  ;;  %v336_v14 = vld [vmem:[%s3721_s11 + $0x68] sm:$0xff]  ;;  %v3192_v17 = vld [vmem:[%s4935_s3 + $0x78] sm:$0xff] }
  0x1a   : > { %3127 = vmatmul.msk.f32.vlgmr.msra.gmra.mxu3 %vm344_vm2, %v335_v5  ;;  %638 = vmatpush.msrb.mxu2 %v3150_v6  ;;  %v3148_v15 = vld [vmem:[%s4935_s3 + $0x28] sm:$0xff]  ;;  %v3147_v18 = vld [vmem:[%s4935_s3 + $0x20] sm:$0xff]  ;;  %v325_v20 = vld [vmem:[%s3721_s11 + $0x10] sm:$0xff] }
  0x1b   : > { %548 = vmatpush.msrb.mxu1 %v480_v10  ;;  %v479_v16 = vld [vmem:[%s4935_s3 + $0x8] sm:$0xff]  ;;  %730 = vmatpush.msrb.mxu3 %v3171_v13  ;;  %v478_v19 = vld [vmem:[%s4935_s3] sm:$0xff]  ;;  %v329_v21 = vld [vmem:[%s3721_s11 + $0x30] sm:$0xff] }
  0x1c   : > { %639 = vmatpush.msrb.mxu2 %v3149_v9  ;;  %822 = vmatpush.msrb.mxu0 %v3192_v17  ;;  %v333_v22 = vld [vmem:[%s3721_s11 + $0x50] sm:$0xff]  ;;  %v326_v24 = vld [vmem:[%s3721_s11 + $0x18] sm:$0xff]  ;;  %v3169_v30 = vld [vmem:[%s4935_s3 + $0x48] sm:$0xff] }
  0x1d   : > { %549 = vmatpush.msrb.mxu1 %v479_v16  ;;  %v337_v23 = vld [vmem:[%s3721_s11 + $0x70] sm:$0xff]  ;;  %v330_v25 = vld [vmem:[%s3721_s11 + $0x38] sm:$0xff]  ;;  %v3190_v31 = vld [vmem:[%s4935_s3 + $0x68] sm:$0xff] }
  0x1e   : > { %640 = vmatpush.msrb.mxu2 %v3148_v15  ;;  %v334_v26 = vld [vmem:[%s3721_s11 + $0x58] sm:$0xff]  ;;  %v3170_v28 = vld [vmem:[%s4935_s3 + $0x50] sm:$0xff]  ;;  %v3168_v32 = vld [vmem:[%s4935_s3 + $0x40] sm:$0xff] }
  0x1f   : > { %3116 = vmatmul.msk.f32.gmra.mxu0 %vm344_vm2, %v324_v8  ;;  %550 = vmatpush.msrb.mxu1 %v478_v19  ;;  %v338_v27 = vld [vmem:[%s3721_s11 + $0x78] sm:$0xff]  ;;  %v3191_v29 = vld [vmem:[%s4935_s3 + $0x70] sm:$0xff]  ;;  %v3189_v33 = vld [vmem:[%s4935_s3 + $0x60] sm:$0xff] }
  0x20   : > { %3120 = vmatmul.msk.f32.gmra.mxu1 %vm344_vm2, %v328_v11  ;;  %641 = vmatpush.msrb.mxu2 %v3147_v18  ;;  %v3814_v34 = vld [vmem:[%s4937_s5 + $0x38] sm:$0xff]  ;;  %v3833_v37 = vld [vmem:[%s4934_s2] ss:$0 sm:$0xff]  ;;  %v3843_v41 = vld [vmem:[%s4937_s5 + $0x30] sm:$0xff] }
  0x21   : > { %3124 = vmatmul.msk.f32.gmra.mxu2 %vm344_vm2, %v332_v12  ;;  %731 = vmatpush.msrb.mxu3 %v3170_v28  ;;  %v3819_v35 = vld [vmem:[%s4937_s5 + $0x18] sm:$0xff]  ;;  %v3848_v42 = vld [vmem:[%s4937_s5 + $0x10] sm:$0xff]  ;;  %v3883_v58 = vld [vmem:[%s4937_s5 + $0x28] sm:$0xff] }
  0x22   : > { %3128 = vmatmul.msk.f32.gmra.mxu3 %vm344_vm2, %v336_v14  ;;  %823 = vmatpush.msrb.mxu0 %v3191_v29  ;;  %v3827_v36 = vld [vmem:[%s4937_s5 + $0x58] sm:$0xff]  ;;  %v3866_v50 = vld [vmem:[%s4937_s5 + $0x50] sm:$0xff]  ;;  %v3888_v59 = vld [vmem:[%s4937_s5 + $0x8] sm:$0xff] }
  0x23   : > { %732 = vmatpush.msrb.mxu3 %v3169_v30  ;;  %962 = vmatpush.msra.mxu2 %v3814_v34  ;;  %v3906_v3 = vld [vmem:[%s4937_s5 + $0x48] sm:$0xff]  ;;  %v3922_v9 = vld [vmem:[%s4937_s5 + $0x20] sm:$0xff]  ;;  %v3984_v28 = vld [vmem:[%s4937_s5 + $0x70] sm:$0xff] }
  0x24   : > { %824 = vmatpush.msrb.mxu0 %v3190_v31  ;;  %935 = vmatpush.msra.mxu1 %v3819_v35  ;;  %v3927_v10 = vld [vmem:[%s4937_s5] sm:$0xff]  ;;  %v3989_v29 = vld [vmem:[%s4937_s5 + $0x68] sm:$0xff] }
  0x25   : > { %733 = vmatpush.msrb.mxu3 %v3168_v32  ;;  %963 = vmatpush.msra.mxu2 %v3843_v41  ;;  %v3953_v18 = vld [vmem:[%s4937_s5 + $0x40] sm:$0xff] }
  0x26   : > { %825 = vmatpush.msrb.mxu0 %v3189_v33  ;;  %936 = vmatpush.msra.mxu1 %v3848_v42  ;;  %v3996_v32 = vld [vmem:[%s4937_s5 + $0x60] sm:$0xff] }
  0x27   : > { %3117 = vmatmul.msk.f32.gmra.mxu0 %vm344_vm2, %v325_v20  ;;  %989 = vmatpush.msra.mxu3 %v3827_v36 }
  0x28   : > { %3121 = vmatmul.msk.f32.gmra.mxu1 %vm344_vm2, %v329_v21  ;;  %2413 = vmatpush.msra.mxu0 %v3819_v35 }
  0x29   : > { %3125 = vmatmul.msk.f32.gmra.mxu2 %vm344_vm2, %v333_v22  ;;  %990 = vmatpush.msra.mxu3 %v3866_v50 }
  0x2a   : > { %3129 = vmatmul.msk.f32.gmra.mxu3 %vm344_vm2, %v337_v23  ;;  %2414 = vmatpush.msra.mxu0 %v3848_v42 }
  0x2b   : > { %964 = vmatpush.msra.mxu2 %v3883_v58  ;;  %937 = vmatpush.msra.mxu1 %v3888_v59 }
  0x2c   : > { %2415 = vmatpush.msra.mxu0 %v3888_v59  ;;  %991 = vmatpush.msra.mxu3 %v3906_v3 }
  0x2d   : > { %965 = vmatpush.msra.mxu2 %v3922_v9  ;;  %938 = vmatpush.msra.mxu1 %v3927_v10 }
  0x2e   : > { %2416 = vmatpush.msra.mxu0 %v3927_v10  ;;  %992 = vmatpush.msra.mxu3 %v3953_v18 }
  0x2f   : > { %3118 = vmatmul.msk.f32.gmra.mxu0 %vm344_vm2, %v326_v24  ;;  %v3973_v24 = vld [vmem:[%s4937_s5 + $0x78] sm:$0xff] }
  0x30   : > { %3122 = vmatmul.msk.f32.gmra.mxu1 %vm344_vm2, %v330_v25 }
  0x31   : > { %3126 = vmatmul.msk.f32.gmra.mxu2 %vm344_vm2, %v334_v26 }
  0x32   : > { %3130 = vmatmul.msk.f32.gmra.mxu3 %vm344_vm2, %v338_v27 }
  0x94   : > { %v414_v38 = vpop.f32.mrf.mxu0 }
  0x95   : > { %v415_v39 = vadd.f32 %v3833_v37, %v414_v38  ;;  %v426_v49 = vpop.f32.mrf.mxu1 }
  0x96   : > { %v427_v54 = vadd.f32 %v3833_v37, %v426_v49 }
  0x97   : > { %v462_v40 = vmax.f32 %v415_v39, 0.0  ;;  %v4011_v39 = vld [vmem:[%s4936_s4] ss:$0 sm:$0xff] }
  0x98   : > { %v466_v56 = vmax.f32 %v427_v54, 0.0 }
  0x99   : > { %3131 = vmatmul.msk.f32.vlgmr.msrb.gmra.mxu1 %vm486_vm3, %v462_v40  ;;  %3152 = vmatmul.msk.f32.vlgmr.msrb.gmra.mxu2 %vm486_vm3, %v462_v40 }
  0x9a   : > { %3173 = vmatmul.msk.f32.vlgmr.msrb.gmra.mxu3 %vm486_vm3, %v462_v40  ;;  %3194 = vmatmul.msk.f32.vlgmr.msrb.gmra.mxu0 %vm486_vm3, %v462_v40 }
  0x9b   : > { %1178 = vmatpush.msrb.mxu2 %v3819_v35  ;;  %2660 = vmatpush.msrb.mxu0 %v3819_v35 }
  0x9c   : > { %v417_v43 = vpop.f32.mrf.mxu0  ;;  %v438_v1 = vpop.f32.mrf.mxu2  ;;  %1206 = vmatpush.msrb.mxu3 %v3814_v34  ;;  %1016 = vmatpush.msrb.mxu1 %v3973_v24 }
  0x9d   : > { %v418_v44 = vadd.f32 %v3833_v37, %v417_v43  ;;  %v429_v55 = vpop.f32.mrf.mxu1  ;;  %v439_v5 = vadd.f32 %v3833_v37, %v438_v1  ;;  %1179 = vmatpush.msrb.mxu2 %v3848_v42  ;;  %2661 = vmatpush.msrb.mxu0 %v3848_v42  ;;  %v450_v16 = vpop.f32.mrf.mxu3  ;;  %v911_v43 = vld [vmem:[#allocation2] sm:$0xff] }
  0x9e   : > { %v430_v57 = vadd.f32 %v3833_v37, %v429_v55  ;;  %1207 = vmatpush.msrb.mxu3 %v3843_v41  ;;  %v451_v20 = vadd.f32 %v3833_v37, %v450_v16  ;;  %1017 = vmatpush.msrb.mxu1 %v3984_v28  ;;  %v912_v55 = vld [vmem:[#allocation2 + $0x8] sm:$0xff] }
  0x9f   : > { %v463_v45 = vmax.f32 %v418_v44, 0.0  ;;  %v470_v7 = vmax.f32 %v439_v5, 0.0  ;;  %1180 = vmatpush.msrb.mxu2 %v3888_v59  ;;  %2662 = vmatpush.msrb.mxu0 %v3888_v59 }
  0xa0   : > { %v467_v61 = vmax.f32 %v430_v57, 0.0  ;;  %1208 = vmatpush.msrb.mxu3 %v3883_v58  ;;  %v474_v22 = vmax.f32 %v451_v20, 0.0  ;;  %1018 = vmatpush.msrb.mxu1 %v3989_v29 }
  0xa1   : > { %3132 = vmatmul.msk.f32.gmra.mxu1 %vm486_vm3, %v463_v45  ;;  %3153 = vmatmul.msk.f32.gmra.mxu2 %vm486_vm3, %v463_v45 }
  0xa2   : > { %3174 = vmatmul.msk.f32.gmra.mxu3 %vm486_vm3, %v463_v45  ;;  %3195 = vmatmul.msk.f32.gmra.mxu0 %vm486_vm3, %v463_v45 }
  0xa3   : > { %1181 = vmatpush.msrb.mxu2 %v3927_v10  ;;  %2663 = vmatpush.msrb.mxu0 %v3927_v10 }
  0xa4   : > { %v420_v46 = vpop.f32.mrf.mxu0  ;;  %v441_v6 = vpop.f32.mrf.mxu2  ;;  %1209 = vmatpush.msrb.mxu3 %v3922_v9  ;;  %1019 = vmatpush.msrb.mxu1 %v3996_v32 }
  0xa5   : > { %v421_v47 = vadd.f32 %v3833_v37, %v420_v46  ;;  %v432_v60 = vpop.f32.mrf.mxu1  ;;  %v442_v8 = vadd.f32 %v3833_v37, %v441_v6  ;;  %v453_v21 = vpop.f32.mrf.mxu3 }
  0xa6   : > { %v433_v62 = vadd.f32 %v3833_v37, %v432_v60  ;;  %v454_v23 = vadd.f32 %v3833_v37, %v453_v21 }
  0xa7   : > { %v464_v48 = vmax.f32 %v421_v47, 0.0  ;;  %v471_v12 = vmax.f32 %v442_v8, 0.0  ;;  %v4026_v47 = vld [vmem:[%s4936_s4 + $0x1] ss:$0 sm:$0xff] }
  0xa8   : > { %v468_v63 = vmax.f32 %v433_v62, 0.0  ;;  %v475_v26 = vmax.f32 %v454_v23, 0.0 }
  0xa9   : > { %3133 = vmatmul.msk.f32.gmra.mxu1 %vm486_vm3, %v464_v48  ;;  %3154 = vmatmul.msk.f32.gmra.mxu2 %vm486_vm3, %v464_v48 }
  0xaa   : > { %3175 = vmatmul.msk.f32.gmra.mxu3 %vm486_vm3, %v464_v48  ;;  %3196 = vmatmul.msk.f32.gmra.mxu0 %vm486_vm3, %v464_v48  ;;  %v4033_v48 = vld [vmem:[%s4936_s4 + $0x2] ss:$0 sm:$0xff] }
  0xac   : > { %v423_v51 = vpop.f32.mrf.mxu0  ;;  %v444_v11 = vpop.f32.mrf.mxu2 }
  0xad   : > { %v424_v52 = vadd.f32 %v3833_v37, %v423_v51  ;;  %v435_v0 = vpop.f32.mrf.mxu1  ;;  %v445_v13 = vadd.f32 %v3833_v37, %v444_v11  ;;  %v456_v25 = vpop.f32.mrf.mxu3 }
  0xae   : > { %v436_v2 = vadd.f32 %v3833_v37, %v435_v0  ;;  %v457_v27 = vadd.f32 %v3833_v37, %v456_v25 }
  0xaf   : > { %v465_v53 = vmax.f32 %v424_v52, 0.0  ;;  %v472_v14 = vmax.f32 %v445_v13, 0.0 }
  0xb0   : > { %v469_v4 = vmax.f32 %v436_v2, 0.0  ;;  %v476_v30 = vmax.f32 %v457_v27, 0.0 }
  0xb1   : > { %3134 = vmatmul.msk.f32.gmra.mxu1 %vm486_vm3, %v465_v53  ;;  %3155 = vmatmul.msk.f32.gmra.mxu2 %vm486_vm3, %v465_v53 }
  0xb2   : > { %3176 = vmatmul.msk.f32.gmra.mxu3 %vm486_vm3, %v465_v53  ;;  %3197 = vmatmul.msk.f32.gmra.mxu0 %vm486_vm3, %v465_v53 }
  0xb4   : > { %v447_v15 = vpop.f32.mrf.mxu2 }
  0xb5   : > { %v448_v17 = vadd.f32 %v3833_v37, %v447_v15  ;;  %v459_v31 = vpop.f32.mrf.mxu3 }
  0xb6   : > { %v460_v33 = vadd.f32 %v3833_v37, %v459_v31  ;;  %v4016_v37 = vld [vmem:[%s4936_s4 + $0x3] ss:$0 sm:$0xff] }
  0xb7   : > { %v473_v19 = vmax.f32 %v448_v17, 0.0 }
  0xb8   : > { %v477_v38 = vmax.f32 %v460_v33, 0.0 }
  0xb9   : > { %3135 = vmatmul.msk.f32.gmra.mxu1 %vm486_vm3, %v466_v56  ;;  %3156 = vmatmul.msk.f32.gmra.mxu2 %vm486_vm3, %v466_v56 }
  0xba   : > { %3177 = vmatmul.msk.f32.gmra.mxu3 %vm486_vm3, %v466_v56  ;;  %3198 = vmatmul.msk.f32.gmra.mxu0 %vm486_vm3, %v466_v56 }
  0xc1   : > { %3136 = vmatmul.msk.f32.gmra.mxu1 %vm486_vm3, %v467_v61  ;;  %3157 = vmatmul.msk.f32.gmra.mxu2 %vm486_vm3, %v467_v61 }
  0xc2   : > { %3178 = vmatmul.msk.f32.gmra.mxu3 %vm486_vm3, %v467_v61  ;;  %3199 = vmatmul.msk.f32.gmra.mxu0 %vm486_vm3, %v467_v61 }
  0xc9   : > { %3137 = vmatmul.msk.f32.gmra.mxu1 %vm486_vm3, %v468_v63  ;;  %3158 = vmatmul.msk.f32.gmra.mxu2 %vm486_vm3, %v468_v63 }
  0xca   : > { %3179 = vmatmul.msk.f32.gmra.mxu3 %vm486_vm3, %v468_v63  ;;  %3200 = vmatmul.msk.f32.gmra.mxu0 %vm486_vm3, %v468_v63 }
  0xd1   : > { %3138 = vmatmul.msk.f32.gmra.mxu1 %vm486_vm3, %v469_v4  ;;  %3159 = vmatmul.msk.f32.gmra.mxu2 %vm486_vm3, %v469_v4 }
  0xd2   : > { %3180 = vmatmul.msk.f32.gmra.mxu3 %vm486_vm3, %v469_v4  ;;  %3201 = vmatmul.msk.f32.gmra.mxu0 %vm486_vm3, %v469_v4 }
  0xd9   : > { %3139 = vmatmul.msk.f32.gmra.mxu1 %vm486_vm3, %v470_v7  ;;  %3160 = vmatmul.msk.f32.gmra.mxu2 %vm486_vm3, %v470_v7 }
  0xda   : > { %3181 = vmatmul.msk.f32.gmra.mxu3 %vm486_vm3, %v470_v7  ;;  %3202 = vmatmul.msk.f32.gmra.mxu0 %vm486_vm3, %v470_v7 }
  0xe1   : > { %3140 = vmatmul.msk.f32.gmra.mxu1 %vm486_vm3, %v471_v12  ;;  %3161 = vmatmul.msk.f32.gmra.mxu2 %vm486_vm3, %v471_v12 }
  0xe2   : > { %3182 = vmatmul.msk.f32.gmra.mxu3 %vm486_vm3, %v471_v12  ;;  %3203 = vmatmul.msk.f32.gmra.mxu0 %vm486_vm3, %v471_v12 }
  0xe9   : > { %3141 = vmatmul.msk.f32.gmra.mxu1 %vm486_vm3, %v472_v14  ;;  %3162 = vmatmul.msk.f32.gmra.mxu2 %vm486_vm3, %v472_v14 }
  0xea   : > { %3183 = vmatmul.msk.f32.gmra.mxu3 %vm486_vm3, %v472_v14  ;;  %3204 = vmatmul.msk.f32.gmra.mxu0 %vm486_vm3, %v472_v14 }
  0xf1   : > { %3142 = vmatmul.msk.f32.gmra.mxu1 %vm486_vm3, %v473_v19  ;;  %3163 = vmatmul.msk.f32.gmra.mxu2 %vm486_vm3, %v473_v19 }
  0xf2   : > { %3184 = vmatmul.msk.f32.gmra.mxu3 %vm486_vm3, %v473_v19  ;;  %3205 = vmatmul.msk.f32.gmra.mxu0 %vm486_vm3, %v473_v19 }
  0xf9   : > { %3143 = vmatmul.msk.f32.gmra.mxu1 %vm486_vm3, %v474_v22  ;;  %3164 = vmatmul.msk.f32.gmra.mxu2 %vm486_vm3, %v474_v22 }
  0xfa   : > { %3185 = vmatmul.msk.f32.gmra.mxu3 %vm486_vm3, %v474_v22  ;;  %3206 = vmatmul.msk.f32.gmra.mxu0 %vm486_vm3, %v474_v22 }
 0x101   : > { %3144 = vmatmul.msk.f32.gmra.mxu1 %vm486_vm3, %v475_v26  ;;  %3165 = vmatmul.msk.f32.gmra.mxu2 %vm486_vm3, %v475_v26 }
 0x102   : > { %3186 = vmatmul.msk.f32.gmra.mxu3 %vm486_vm3, %v475_v26  ;;  %3207 = vmatmul.msk.f32.gmra.mxu0 %vm486_vm3, %v475_v26 }
 0x109   : > { %3145 = vmatmul.msk.f32.gmra.mxu1 %vm486_vm3, %v476_v30  ;;  %3166 = vmatmul.msk.f32.gmra.mxu2 %vm486_vm3, %v476_v30 }
 0x10a   : > { %3187 = vmatmul.msk.f32.gmra.mxu3 %vm486_vm3, %v476_v30  ;;  %3208 = vmatmul.msk.f32.gmra.mxu0 %vm486_vm3, %v476_v30 }
 0x111   : > { %3146 = vmatmul.msk.f32.gmra.mxu1 %vm486_vm3, %v477_v38  ;;  %3167 = vmatmul.msk.f32.gmra.mxu2 %vm486_vm3, %v477_v38 }
 0x112   : > { %3188 = vmatmul.msk.f32.gmra.mxu3 %vm486_vm3, %v477_v38  ;;  %3209 = vmatmul.msk.f32.gmra.mxu0 %vm486_vm3, %v477_v38 }
 0x116   : > { %v552_v40 = vpop.f32.mrf.mxu1 }
 0x117   : > { %v553_v44 = vadd.f32 %v4011_v39, %v552_v40  ;;  %v827_v45 = vpop.f32.mrf.mxu0 }
 0x118   : > { %v828_v46 = vadd.f32 %v4016_v37, %v827_v45 }
 0x119   : > { %600 = vst.msk [vmem:[#allocation4] sm:$0xff] %vm486_vm3, %v553_v44  ;;  %3222 = vmatmul.msk.f32.vlgmr.msra.gmra.mxu1 %vm486_vm3, %v911_v43  ;;  %3224 = vmatmul.msk.f32.vlgmr.msra.gmra.mxu2 %vm486_vm3, %v911_v43 }
 0x11a   : > { %876 = vst.msk [vmem:[#allocation4 + $0x180] sm:$0xff] %vm486_vm3, %v828_v46  ;;  %3226 = vmatmul.msk.f32.vlgmr.msra.gmra.mxu3 %vm486_vm3, %v911_v43  ;;  %1234 = vmatpush.msra.mxu1 %v3827_v36 }
 0x11b   : > { %1262 = vmatpush.msra.mxu2 %v3973_v24  ;;  %1425 = vmatpush.msra.mxu3 %v3819_v35 }
 0x11c   : > { %v643_v49 = vpop.f32.mrf.mxu2  ;;  %1235 = vmatpush.msra.mxu1 %v3866_v50 }
 0x11d   : > { %v644_v51 = vadd.f32 %v4026_v47, %v643_v49  ;;  %v735_v52 = vpop.f32.mrf.mxu3  ;;  %1263 = vmatpush.msra.mxu2 %v3984_v28  ;;  %1426 = vmatpush.msra.mxu3 %v3848_v42 }
 0x11e   : > { %v736_v53 = vadd.f32 %v4033_v48, %v735_v52  ;;  %v555_v54 = vpop.f32.mrf.mxu1  ;;  %1236 = vmatpush.msra.mxu1 %v3906_v3 }
 0x11f   : > { %692 = vst.msk [vmem:[#allocation4 + $0x80] sm:$0xff] %vm486_vm3, %v644_v51  ;;  %v556_v35 = vadd.f32 %v4011_v39, %v555_v54  ;;  %v830_v36 = vpop.f32.mrf.mxu0  ;;  %1264 = vmatpush.msra.mxu2 %v3989_v29  ;;  %1427 = vmatpush.msra.mxu3 %v3888_v59 }
 0x120   : > { %784 = vst.msk [vmem:[#allocation4 + $0x100] sm:$0xff] %vm486_vm3, %v736_v53  ;;  %v831_v56 = vadd.f32 %v4016_v37, %v830_v36  ;;  %1237 = vmatpush.msra.mxu1 %v3953_v18 }
 0x121   : > { %601 = vst.msk [vmem:[#allocation4 + $0x8] sm:$0xff] %vm486_vm3, %v556_v35  ;;  %3223 = vmatmul.msk.f32.gmra.mxu1 %vm486_vm3, %v912_v55  ;;  %3225 = vmatmul.msk.f32.gmra.mxu2 %vm486_vm3, %v912_v55 }
 0x122   : > { %877 = vst.msk [vmem:[#allocation4 + $0x188] sm:$0xff] %vm486_vm3, %v831_v56  ;;  %3227 = vmatmul.msk.f32.gmra.mxu3 %vm486_vm3, %v912_v55  ;;  %1265 = vmatpush.msra.mxu2 %v3996_v32 }
 0x123   : > { %1428 = vmatpush.msra.mxu3 %v3927_v10 }
 0x124   : > { %v646_v42 = vpop.f32.mrf.mxu2 }
 0x125   : > { %v647_v57 = vadd.f32 %v4026_v47, %v646_v42  ;;  %v738_v60 = vpop.f32.mrf.mxu3 }
 0x126   : > { %v739_v61 = vadd.f32 %v4033_v48, %v738_v60  ;;  %v558_v62 = vpop.f32.mrf.mxu1 }
 0x127   : > { %693 = vst.msk [vmem:[#allocation4 + $0x88] sm:$0xff] %vm486_vm3, %v647_v57  ;;  %v559_v63 = vadd.f32 %v4011_v39, %v558_v62  ;;  %v833_v0 = vpop.f32.mrf.mxu0 }
 0x128   : > { %785 = vst.msk [vmem:[#allocation4 + $0x108] sm:$0xff] %vm486_vm3, %v739_v61  ;;  %v834_v1 = vadd.f32 %v4016_v37, %v833_v0 }
 0x129   : > { %602 = vst.msk [vmem:[#allocation4 + $0x10] sm:$0xff] %vm486_vm3, %v559_v63  ;;  %3228 = vmatmul.msk.f32.vlgmr.msrb.gmra.mxu1 %vm486_vm3, %v911_v43 }
 0x12a   : > { %878 = vst.msk [vmem:[#allocation4 + $0x190] sm:$0xff] %vm486_vm3, %v834_v1  ;;  %1453 = vmatpush.msrb.mxu1 %v3814_v34 }
 0x12c   : > { %v649_v2 = vpop.f32.mrf.mxu2  ;;  %1454 = vmatpush.msrb.mxu1 %v3843_v41 }
 0x12d   : > { %v650_v4 = vadd.f32 %v4026_v47, %v649_v2  ;;  %v741_v5 = vpop.f32.mrf.mxu3 }
 0x12e   : > { %v742_v6 = vadd.f32 %v4033_v48, %v741_v5  ;;  %v561_v7 = vpop.f32.mrf.mxu1  ;;  %1455 = vmatpush.msrb.mxu1 %v3883_v58 }
 0x12f   : > { %694 = vst.msk [vmem:[#allocation4 + $0x90] sm:$0xff] %vm486_vm3, %v650_v4  ;;  %v562_v8 = vadd.f32 %v4011_v39, %v561_v7  ;;  %v836_v11 = vpop.f32.mrf.mxu0 }
 0x130   : > { %786 = vst.msk [vmem:[#allocation4 + $0x110] sm:$0xff] %vm486_vm3, %v742_v6  ;;  %v837_v34 = vadd.f32 %v4016_v37, %v836_v11  ;;  %1456 = vmatpush.msrb.mxu1 %v3922_v9 }
 0x131   : > { %603 = vst.msk [vmem:[#allocation4 + $0x18] sm:$0xff] %vm486_vm3, %v562_v8  ;;  %3229 = vmatmul.msk.f32.gmra.mxu1 %vm486_vm3, %v912_v55 }
 0x132   : > { %879 = vst.msk [vmem:[#allocation4 + $0x198] sm:$0xff] %vm486_vm3, %v837_v34 }
 0x134   : > { %v652_v41 = vpop.f32.mrf.mxu2 }
 0x135   : > { %v653_v12 = vadd.f32 %v4026_v47, %v652_v41  ;;  %v744_v13 = vpop.f32.mrf.mxu3 }
 0x136   : > { %v745_v14 = vadd.f32 %v4033_v48, %v744_v13  ;;  %v564_v15 = vpop.f32.mrf.mxu1 }
 0x137   : > { %695 = vst.msk [vmem:[#allocation4 + $0x98] sm:$0xff] %vm486_vm3, %v653_v12  ;;  %v565_v16 = vadd.f32 %v4011_v39, %v564_v15  ;;  %v839_v17 = vpop.f32.mrf.mxu0 }
 0x138   : > { %787 = vst.msk [vmem:[#allocation4 + $0x118] sm:$0xff] %vm486_vm3, %v745_v14  ;;  %v840_v19 = vadd.f32 %v4016_v37, %v839_v17 }
 0x139   : > { %604 = vst.msk [vmem:[#allocation4 + $0x20] sm:$0xff] %vm486_vm3, %v565_v16 }
 0x13a   : > { %880 = vst.msk [vmem:[#allocation4 + $0x1a0] sm:$0xff] %vm486_vm3, %v840_v19 }
 0x13c   : > { %v655_v20 = vpop.f32.mrf.mxu2 }
 0x13d   : > { %v656_v21 = vadd.f32 %v4026_v47, %v655_v20  ;;  %v747_v22 = vpop.f32.mrf.mxu3 }
 0x13e   : > { %v748_v23 = vadd.f32 %v4033_v48, %v747_v22  ;;  %v567_v25 = vpop.f32.mrf.mxu1 }
 0x13f   : > { %696 = vst.msk [vmem:[#allocation4 + $0xa0] sm:$0xff] %vm486_vm3, %v656_v21  ;;  %v568_v26 = vadd.f32 %v4011_v39, %v567_v25  ;;  %v842_v27 = vpop.f32.mrf.mxu0 }
 0x140   : > { %788 = vst.msk [vmem:[#allocation4 + $0x120] sm:$0xff] %vm486_vm3, %v748_v23  ;;  %v843_v30 = vadd.f32 %v4016_v37, %v842_v27 }
 0x141   : > { %605 = vst.msk [vmem:[#allocation4 + $0x28] sm:$0xff] %vm486_vm3, %v568_v26 }
 0x142   : > { %881 = vst.msk [vmem:[#allocation4 + $0x1a8] sm:$0xff] %vm486_vm3, %v843_v30 }
 0x144   : > { %v658_v31 = vpop.f32.mrf.mxu2 }
 0x145   : > { %v659_v33 = vadd.f32 %v4026_v47, %v658_v31  ;;  %v750_v38 = vpop.f32.mrf.mxu3 }
 0x146   : > { %v751_v40 = vadd.f32 %v4033_v48, %v750_v38  ;;  %v570_v43 = vpop.f32.mrf.mxu1 }
 0x147   : > { %697 = vst.msk [vmem:[#allocation4 + $0xa8] sm:$0xff] %vm486_vm3, %v659_v33  ;;  %v571_v44 = vadd.f32 %v4011_v39, %v570_v43  ;;  %v845_v45 = vpop.f32.mrf.mxu0 }
 0x148   : > { %789 = vst.msk [vmem:[#allocation4 + $0x128] sm:$0xff] %vm486_vm3, %v751_v40  ;;  %v846_v46 = vadd.f32 %v4016_v37, %v845_v45 }
 0x149   : > { %606 = vst.msk [vmem:[#allocation4 + $0x30] sm:$0xff] %vm486_vm3, %v571_v44 }
 0x14a   : > { %882 = vst.msk [vmem:[#allocation4 + $0x1b0] sm:$0xff] %vm486_vm3, %v846_v46 }
 0x14c   : > { %v661_v49 = vpop.f32.mrf.mxu2 }
 0x14d   : > { %v662_v51 = vadd.f32 %v4026_v47, %v661_v49  ;;  %v753_v52 = vpop.f32.mrf.mxu3 }
 0x14e   : > { %v754_v53 = vadd.f32 %v4033_v48, %v753_v52  ;;  %v573_v54 = vpop.f32.mrf.mxu1 }
 0x14f   : > { %698 = vst.msk [vmem:[#allocation4 + $0xb0] sm:$0xff] %vm486_vm3, %v662_v51  ;;  %v574_v55 = vadd.f32 %v4011_v39, %v573_v54  ;;  %v848_v35 = vpop.f32.mrf.mxu0 }
 0x150   : > { %790 = vst.msk [vmem:[#allocation4 + $0x130] sm:$0xff] %vm486_vm3, %v754_v53  ;;  %v849_v36 = vadd.f32 %v4016_v37, %v848_v35 }
 0x151   : > { %607 = vst.msk [vmem:[#allocation4 + $0x38] sm:$0xff] %vm486_vm3, %v574_v55 }
 0x152   : > { %883 = vst.msk [vmem:[#allocation4 + $0x1b8] sm:$0xff] %vm486_vm3, %v849_v36 }
 0x154   : > { %v664_v56 = vpop.f32.mrf.mxu2 }
 0x155   : > { %v665_v42 = vadd.f32 %v4026_v47, %v664_v56  ;;  %v756_v57 = vpop.f32.mrf.mxu3 }
 0x156   : > { %v757_v60 = vadd.f32 %v4033_v48, %v756_v57  ;;  %v576_v61 = vpop.f32.mrf.mxu1 }
 0x157   : > { %699 = vst.msk [vmem:[#allocation4 + $0xb8] sm:$0xff] %vm486_vm3, %v665_v42  ;;  %v577_v62 = vadd.f32 %v4011_v39, %v576_v61  ;;  %v851_v63 = vpop.f32.mrf.mxu0 }
 0x158   : > { %791 = vst.msk [vmem:[#allocation4 + $0x138] sm:$0xff] %vm486_vm3, %v757_v60  ;;  %v852_v0 = vadd.f32 %v4016_v37, %v851_v63 }
 0x159   : > { %608 = vst.msk [vmem:[#allocation4 + $0x40] sm:$0xff] %vm486_vm3, %v577_v62 }
 0x15a   : > { %884 = vst.msk [vmem:[#allocation4 + $0x1c0] sm:$0xff] %vm486_vm3, %v852_v0 }
 0x15c   : > { %v667_v1 = vpop.f32.mrf.mxu2 }
 0x15d   : > { %v668_v2 = vadd.f32 %v4026_v47, %v667_v1  ;;  %v759_v4 = vpop.f32.mrf.mxu3 }
 0x15e   : > { %v760_v5 = vadd.f32 %v4033_v48, %v759_v4  ;;  %v579_v6 = vpop.f32.mrf.mxu1 }
 0x15f   : > { %700 = vst.msk [vmem:[#allocation4 + $0xc0] sm:$0xff] %vm486_vm3, %v668_v2  ;;  %v580_v7 = vadd.f32 %v4011_v39, %v579_v6  ;;  %v854_v8 = vpop.f32.mrf.mxu0 }
 0x160   : > { %792 = vst.msk [vmem:[#allocation4 + $0x140] sm:$0xff] %vm486_vm3, %v760_v5  ;;  %v855_v11 = vadd.f32 %v4016_v37, %v854_v8 }
 0x161   : > { %609 = vst.msk [vmem:[#allocation4 + $0x48] sm:$0xff] %vm486_vm3, %v580_v7 }
 0x162   : > { %885 = vst.msk [vmem:[#allocation4 + $0x1c8] sm:$0xff] %vm486_vm3, %v855_v11 }
 0x164   : > { %v670_v34 = vpop.f32.mrf.mxu2 }
 0x165   : > { %v671_v41 = vadd.f32 %v4026_v47, %v670_v34  ;;  %v762_v12 = vpop.f32.mrf.mxu3 }
 0x166   : > { %v763_v13 = vadd.f32 %v4033_v48, %v762_v12  ;;  %v582_v14 = vpop.f32.mrf.mxu1 }
 0x167   : > { %701 = vst.msk [vmem:[#allocation4 + $0xc8] sm:$0xff] %vm486_vm3, %v671_v41  ;;  %v583_v15 = vadd.f32 %v4011_v39, %v582_v14  ;;  %v857_v16 = vpop.f32.mrf.mxu0 }
 0x168   : > { %793 = vst.msk [vmem:[#allocation4 + $0x148] sm:$0xff] %vm486_vm3, %v763_v13  ;;  %v858_v17 = vadd.f32 %v4016_v37, %v857_v16  ;;  %v915_v13 = vld [vmem:[#allocation4] sm:$0xff] }
 0x169   : > { %610 = vst.msk [vmem:[#allocation4 + $0x50] sm:$0xff] %vm486_vm3, %v583_v15 }
 0x16a   : > { %886 = vst.msk [vmem:[#allocation4 + $0x1d0] sm:$0xff] %vm486_vm3, %v858_v17 }
 0x16c   : > { %v673_v19 = vpop.f32.mrf.mxu2 }
 0x16d   : > { %v674_v20 = vadd.f32 %v4026_v47, %v673_v19  ;;  %v765_v21 = vpop.f32.mrf.mxu3  ;;  %v916_v19 = vld [vmem:[#allocation4 + $0x8] sm:$0xff] }
 0x16e   : > { %v766_v22 = vadd.f32 %v4033_v48, %v765_v21  ;;  %v585_v23 = vpop.f32.mrf.mxu1 }
 0x16f   : > { %702 = vst.msk [vmem:[#allocation4 + $0xd0] sm:$0xff] %vm486_vm3, %v674_v20  ;;  %v586_v25 = vadd.f32 %v4011_v39, %v585_v23  ;;  %v860_v26 = vpop.f32.mrf.mxu0 }
 0x170   : > { %794 = vst.msk [vmem:[#allocation4 + $0x150] sm:$0xff] %vm486_vm3, %v766_v22  ;;  %v861_v27 = vadd.f32 %v4016_v37, %v860_v26 }
 0x171   : > { %611 = vst.msk [vmem:[#allocation4 + $0x58] sm:$0xff] %vm486_vm3, %v586_v25  ;;  %v949_v25 = vld [vmem:[#allocation4 + $0x88] sm:$0xff] }
 0x172   : > { %887 = vst.msk [vmem:[#allocation4 + $0x1d8] sm:$0xff] %vm486_vm3, %v861_v27 }
 0x174   : > { %v676_v30 = vpop.f32.mrf.mxu2 }
 0x175   : > { %v677_v31 = vadd.f32 %v4026_v47, %v676_v30  ;;  %v768_v33 = vpop.f32.mrf.mxu3 }
 0x176   : > { %v769_v38 = vadd.f32 %v4033_v48, %v768_v33  ;;  %v588_v40 = vpop.f32.mrf.mxu1 }
 0x177   : > { %703 = vst.msk [vmem:[#allocation4 + $0xd8] sm:$0xff] %vm486_vm3, %v677_v31  ;;  %v589_v43 = vadd.f32 %v4011_v39, %v588_v40  ;;  %v863_v44 = vpop.f32.mrf.mxu0  ;;  %v1002_v31 = vld [vmem:[#allocation4 + $0x180] sm:$0xff] }
 0x178   : > { %795 = vst.msk [vmem:[#allocation4 + $0x158] sm:$0xff] %vm486_vm3, %v769_v38  ;;  %v864_v45 = vadd.f32 %v4016_v37, %v863_v44 }
 0x179   : > { %612 = vst.msk [vmem:[#allocation4 + $0x60] sm:$0xff] %vm486_vm3, %v589_v43 }
 0x17a   : > { %888 = vst.msk [vmem:[#allocation4 + $0x1e0] sm:$0xff] %vm486_vm3, %v864_v45 }
 0x17c   : > { %v679_v46 = vpop.f32.mrf.mxu2 }
 0x17d   : > { %v680_v49 = vadd.f32 %v4026_v47, %v679_v46  ;;  %v771_v51 = vpop.f32.mrf.mxu3 }
 0x17e   : > { %v772_v52 = vadd.f32 %v4033_v48, %v771_v51  ;;  %v591_v53 = vpop.f32.mrf.mxu1 }
 0x17f   : > { %704 = vst.msk [vmem:[#allocation4 + $0xe0] sm:$0xff] %vm486_vm3, %v680_v49  ;;  %v592_v54 = vadd.f32 %v4011_v39, %v591_v53  ;;  %v866_v55 = vpop.f32.mrf.mxu0 }
 0x180   : > { %796 = vst.msk [vmem:[#allocation4 + $0x160] sm:$0xff] %vm486_vm3, %v772_v52  ;;  %v867_v35 = vadd.f32 %v4016_v37, %v866_v55 }
 0x181   : > { %613 = vst.msk [vmem:[#allocation4 + $0x68] sm:$0xff] %vm486_vm3, %v592_v54  ;;  %v1003_v54 = vld [vmem:[#allocation4 + $0x188] sm:$0xff] }
 0x182   : > { %889 = vst.msk [vmem:[#allocation4 + $0x1e8] sm:$0xff] %vm486_vm3, %v867_v35 }
 0x184   : > { %v682_v36 = vpop.f32.mrf.mxu2 }
 0x185   : > { %v683_v56 = vadd.f32 %v4026_v47, %v682_v36  ;;  %v774_v42 = vpop.f32.mrf.mxu3  ;;  %v975_v36 = vld [vmem:[#allocation4 + $0x100] sm:$0xff] }
 0x186   : > { %v775_v57 = vadd.f32 %v4033_v48, %v774_v42  ;;  %v594_v60 = vpop.f32.mrf.mxu1 }
 0x187   : > { %705 = vst.msk [vmem:[#allocation4 + $0xe8] sm:$0xff] %vm486_vm3, %v683_v56  ;;  %v595_v61 = vadd.f32 %v4011_v39, %v594_v60  ;;  %v869_v62 = vpop.f32.mrf.mxu0 }
 0x188   : > { %797 = vst.msk [vmem:[#allocation4 + $0x168] sm:$0xff] %vm486_vm3, %v775_v57  ;;  %v870_v63 = vadd.f32 %v4016_v37, %v869_v62 }
 0x189   : > { %614 = vst.msk [vmem:[#allocation4 + $0x70] sm:$0xff] %vm486_vm3, %v595_v61 }
 0x18a   : > { %890 = vst.msk [vmem:[#allocation4 + $0x1f0] sm:$0xff] %vm486_vm3, %v870_v63 }
 0x18c   : > { %v685_v0 = vpop.f32.mrf.mxu2 }
 0x18d   : > { %v686_v1 = vadd.f32 %v4026_v47, %v685_v0  ;;  %v777_v2 = vpop.f32.mrf.mxu3 }
 0x18e   : > { %v778_v4 = vadd.f32 %v4033_v48, %v777_v2  ;;  %v597_v5 = vpop.f32.mrf.mxu1  ;;  %v976_v2 = vld [vmem:[#allocation4 + $0x108] sm:$0xff] }
 0x18f   : > { %706 = vst.msk [vmem:[#allocation4 + $0xf0] sm:$0xff] %vm486_vm3, %v686_v1  ;;  %v598_v6 = vadd.f32 %v4011_v39, %v597_v5  ;;  %v872_v7 = vpop.f32.mrf.mxu0 }
 0x190   : > { %798 = vst.msk [vmem:[#allocation4 + $0x170] sm:$0xff] %vm486_vm3, %v778_v4  ;;  %v873_v8 = vadd.f32 %v4016_v37, %v872_v7  ;;  %v948_v37 = vld [vmem:[#allocation4 + $0x80] sm:$0xff] }
 0x191   : > { %615 = vst.msk [vmem:[#allocation4 + $0x78] sm:$0xff] %vm486_vm3, %v598_v6 }
 0x192   : > { %891 = vst.msk [vmem:[#allocation4 + $0x1f8] sm:$0xff] %vm486_vm3, %v873_v8 }
 0x194   : > { %v688_v11 = vpop.f32.mrf.mxu2 }
 0x195   : > { %v689_v34 = vadd.f32 %v4026_v47, %v688_v11  ;;  %v780_v41 = vpop.f32.mrf.mxu3 }
 0x196   : > { %v781_v12 = vadd.f32 %v4033_v48, %v780_v41  ;;  %v940_v14 = vpop.f32.mrf.mxu1 }
 0x197   : > { %707 = vst.msk [vmem:[#allocation4 + $0xf8] sm:$0xff] %vm486_vm3, %v689_v34  ;;  %v946_v39 = vadd.f32 %v940_v14, %v915_v13 }
 0x198   : > { %799 = vst.msk [vmem:[#allocation4 + $0x178] sm:$0xff] %vm486_vm3, %v781_v12 }
 0x199   : > { %v3230_v15 = vmul.f32 -1.442695, %v946_v39 }
 0x19b   : > { %3372 = vpow2.f32 %v3230_v15 }
 0x19c   : > { %v967_v16 = vpop.f32.mrf.mxu2 }
 0x19d   : > { %v973_v17 = vadd.f32 %v967_v16, %v948_v37  ;;  %v994_v27 = vpop.f32.mrf.mxu3 }
 0x19e   : > { %v943_v20 = vpop.f32.mrf.mxu1  ;;  %v1000_v61 = vadd.f32 %v994_v27, %v975_v36 }
 0x19f   : > { %v3232_v21 = vmul.f32 -1.442695, %v973_v17  ;;  %v947_v22 = vadd.f32 %v943_v20, %v916_v19 }
 0x1a1   : > { %v3373_v47 = vpop.eup %3372  ;;  %3374 = vpow2.f32 %v3232_v21  ;;  %v3231_v23 = vmul.f32 -1.442695, %v947_v22  ;;  %v913_v21 = vld [vmem:[#allocation3] sm:$0xff] }
 0x1a2   : > { %v1035_v48 = vadd.f32 1.0, %v3373_v47 }
 0x1a3   : > { %3376 = vpow2.f32 %v3231_v23 }
 0x1a4   : > { %3378 = vrcp.f32 %v1035_v48  ;;  %v970_v26 = vpop.f32.mrf.mxu2  ;;  %vm1042_vm4 = vweird.f32 %v1035_v48  ;;  %v1046_v5 = vand.u32 2147483647, %v1035_v48  ;;  %v1048_v6 = vand.u32 2147483648, %v1035_v48 }
 0x1a5   : > { %v974_v30 = vadd.f32 %v970_v26, %v949_v25  ;;  %v997_v42 = vpop.f32.mrf.mxu3 }
 0x1a6   : > { %v1021_v33 = vpop.f32.mrf.mxu1  ;;  %v1001_v7 = vadd.f32 %v997_v42, %v976_v2  ;;  %vm1047_vm8 = vcmp.eq.f32.partialorder %v1046_v5, 8.507059e+37  ;;  %v1049_v37 = vor.u32 1.1754944e-38, %v1048_v6 }
 0x1a7   : > { %v3375_v38 = vpop.eup %3374  ;;  %v3233_v40 = vmul.f32 -1.442695, %v974_v30  ;;  %v1027_v43 = vadd.f32 %v1021_v33, %v1002_v31 }
 0x1a8   : > { %v1073_v44 = vadd.f32 1.0, %v3375_v38 }
 0x1a9   : > { %v3377_v45 = vpop.eup %3376  ;;  %3380 = vpow2.f32 %v3233_v40  ;;  %v3234_v46 = vmul.f32 -1.442695, %v1027_v43 }
 0x1aa   : > { %v3379_v49 = vpop.eup %3378  ;;  %3382 = vrcp.f32 %v1073_v44  ;;  %v4180_v52 = vadd.f32 1.0, %v3377_v45  ;;  %v1086_v34 = vand.u32 2147483648, %v1073_v44  ;;  %v1084_v13 = vand.u32 2147483647, %v1073_v44 }
 0x1ab   : > { %v1038_v51 = vmul.f32 %v3379_v49, %v1035_v48  ;;  %3384 = vpow2.f32 %v3234_v46  ;;  %vm1043_vm5 = vweird.f32 %v3379_v49  ;;  %vm1080_vm9 = vweird.f32 %v1073_v44 }
 0x1ac   : > { %3386 = vrcp.f32 %v4180_v52  ;;  %vm4191_vm6 = vmor %vm1042_vm4, %vm1043_vm5  ;;  %v1087_v17 = vor.u32 1.1754944e-38, %v1086_v34  ;;  %vm1085_vm11 = vcmp.eq.f32.partialorder %v1084_v13, 8.507059e+37  ;;  %vm1057_vm12 = vweird.f32 %v4180_v52 }
 0x1ad   : > { %v1039_v53 = vsub.f32 1.0, %v1038_v51  ;;  %v1061_v26 = vand.u32 2147483647, %v4180_v52  ;;  %v1063_v33 = vand.u32 2147483648, %v4180_v52 }
 0x1ae   : > { %v1024_v55 = vpop.f32.mrf.mxu1 }
 0x1af   : > { %v3381_v35 = vpop.eup %3380  ;;  %v1040_v56 = vmul.f32 %v3379_v49, %v1039_v53  ;;  %v1028_v57 = vadd.f32 %v1024_v55, %v1003_v54  ;;  %vm1062_vm1 = vcmp.eq.f32.partialorder %v1061_v26, 8.507059e+37 }
 0x1b0   : > { %v3383_v60 = vpop.eup %3382  ;;  %v4183_v62 = vadd.f32 1.0, %v3381_v35 }
 0x1b1   : > { %v3385_v63 = vpop.eup %3384  ;;  %v1076_v0 = vmul.f32 %v3383_v60, %v1073_v44  ;;  %v1041_v1 = vadd.f32 %v3379_v49, %v1040_v56  ;;  %v3235_v4 = vmul.f32 -1.442695, %v1028_v57  ;;  %vm1081_vm7 = vweird.f32 %v3383_v60 }
 0x1b2   : > { %3388 = vrcp.f32 %v4183_v62  ;;  %v4186_v8 = vpop.eup %3386  ;;  %v4188_v41 = vadd.f32 1.0, %v3385_v63  ;;  %vm1082_vm10 = vmor %vm1080_vm9, %vm1081_vm7  ;;  %v1101_v46 = vand.u32 2147483648, %v4183_v62  ;;  %v1099_v51 = vand.u32 2147483647, %v4183_v62 }
 0x1b3   : > { %v1077_v11 = vsub.f32 1.0, %v1076_v0  ;;  %3390 = vpow2.f32 %v3235_v4  ;;  %v1053_v14 = vmul.f32 %v4186_v8, %v4180_v52  ;;  %v1045_v15 = vsel %vm4191_vm6, %v3379_v49, %v1041_v1  ;;  %v1248_v49 = vld [vmem:[#allocation4 + $0x190] sm:$0xff] }
 0x1b4   : > { %3392 = vtanh.f32 %v1000_v61  ;;  %v1050_v22 = vsel %vm1047_vm8, %v1049_v37, %v1045_v15  ;;  %vm1058_vm13 = vweird.f32 %v4186_v8  ;;  %vm1095_vm0 = vweird.f32 %v4183_v62  ;;  %v914_v61 = vld [vmem:[#allocation3 + $0x8] sm:$0xff] }
 0x1b5   : > { %v1078_v39 = vmul.f32 %v3383_v60, %v1077_v11  ;;  %3394 = vrcp.f32 %v4188_v41  ;;  %v1054_v16 = vsub.f32 1.0, %v1053_v14  ;;  %vm4212_vm14 = vmor %vm1057_vm12, %vm1058_vm13  ;;  %v1064_v52 = vor.u32 1.1754944e-38, %v1063_v33 }
 0x1b6   : > { %3396 = vtanh.f32 %v1001_v7  ;;  %v1102_v42 = vor.u32 1.1754944e-38, %v1101_v46  ;;  %v1124_v1 = vand.u32 2147483647, %v4188_v41  ;;  %vm1100_vm5 = vcmp.eq.f32.partialorder %v1099_v51, 8.507059e+37 }
 0x1b7   : > { %v1079_v19 = vadd.f32 %v3383_v60, %v1078_v39  ;;  %v1055_v47 = vmul.f32 %v4186_v8, %v1054_v16  ;;  %vm1120_vm6 = vweird.f32 %v4188_v41 }
 0x1b8   : > { %v3389_v20 = vpop.eup %3388  ;;  %vm1125_vm8 = vcmp.eq.f32.partialorder %v1124_v1, 8.507059e+37 }
 0x1b9   : > { %v3391_v23 = vpop.eup %3390  ;;  %v1083_v48 = vsel %vm1082_vm10, %v3383_v60, %v1079_v19  ;;  %v1091_v25 = vmul.f32 %v3389_v20, %v4183_v62  ;;  %v1056_v31 = vadd.f32 %v4186_v8, %v1055_v47  ;;  %vm1096_vm15 = vweird.f32 %v3389_v20  ;;  %v4243_v19 = vld [vmem:[%s4937_s5 + $0x58] sm:$0xff] }
 0x1ba   : > { %v3393_v27 = vpop.eup %3392  ;;  %v1088_v30 = vsel %vm1085_vm11, %v1087_v17, %v1083_v48  ;;  %v4207_v38 = vadd.f32 1.0, %v3391_v23  ;;  %v1126_v60 = vand.u32 2147483648, %v4188_v41  ;;  %vm1097_vm2 = vmor %vm1095_vm0, %vm1096_vm15  ;;  %v4258_v23 = vld [vmem:[%s4937_s5 + $0x10] sm:$0xff] }
 0x1bb   : > { %v3395_v40 = vpop.eup %3394  ;;  %v1145_v43 = vmul.f32 %v1088_v30, %v913_v21  ;;  %v1147_v44 = vmul.f32 %v3393_v27, %v1050_v22  ;;  %v1092_v45 = vsub.f32 1.0, %v1091_v25  ;;  %v1060_v36 = vsel %vm4212_vm14, %v4186_v8, %v1056_v31  ;;  %v4250_v21 = vld [vmem:[%s4937_s5 + $0x18] sm:$0xff] }
 0x1bc   : > { %v1116_v53 = vmul.f32 %v3395_v40, %v4188_v41  ;;  %3398 = vrcp.f32 %v4207_v38  ;;  %v3397_v54 = vpop.eup %3396  ;;  %v1065_v63 = vsel %vm1062_vm1, %v1064_v52, %v1060_v36  ;;  %vm1121_vm4 = vweird.f32 %v3395_v40  ;;  %v1159_v27 = vld [vmem:[#allocation4 + $0x18] sm:$0xff]  ;;  %v1220_v36 = vld [vmem:[#allocation4 + $0x110] sm:$0xff] }
 0x1bd   : > { %v4219_v55 = vadd.f32 %v1147_v44, %v1145_v43  ;;  %v1093_v35 = vmul.f32 %v3389_v20, %v1092_v45  ;;  %v1148_v7 = vmul.f32 %v3397_v54, %v1065_v63  ;;  %vm1122_vm7 = vmor %vm1120_vm6, %vm1121_vm4  ;;  %v1127_v8 = vor.u32 1.1754944e-38, %v1126_v60  ;;  %v1193_v31 = vld [vmem:[#allocation4 + $0x98] sm:$0xff] }
 0x1be   : > { %v1117_v56 = vsub.f32 1.0, %v1116_v53  ;;  %v1141_v15 = vand.u32 2147483648, %v4207_v38  ;;  %v1139_v16 = vand.u32 2147483647, %v4207_v38  ;;  %vm1135_vm10 = vweird.f32 %v4207_v38 }
 0x1bf   : > { %3400 = vtanh.f32 %v4219_v55  ;;  %v1094_v57 = vadd.f32 %v3389_v20, %v1093_v35 }
 0x1c0   : > { %v1118_v0 = vmul.f32 %v3395_v40, %v1117_v56  ;;  %vm1140_vm12 = vcmp.eq.f32.partialorder %v1139_v16, 8.507059e+37 }
 0x1c1   : > { %v1098_v2 = vsel %vm1097_vm2, %v3389_v20, %v1094_v57  ;;  %v1142_v20 = vor.u32 1.1754944e-38, %v1141_v15 }
 0x1c2   : > { %v3399_v4 = vpop.eup %3398  ;;  %v1103_v62 = vsel %vm1100_vm5, %v1102_v42, %v1098_v2  ;;  %v1119_v5 = vadd.f32 %v3395_v40, %v1118_v0 }
 0x1c3   : > { %v1146_v6 = vmul.f32 %v1103_v62, %v914_v61  ;;  %v1131_v11 = vmul.f32 %v3399_v4, %v4207_v38  ;;  %vm1136_vm9 = vweird.f32 %v3399_v4 }
 0x1c4   : > { %v1123_v34 = vsel %vm1122_vm7, %v3395_v40, %v1119_v5  ;;  %vm1137_vm11 = vmor %vm1135_vm10, %vm1136_vm9 }
 0x1c5   : > { %v3401_v12 = vpop.eup %3400  ;;  %v4230_v13 = vadd.f32 %v1148_v7, %v1146_v6  ;;  %v1132_v14 = vsub.f32 1.0, %v1131_v11  ;;  %v1128_v39 = vsel %vm1125_vm8, %v1127_v8, %v1123_v34 }
 0x1c6   : > { %v1153_v37 = vmul.f32 %v3401_v12, %v1128_v39  ;;  %v1249_v12 = vld [vmem:[#allocation4 + $0x198] sm:$0xff] }
 0x1c7   : > { %3402 = vtanh.f32 %v4230_v13  ;;  %v1133_v41 = vmul.f32 %v3399_v4, %v1132_v14 }
 0x1c8   : > { %1155 = vst.msk [vmem:[#allocation5] sm:$0xff] %vm486_vm3, %v1153_v37  ;;  %3236 = vmatmul.msk.f32.vlgmr.msrb.gmra.mxu2 %vm486_vm3, %v1153_v37  ;;  %3238 = vmatmul.msk.f32.vlgmr.msrb.gmra.mxu3 %vm486_vm3, %v1153_v37 }
 0x1c9   : > { %3240 = vmatmul.msk.f32.vlgmr.msra.gmra.mxu1 %vm486_vm3, %v1153_v37  ;;  %v1134_v17 = vadd.f32 %v3399_v4, %v1133_v41  ;;  %1481 = vmatpush.msrb.mxu2 %v4243_v19 }
 0x1ca   : > { %1509 = vmatpush.msrb.mxu3 %v3973_v24  ;;  %1672 = vmatpush.msra.mxu1 %v4250_v21 }
 0x1cb   : > { %v1138_v22 = vsel %vm1137_vm11, %v3399_v4, %v1134_v17  ;;  %1482 = vmatpush.msrb.mxu2 %v3866_v50  ;;  %v4275_v50 = vld [vmem:[%s4937_s5 + $0x38] sm:$0xff] }
 0x1cc   : > { %v1143_v47 = vsel %vm1140_vm12, %v1142_v20, %v1138_v22  ;;  %1510 = vmatpush.msrb.mxu3 %v3984_v28  ;;  %1673 = vmatpush.msra.mxu1 %v4258_v23 }
 0x1cd   : > { %v3403_v24 = vpop.eup %3402  ;;  %1483 = vmatpush.msrb.mxu2 %v3906_v3  ;;  %v1158_v3 = vld [vmem:[#allocation4 + $0x10] sm:$0xff] }
 0x1ce   : > { %v1154_v48 = vmul.f32 %v3403_v24, %v1143_v47  ;;  %1511 = vmatpush.msrb.mxu3 %v3989_v29  ;;  %1674 = vmatpush.msra.mxu1 %v3888_v59  ;;  %v4281_v59 = vld [vmem:[%s4937_s5 + $0x30] sm:$0xff] }
 0x1cf   : > { %1484 = vmatpush.msrb.mxu2 %v3953_v18  ;;  %v1192_v18 = vld [vmem:[#allocation4 + $0x90] sm:$0xff] }
 0x1d0   : > { %1156 = vst.msk [vmem:[#allocation5 + $0x8] sm:$0xff] %vm486_vm3, %v1154_v48  ;;  %3237 = vmatmul.msk.f32.gmra.mxu2 %vm486_vm3, %v1154_v48  ;;  %3239 = vmatmul.msk.f32.gmra.mxu3 %vm486_vm3, %v1154_v48 }
 0x1d1   : > { %3241 = vmatmul.msk.f32.gmra.mxu1 %vm486_vm3, %v1154_v48  ;;  %1512 = vmatpush.msrb.mxu3 %v3996_v32 }
 0x1d2   : > { %1675 = vmatpush.msra.mxu1 %v3927_v10 }
 0x1d8   : > { %3242 = vmatmul.msk.f32.vlgmr.msra.gmra.mxu2 %vm486_vm3, %v1153_v37 }
 0x1d9   : > { %1700 = vmatpush.msra.mxu2 %v4275_v50 }
 0x1db   : > { %1701 = vmatpush.msra.mxu2 %v4281_v59 }
 0x1dd   : > { %1702 = vmatpush.msra.mxu2 %v3883_v58 }
 0x1df   : > { %1703 = vmatpush.msra.mxu2 %v3922_v9 }
 0x1e0   : > { %3243 = vmatmul.msk.f32.gmra.mxu2 %vm486_vm3, %v1154_v48 }
 0x246   : > { %v1239_v53 = vpop.f32.mrf.mxu1 }
 0x247   : > { %v1245_v42 = vadd.f32 %v1239_v53, %v1220_v36 }
 0x24b   : > { %v1183_v10 = vpop.f32.mrf.mxu2  ;;  %v1211_v28 = vpop.f32.mrf.mxu3 }
 0x24c   : > { %v1189_v29 = vadd.f32 %v1183_v10, %v1158_v3  ;;  %v1217_v32 = vadd.f32 %v1211_v28, %v1192_v18 }
 0x24e   : > { %v3244_v25 = vmul.f32 -1.442695, %v1189_v29  ;;  %v3246_v26 = vmul.f32 -1.442695, %v1217_v32  ;;  %v1242_v18 = vpop.f32.mrf.mxu1 }
 0x250   : > { %3404 = vpow2.f32 %v3244_v25 }
 0x251   : > { %3406 = vpow2.f32 %v3246_v26 }
 0x253   : > { %v1186_v30 = vpop.f32.mrf.mxu2  ;;  %v1214_v33 = vpop.f32.mrf.mxu3 }
 0x254   : > { %v1190_v38 = vadd.f32 %v1186_v30, %v1159_v27  ;;  %v1218_v58 = vadd.f32 %v1214_v33, %v1193_v31  ;;  %v1221_v27 = vld [vmem:[#allocation4 + $0x118] sm:$0xff] }
 0x255   : > { %v1246_v31 = vadd.f32 %v1242_v18, %v1221_v27  ;;  %v4375_v18 = vld [vmem:[%s4937_s5 + $0x40] sm:$0xff] }
 0x256   : > { %v3405_v40 = vpop.eup %3404  ;;  %v3245_v9 = vmul.f32 -1.442695, %v1190_v38  ;;  %v3247_v45 = vmul.f32 -1.442695, %v1218_v58 }
 0x257   : > { %v3407_v43 = vpop.eup %3406  ;;  %v1281_v44 = vadd.f32 1.0, %v3405_v40 }
 0x258   : > { %v1319_v46 = vadd.f32 1.0, %v3407_v43  ;;  %3408 = vpow2.f32 %v3245_v9 }
 0x259   : > { %3410 = vrcp.f32 %v1281_v44  ;;  %v1292_v4 = vand.u32 2147483647, %v1281_v44  ;;  %v1294_v62 = vand.u32 2147483648, %v1281_v44  ;;  %vm1288_vm15 = vweird.f32 %v1281_v44 }
 0x25a   : > { %3412 = vrcp.f32 %v1319_v46  ;;  %v1332_v8 = vand.u32 2147483648, %v1319_v46  ;;  %v1330_v34 = vand.u32 2147483647, %v1319_v46  ;;  %vm1326_vm0 = vweird.f32 %v1319_v46 }
 0x25b   : > { %3414 = vpow2.f32 %v3247_v45  ;;  %v1267_v51 = vpop.f32.mrf.mxu2  ;;  %vm1293_vm2 = vcmp.eq.f32.partialorder %v1292_v4, 8.507059e+37  ;;  %v1295_v41 = vor.u32 1.1754944e-38, %v1294_v62 }
 0x25c   : > { %v1273_v54 = vadd.f32 %v1267_v51, %v1248_v49  ;;  %v1333_v22 = vor.u32 1.1754944e-38, %v1332_v8  ;;  %vm1331_vm5 = vcmp.eq.f32.partialorder %v1330_v34, 8.507059e+37  ;;  %v1440_v51 = vld [vmem:[#allocation4 + $0xa8] sm:$0xff] }
 0x25e   : > { %v3409_v35 = vpop.eup %3408  ;;  %v3248_v52 = vmul.f32 -1.442695, %v1273_v54 }
 0x25f   : > { %v3411_v56 = vpop.eup %3410  ;;  %v4287_v57 = vadd.f32 1.0, %v3409_v35 }
 0x260   : > { %v3413_v60 = vpop.eup %3412  ;;  %v1284_v61 = vmul.f32 %v3411_v56, %v1281_v44  ;;  %3416 = vpow2.f32 %v3248_v52  ;;  %vm1289_vm13 = vweird.f32 %v3411_v56 }
 0x261   : > { %v3415_v63 = vpop.eup %3414  ;;  %v1322_v0 = vmul.f32 %v3413_v60, %v1319_v46  ;;  %3418 = vrcp.f32 %v4287_v57  ;;  %vm1327_vm14 = vweird.f32 %v3413_v60  ;;  %vm1290_vm1 = vmor %vm1288_vm15, %vm1289_vm13  ;;  %v1307_v38 = vand.u32 2147483647, %v4287_v57 }
 0x262   : > { %v1285_v1 = vsub.f32 1.0, %v1284_v61  ;;  %v4290_v2 = vadd.f32 1.0, %v3415_v63  ;;  %3420 = vtanh.f32 %v1245_v42  ;;  %vm1328_vm4 = vmor %vm1326_vm0, %vm1327_vm14  ;;  %v1309_v58 = vand.u32 2147483648, %v4287_v57 }
 0x263   : > { %v1323_v5 = vsub.f32 1.0, %v1322_v0  ;;  %v1270_v6 = vpop.f32.mrf.mxu2  ;;  %vm1303_vm7 = vweird.f32 %v4287_v57  ;;  %vm4311_vm10 = vcmp.eq.f32.partialorder %v1307_v38, 8.507059e+37 }
 0x264   : > { %v1286_v7 = vmul.f32 %v3411_v56, %v1285_v1  ;;  %3422 = vrcp.f32 %v4290_v2  ;;  %v1274_v15 = vadd.f32 %v1270_v6, %v1249_v12  ;;  %v1345_v43 = vand.u32 2147483647, %v4290_v2 }
 0x265   : > { %v1324_v11 = vmul.f32 %v3413_v60, %v1323_v5  ;;  %v1347_v44 = vand.u32 2147483648, %v4290_v2  ;;  %v1310_v35 = vor.u32 1.1754944e-38, %v1309_v58  ;;  %vm1341_vm11 = vweird.f32 %v4290_v2 }
 0x266   : > { %v3417_v14 = vpop.eup %3416  ;;  %v1287_v39 = vadd.f32 %v3411_v56, %v1286_v7  ;;  %v3249_v24 = vmul.f32 -1.442695, %v1274_v15  ;;  %vm1346_vm13 = vcmp.eq.f32.partialorder %v1345_v43, 8.507059e+37 }
 0x267   : > { %v3419_v37 = vpop.eup %3418  ;;  %v1325_v16 = vadd.f32 %v3413_v60, %v1324_v11  ;;  %v4293_v17 = vadd.f32 1.0, %v3417_v14 }
 0x268   : > { %v1291_v20 = vsel %vm1290_vm1, %v3411_v56, %v1287_v39  ;;  %v1299_v47 = vmul.f32 %v3419_v37, %v4287_v57  ;;  %v3421_v48 = vpop.eup %3420  ;;  %vm1304_vm6 = vweird.f32 %v3419_v37  ;;  %v1348_v56 = vor.u32 1.1754944e-38, %v1347_v44 }
 0x269   : > { %v1296_v3 = vsel %vm1293_vm2, %v1295_v41, %v1291_v20  ;;  %v1329_v10 = vsel %vm1328_vm4, %v3413_v60, %v1325_v16  ;;  %3424 = vrcp.f32 %v4293_v17  ;;  %vm4307_vm9 = vmor %vm1303_vm7, %vm1304_vm6  ;;  %v1370_v57 = vand.u32 2147483647, %v4293_v17  ;;  %v4344_v16 = vld [vmem:[%s4937_s5 + $0x50] sm:$0xff] }
 0x26a   : > { %v3423_v28 = vpop.eup %3422  ;;  %v1334_v29 = vsel %vm1331_vm5, %v1333_v22, %v1329_v10  ;;  %v1300_v32 = vsub.f32 1.0, %v1299_v47  ;;  %v1393_v25 = vmul.f32 %v3421_v48, %v1296_v3  ;;  %3426 = vpow2.f32 %v3249_v24  ;;  %v4350_v22 = vld [vmem:[%s4937_s5 + $0x70] sm:$0xff]  ;;  %v4357_v47 = vld [vmem:[%s4937_s5 + $0x48] sm:$0xff] }
 0x26b   : > { %v1391_v26 = vmul.f32 %v1334_v29, %v4219_v55  ;;  %v1337_v30 = vmul.f32 %v3423_v28, %v4290_v2  ;;  %vm1342_vm8 = vweird.f32 %v3423_v28  ;;  %3428 = vtanh.f32 %v1246_v31  ;;  %v4363_v48 = vld [vmem:[%s4937_s5 + $0x68] sm:$0xff]  ;;  %v4381_v29 = vld [vmem:[%s4937_s5 + $0x60] sm:$0xff] }
 0x26c   : > { %v1301_v33 = vmul.f32 %v3419_v37, %v1300_v32  ;;  %vm1343_vm12 = vmor %vm1341_vm11, %vm1342_vm8  ;;  %v1372_v61 = vand.u32 2147483648, %v4293_v17  ;;  %vm1366_vm15 = vweird.f32 %v4293_v17  ;;  %vm1371_vm1 = vcmp.eq.f32.partialorder %v1370_v57, 8.507059e+37  ;;  %v4369_v3 = vld [vmem:[%s4937_s5 + $0x8] sm:$0xff]  ;;  %v4387_v32 = vld [vmem:[%s4937_s5] sm:$0xff] }
 0x26d   : > { %v1338_v40 = vsub.f32 1.0, %v1337_v30  ;;  %v4304_v46 = vadd.f32 %v1393_v25, %v1391_v26  ;;  %v4400_v30 = vld [vmem:[%s4937_s5 + $0x28] sm:$0xff]  ;;  %v4406_v31 = vld [vmem:[%s4937_s5 + $0x20] sm:$0xff] }
 0x26e   : > { %v1302_v9 = vadd.f32 %v3419_v37, %v1301_v33  ;;  %v1373_v7 = vor.u32 1.1754944e-38, %v1372_v61  ;;  %v1439_v33 = vld [vmem:[#allocation4 + $0xa0] sm:$0xff] }
 0x26f   : > { %v3425_v45 = vpop.eup %3424  ;;  %v1339_v55 = vmul.f32 %v3423_v28, %v1338_v40  ;;  %3430 = vtanh.f32 %v4304_v46 }
 0x270   : > { %v1362_v53 = vmul.f32 %v3425_v45, %v4293_v17  ;;  %v1306_v54 = vsel %vm4307_vm9, %v3419_v37, %v1302_v9  ;;  %v3427_v52 = vpop.eup %3426  ;;  %vm1367_vm14 = vweird.f32 %v3425_v45  ;;  %v4336_v37 = vld [vmem:[%s4937_s5 + $0x78] sm:$0xff]  ;;  %v1405_v9 = vld [vmem:[#allocation4 + $0x20] sm:$0xff] }
 0x271   : > { %v1340_v36 = vadd.f32 %v3423_v28, %v1339_v55  ;;  %v1360_v63 = vadd.f32 1.0, %v3427_v52  ;;  %v1311_v0 = vsel %vm4311_vm10, %v1310_v35, %v1306_v54  ;;  %v3429_v2 = vpop.eup %3428  ;;  %vm1368_vm0 = vmor %vm1366_vm15, %vm1367_vm14 }
 0x272   : > { %v1363_v42 = vsub.f32 1.0, %v1362_v53  ;;  %v1394_v5 = vmul.f32 %v3429_v2, %v1311_v0 }
 0x273   : > { %v1344_v60 = vsel %vm1343_vm12, %v3423_v28, %v1340_v36  ;;  %3432 = vrcp.f32 %v1360_v63  ;;  %v1387_v41 = vand.u32 2147483648, %v1360_v63  ;;  %v1385_v20 = vand.u32 2147483647, %v1360_v63 }
 0x274   : > { %v1349_v1 = vsel %vm1346_vm13, %v1348_v56, %v1344_v60  ;;  %v1364_v4 = vmul.f32 %v3425_v45, %v1363_v42  ;;  %vm1381_vm4 = vweird.f32 %v1360_v63  ;;  %v1406_v56 = vld [vmem:[#allocation4 + $0x28] sm:$0xff] }
 0x275   : > { %v1392_v6 = vmul.f32 %v1349_v1, %v4230_v13  ;;  %v3431_v11 = vpop.eup %3430  ;;  %v1388_v10 = vor.u32 1.1754944e-38, %v1387_v41  ;;  %vm1386_vm6 = vcmp.eq.f32.partialorder %v1385_v20, 8.507059e+37 }
 0x276   : > { %v1365_v62 = vadd.f32 %v3425_v45, %v1364_v4 }
 0x277   : > { %v4326_v39 = vadd.f32 %v1394_v5, %v1392_v6 }
 0x278   : > { %v1369_v8 = vsel %vm1368_vm0, %v3425_v45, %v1365_v62  ;;  %v1495_v62 = vld [vmem:[#allocation4 + $0x1a0] sm:$0xff] }
 0x279   : > { %v1374_v34 = vsel %vm1371_vm1, %v1373_v7, %v1369_v8  ;;  %v3433_v14 = vpop.eup %3432  ;;  %3434 = vtanh.f32 %v4326_v39 }
 0x27a   : > { %v1399_v12 = vmul.f32 %v3431_v11, %v1374_v34  ;;  %v1377_v15 = vmul.f32 %v3433_v14, %v1360_v63  ;;  %vm1382_vm2 = vweird.f32 %v3433_v14 }
 0x27b   : > { %vm1383_vm5 = vmor %vm1381_vm4, %vm1382_vm2 }
 0x27c   : > { %1402 = vst.msk [vmem:[#allocation5 + $0x10] sm:$0xff] %vm486_vm3, %v1399_v12  ;;  %3250 = vmatmul.msk.f32.vlgmr.msra.gmra.mxu3 %vm486_vm3, %v1399_v12  ;;  %3252 = vmatmul.msk.f32.vlgmr.msrb.gmra.mxu1 %vm486_vm3, %v1399_v12  ;;  %v1378_v13 = vsub.f32 1.0, %v1377_v15  ;;  %v1467_v15 = vld [vmem:[#allocation4 + $0x120] sm:$0xff] }
 0x27d   : > { %3254 = vmatmul.msk.f32.vlgmr.msrb.gmra.mxu2 %vm486_vm3, %v1399_v12  ;;  %1728 = vmatpush.msra.mxu3 %v4243_v19 }
 0x27e   : > { %1756 = vmatpush.msrb.mxu1 %v4336_v37  ;;  %1919 = vmatpush.msrb.mxu2 %v4250_v21  ;;  %v1379_v17 = vmul.f32 %v3433_v14, %v1378_v13 }
 0x27f   : > { %1729 = vmatpush.msra.mxu3 %v4344_v16  ;;  %v3435_v25 = vpop.eup %3434 }
 0x280   : > { %1757 = vmatpush.msrb.mxu1 %v4350_v22  ;;  %1920 = vmatpush.msrb.mxu2 %v4258_v23  ;;  %v1380_v24 = vadd.f32 %v3433_v14, %v1379_v17 }
 0x281   : > { %1730 = vmatpush.msra.mxu3 %v4357_v47 }
 0x282   : > { %1758 = vmatpush.msrb.mxu1 %v4363_v48  ;;  %1921 = vmatpush.msrb.mxu2 %v4369_v3  ;;  %v1384_v28 = vsel %vm1383_vm5, %v3433_v14, %v1380_v24 }
 0x283   : > { %1731 = vmatpush.msra.mxu3 %v4375_v18  ;;  %v1389_v26 = vsel %vm1386_vm6, %v1388_v10, %v1384_v28 }
 0x284   : > { %1759 = vmatpush.msrb.mxu1 %v4381_v29  ;;  %1922 = vmatpush.msrb.mxu2 %v4387_v32  ;;  %v1400_v27 = vmul.f32 %v3435_v25, %v1389_v26 }
 0x286   : > { %1403 = vst.msk [vmem:[#allocation5 + $0x18] sm:$0xff] %vm486_vm3, %v1400_v27  ;;  %3251 = vmatmul.msk.f32.gmra.mxu3 %vm486_vm3, %v1400_v27  ;;  %3253 = vmatmul.msk.f32.gmra.mxu1 %vm486_vm3, %v1400_v27 }
 0x287   : > { %3255 = vmatmul.msk.f32.gmra.mxu2 %vm486_vm3, %v1400_v27 }
 0x28e   : > { %3256 = vmatmul.msk.f32.vlgmr.msrb.gmra.mxu3 %vm486_vm3, %v1399_v12 }
 0x28f   : > { %1947 = vmatpush.msrb.mxu3 %v4275_v50 }
 0x291   : > { %1948 = vmatpush.msrb.mxu3 %v4281_v59 }
 0x293   : > { %1949 = vmatpush.msrb.mxu3 %v4400_v30 }
 0x295   : > { %1950 = vmatpush.msrb.mxu3 %v4406_v31 }
 0x296   : > { %3257 = vmatmul.msk.f32.gmra.mxu3 %vm486_vm3, %v1400_v27  ;;  %v1496_v27 = vld [vmem:[#allocation4 + $0x1a8] sm:$0xff] }
 0x2f9   : > { %v1458_v38 = vpop.f32.mrf.mxu1 }
 0x2fa   : > { %v1464_v58 = vadd.f32 %v1458_v38, %v1439_v33 }
 0x2fc   : > { %v3260_v40 = vmul.f32 -1.442695, %v1464_v58 }
 0x2fe   : > { %3436 = vpow2.f32 %v3260_v40 }
 0x2ff   : > { %v1430_v43 = vpop.f32.mrf.mxu3 }
 0x300   : > { %v1436_v44 = vadd.f32 %v1430_v43, %v1405_v9  ;;  %v1486_v8 = vpop.f32.mrf.mxu2 }
 0x301   : > { %v1492_v41 = vadd.f32 %v1486_v8, %v1467_v15 }
 0x302   : > { %v3258_v45 = vmul.f32 -1.442695, %v1436_v44 }
 0x303   : > { %v1461_v53 = vpop.f32.mrf.mxu1 }
 0x304   : > { %v3437_v55 = vpop.eup %3436  ;;  %3438 = vpow2.f32 %v3258_v45  ;;  %v1465_v54 = vadd.f32 %v1461_v53, %v1440_v51 }
 0x305   : > { %v4410_v49 = vadd.f32 1.0, %v3437_v55 }
 0x306   : > { %v3261_v35 = vmul.f32 -1.442695, %v1465_v54 }
 0x307   : > { %3440 = vrcp.f32 %v4410_v49  ;;  %v1579_v38 = vand.u32 2147483648, %v4410_v49  ;;  %vm1573_vm11 = vweird.f32 %v4410_v49  ;;  %v1577_v43 = vand.u32 2147483647, %v4410_v49 }
 0x308   : > { %3442 = vpow2.f32 %v3261_v35 }
 0x309   : > { %v1433_v42 = vpop.f32.mrf.mxu3  ;;  %vm1578_vm14 = vcmp.eq.f32.partialorder %v1577_v43, 8.507059e+37 }
 0x30a   : > { %v3439_v36 = vpop.eup %3438  ;;  %v1437_v57 = vadd.f32 %v1433_v42, %v1406_v56 }
 0x30b   : > { %v1528_v52 = vadd.f32 1.0, %v3439_v36 }
 0x30c   : > { %v3259_v61 = vmul.f32 -1.442695, %v1437_v57  ;;  %v1489_v57 = vpop.f32.mrf.mxu2 }
 0x30d   : > { %v3441_v60 = vpop.eup %3440  ;;  %3444 = vrcp.f32 %v1528_v52  ;;  %v1541_v10 = vand.u32 2147483648, %v1528_v52  ;;  %vm1535_vm9 = vweird.f32 %v1528_v52  ;;  %v1539_v25 = vand.u32 2147483647, %v1528_v52 }
 0x30e   : > { %v1569_v63 = vmul.f32 %v3441_v60, %v4410_v49  ;;  %v3443_v0 = vpop.eup %3442  ;;  %3446 = vpow2.f32 %v3259_v61  ;;  %vm1574_vm8 = vweird.f32 %v3441_v60 }
 0x30f   : > { %v4414_v1 = vadd.f32 1.0, %v3443_v0  ;;  %vm4433_vm12 = vmor %vm1573_vm11, %vm1574_vm8  ;;  %v1542_v55 = vor.u32 1.1754944e-38, %v1541_v10  ;;  %vm1540_vm13 = vcmp.eq.f32.partialorder %v1539_v25, 8.507059e+37 }
 0x310   : > { %v1570_v2 = vsub.f32 1.0, %v1569_v63 }
 0x311   : > { %3448 = vrcp.f32 %v4414_v1  ;;  %v1514_v5 = vpop.f32.mrf.mxu3  ;;  %vm1588_vm4 = vweird.f32 %v4414_v1 }
 0x312   : > { %v1520_v7 = vadd.f32 %v1514_v5, %v1495_v62  ;;  %v1571_v14 = vmul.f32 %v3441_v60, %v1570_v2 }
 0x313   : > { %v3445_v4 = vpop.eup %3444 }
 0x314   : > { %v1531_v6 = vmul.f32 %v3445_v4, %v1528_v52  ;;  %v3447_v11 = vpop.eup %3446  ;;  %v3262_v12 = vmul.f32 -1.442695, %v1520_v7  ;;  %vm1536_vm7 = vweird.f32 %v3445_v4  ;;  %v1572_v26 = vadd.f32 %v3441_v60, %v1571_v14 }
 0x315   : > { %v4417_v13 = vadd.f32 1.0, %v3447_v11  ;;  %vm4425_vm10 = vmor %vm1535_vm9, %vm1536_vm7  ;;  %v1580_v52 = vor.u32 1.1754944e-38, %v1579_v38 }
 0x316   : > { %v1532_v34 = vsub.f32 1.0, %v1531_v6  ;;  %3450 = vpow2.f32 %v3262_v12  ;;  %v1576_v54 = vsel %vm4433_vm12, %v3441_v60, %v1572_v26  ;;  %v1594_v6 = vand.u32 2147483648, %v4414_v1 }
 0x317   : > { %v4419_v20 = vpop.eup %3448  ;;  %3452 = vrcp.f32 %v4417_v13  ;;  %v1581_v61 = vsel %vm1578_vm14, %v1580_v52, %v1576_v54  ;;  %vm1550_vm0 = vweird.f32 %v4417_v13  ;;  %v1556_v7 = vand.u32 2147483648, %v4417_v13 }
 0x318   : > { %v1533_v17 = vmul.f32 %v3445_v4, %v1532_v34  ;;  %v1584_v28 = vmul.f32 %v4419_v20, %v4414_v1  ;;  %3454 = vtanh.f32 %v1492_v41  ;;  %v1638_v60 = vmul.f32 %v1581_v61, %v4304_v46 }
 0x319   : > { %v1517_v33 = vpop.f32.mrf.mxu3  ;;  %vm1589_vm1 = vweird.f32 %v4419_v20  ;;  %v1554_v11 = vand.u32 2147483647, %v4417_v13  ;;  %v1592_v46 = vand.u32 2147483647, %v4414_v1  ;;  %v1595_v10 = vor.u32 1.1754944e-38, %v1594_v6 }
 0x31a   : > { %v1534_v24 = vadd.f32 %v3445_v4, %v1533_v17  ;;  %v1521_v40 = vadd.f32 %v1517_v33, %v1496_v27  ;;  %v1585_v51 = vsub.f32 1.0, %v1584_v28  ;;  %vm4458_vm5 = vmor %vm1588_vm4, %vm1589_vm1  ;;  %v1557_v28 = vor.u32 1.1754944e-38, %v1556_v7 }
 0x31b   : > { %vm1555_vm6 = vcmp.eq.f32.partialorder %v1554_v11, 8.507059e+37  ;;  %vm1593_vm7 = vcmp.eq.f32.partialorder %v1592_v46, 8.507059e+37 }
 0x31c   : > { %v1538_v9 = vsel %vm4425_vm10, %v3445_v4, %v1534_v24  ;;  %v3451_v44 = vpop.eup %3450  ;;  %v3263_v36 = vmul.f32 -1.442695, %v1521_v40  ;;  %v1586_v63 = vmul.f32 %v4419_v20, %v1585_v51  ;;  %v1468_v4 = vld [vmem:[#allocation4 + $0x128] sm:$0xff] }
 0x31d   : > { %v3453_v53 = vpop.eup %3452  ;;  %v1606_v35 = vadd.f32 1.0, %v3451_v44  ;;  %v1543_v56 = vsel %vm1540_vm13, %v1542_v55, %v1538_v9  ;;  %v1493_v62 = vadd.f32 %v1489_v57, %v1468_v4 }
 0x31e   : > { %v1546_v42 = vmul.f32 %v3453_v53, %v4417_v13  ;;  %v3455_v49 = vpop.eup %3454  ;;  %vm1551_vm15 = vweird.f32 %v3453_v53  ;;  %v1587_v34 = vadd.f32 %v4419_v20, %v1586_v63 }
 0x31f   : > { %3456 = vrcp.f32 %v1606_v35  ;;  %v1640_v2 = vmul.f32 %v3455_v49, %v1543_v56  ;;  %vm4450_vm2 = vmor %vm1550_vm0, %vm1551_vm15  ;;  %v1619_v33 = vand.u32 2147483648, %v1606_v35  ;;  %v1617_v58 = vand.u32 2147483647, %v1606_v35 }
 0x320   : > { %v1547_v0 = vsub.f32 1.0, %v1546_v42  ;;  %3458 = vpow2.f32 %v3263_v36  ;;  %v1591_v25 = vsel %vm4458_vm5, %v4419_v20, %v1587_v34  ;;  %vm1613_vm9 = vweird.f32 %v1606_v35 }
 0x321   : > { %v4448_v14 = vadd.f32 %v1640_v2, %v1638_v60  ;;  %3460 = vtanh.f32 %v1493_v62  ;;  %v1596_v9 = vsel %vm1593_vm7, %v1595_v10, %v1591_v25  ;;  %v1620_v45 = vor.u32 1.1754944e-38, %v1619_v33  ;;  %v1686_v2 = vld [vmem:[#allocation4 + $0xb0] sm:$0xff] }
 0x322   : > { %v1548_v5 = vmul.f32 %v3453_v53, %v1547_v0  ;;  %v1639_v20 = vmul.f32 %v1596_v9, %v4326_v39  ;;  %vm1618_vm11 = vcmp.eq.f32.partialorder %v1617_v58, 8.507059e+37  ;;  %v1714_v9 = vld [vmem:[#allocation4 + $0x130] sm:$0xff] }
 0x323   : > { %3462 = vtanh.f32 %v4448_v14 }
 0x324   : > { %v1549_v8 = vadd.f32 %v3453_v53, %v1548_v5 }
 0x325   : > { %v3457_v12 = vpop.eup %3456 }
 0x326   : > { %v1553_v41 = vsel %vm4450_vm2, %v3453_v53, %v1549_v8  ;;  %v1609_v17 = vmul.f32 %v3457_v12, %v1606_v35  ;;  %v3459_v24 = vpop.eup %3458  ;;  %vm1614_vm8 = vweird.f32 %v3457_v12 }
 0x327   : > { %v1607_v27 = vadd.f32 1.0, %v3459_v24  ;;  %v1558_v1 = vsel %vm1555_vm6, %v1557_v28, %v1553_v41  ;;  %v3461_v40 = vpop.eup %3460  ;;  %vm1615_vm10 = vmor %vm1613_vm9, %vm1614_vm8  ;;  %v1742_v28 = vld [vmem:[#allocation4 + $0x1b0] sm:$0xff] }
 0x328   : > { %v1610_v26 = vsub.f32 1.0, %v1609_v17  ;;  %v1641_v43 = vmul.f32 %v3461_v40, %v1558_v1 }
 0x329   : > { %3464 = vrcp.f32 %v1607_v27  ;;  %v3463_v51 = vpop.eup %3462  ;;  %v1634_v39 = vand.u32 2147483648, %v1607_v27  ;;  %v1632_v57 = vand.u32 2147483647, %v1607_v27  ;;  %vm1628_vm13 = vweird.f32 %v1607_v27 }
 0x32a   : > { %v1611_v38 = vmul.f32 %v3457_v12, %v1610_v26  ;;  %v4467_v36 = vadd.f32 %v1641_v43, %v1639_v20 }
 0x32b   : > { %vm1633_vm15 = vcmp.eq.f32.partialorder %v1632_v57, 8.507059e+37 }
 0x32c   : > { %v1612_v44 = vadd.f32 %v3457_v12, %v1611_v38  ;;  %3466 = vtanh.f32 %v4467_v36 }
 0x32e   : > { %v1616_v55 = vsel %vm1615_vm10, %v3457_v12, %v1612_v44  ;;  %v1687_v12 = vld [vmem:[#allocation4 + $0xb8] sm:$0xff] }
 0x32f   : > { %v1621_v53 = vsel %vm1618_vm11, %v1620_v45, %v1616_v55  ;;  %v3465_v54 = vpop.eup %3464  ;;  %v1743_v45 = vld [vmem:[#allocation4 + $0x1b8] sm:$0xff] }
 0x330   : > { %v1646_v52 = vmul.f32 %v3463_v51, %v1621_v53  ;;  %v1624_v56 = vmul.f32 %v3465_v54, %v1607_v27  ;;  %vm1629_vm12 = vweird.f32 %v3465_v54 }
 0x331   : > { %vm1630_vm14 = vmor %vm1628_vm13, %vm1629_vm12 }
 0x332   : > { %1649 = vst.msk [vmem:[#allocation5 + $0x20] sm:$0xff] %vm486_vm3, %v1646_v52  ;;  %3264 = vmatmul.msk.f32.vlgmr.msra.gmra.mxu1 %vm486_vm3, %v1646_v52  ;;  %3266 = vmatmul.msk.f32.vlgmr.msra.gmra.mxu2 %vm486_vm3, %v1646_v52  ;;  %v1625_v35 = vsub.f32 1.0, %v1624_v56  ;;  %v3467_v61 = vpop.eup %3466 }
 0x333   : > { %3268 = vmatmul.msk.f32.vlgmr.msra.gmra.mxu3 %vm486_vm3, %v1646_v52  ;;  %1975 = vmatpush.msra.mxu1 %v4243_v19  ;;  %v1635_v19 = vor.u32 1.1754944e-38, %v1634_v39 }
 0x334   : > { %2003 = vmatpush.msra.mxu2 %v4336_v37  ;;  %2166 = vmatpush.msra.mxu3 %v4250_v21  ;;  %v1626_v42 = vmul.f32 %v3465_v54, %v1625_v35 }
 0x335   : > { %1976 = vmatpush.msra.mxu1 %v4344_v16 }
 0x336   : > { %2004 = vmatpush.msra.mxu2 %v4350_v22  ;;  %2167 = vmatpush.msra.mxu3 %v4258_v23  ;;  %v1627_v49 = vadd.f32 %v3465_v54, %v1626_v42 }
 0x337   : > { %1977 = vmatpush.msra.mxu1 %v4357_v47 }
 0x338   : > { %2005 = vmatpush.msra.mxu2 %v4363_v48  ;;  %2168 = vmatpush.msra.mxu3 %v4369_v3  ;;  %v1631_v21 = vsel %vm1630_vm14, %v3465_v54, %v1627_v49  ;;  %v1652_v3 = vld [vmem:[#allocation4 + $0x30] sm:$0xff] }
 0x339   : > { %1978 = vmatpush.msra.mxu1 %v4375_v18  ;;  %v1636_v63 = vsel %vm1633_vm15, %v1635_v19, %v1631_v21 }
 0x33a   : > { %2006 = vmatpush.msra.mxu2 %v4381_v29  ;;  %2169 = vmatpush.msra.mxu3 %v4387_v32  ;;  %v1647_v23 = vmul.f32 %v3467_v61, %v1636_v63 }
 0x33c   : > { %1650 = vst.msk [vmem:[#allocation5 + $0x28] sm:$0xff] %vm486_vm3, %v1647_v23  ;;  %3265 = vmatmul.msk.f32.gmra.mxu1 %vm486_vm3, %v1647_v23  ;;  %3267 = vmatmul.msk.f32.gmra.mxu2 %vm486_vm3, %v1647_v23 }
 0x33d   : > { %3269 = vmatmul.msk.f32.gmra.mxu3 %vm486_vm3, %v1647_v23 }
 0x344   : > { %3270 = vmatmul.msk.f32.vlgmr.msrb.gmra.mxu1 %vm486_vm3, %v1646_v52 }
 0x345   : > { %2194 = vmatpush.msrb.mxu1 %v4275_v50  ;;  %v1653_v50 = vld [vmem:[#allocation4 + $0x38] sm:$0xff] }
 0x347   : > { %2195 = vmatpush.msrb.mxu1 %v4281_v59 }
 0x349   : > { %2196 = vmatpush.msrb.mxu1 %v4400_v30 }
 0x34b   : > { %2197 = vmatpush.msrb.mxu1 %v4406_v31 }
 0x34c   : > { %3271 = vmatmul.msk.f32.gmra.mxu1 %vm486_vm3, %v1647_v23 }
 0x3af   : > { %v1677_v32 = vpop.f32.mrf.mxu1 }
 0x3b0   : > { %v1683_v0 = vadd.f32 %v1677_v32, %v1652_v3 }
 0x3b2   : > { %v3272_v4 = vmul.f32 -1.442695, %v1683_v0 }
 0x3b4   : > { %3468 = vpow2.f32 %v3272_v4 }
 0x3b5   : > { %v1705_v62 = vpop.f32.mrf.mxu2 }
 0x3b6   : > { %v1711_v5 = vadd.f32 %v1705_v62, %v1686_v2  ;;  %v1733_v1 = vpop.f32.mrf.mxu3 }
 0x3b7   : > { %v1739_v44 = vadd.f32 %v1733_v1, %v1714_v9 }
 0x3b8   : > { %v3274_v60 = vmul.f32 -1.442695, %v1711_v5 }
 0x3b9   : > { %v1680_v7 = vpop.f32.mrf.mxu1 }
 0x3ba   : > { %v3469_v6 = vpop.eup %3468  ;;  %3470 = vpow2.f32 %v3274_v60  ;;  %v1684_v8 = vadd.f32 %v1680_v7, %v1653_v50  ;;  %v1715_v50 = vld [vmem:[#allocation4 + $0x138] sm:$0xff] }
 0x3bb   : > { %v1775_v59 = vadd.f32 1.0, %v3469_v6 }
 0x3bc   : > { %v3273_v11 = vmul.f32 -1.442695, %v1684_v8 }
 0x3bd   : > { %3472 = vrcp.f32 %v1775_v59  ;;  %v1788_v51 = vand.u32 2147483648, %v1775_v59  ;;  %vm1782_vm1 = vweird.f32 %v1775_v59  ;;  %v1786_v35 = vand.u32 2147483647, %v1775_v59 }
 0x3be   : > { %3474 = vpow2.f32 %v3273_v11 }
 0x3bf   : > { %v1708_v15 = vpop.f32.mrf.mxu2  ;;  %v1789_v63 = vor.u32 1.1754944e-38, %v1788_v51  ;;  %vm1787_vm7 = vcmp.eq.f32.partialorder %v1786_v35, 8.507059e+37 }
 0x3c0   : > { %v3471_v34 = vpop.eup %3470  ;;  %v1712_v41 = vadd.f32 %v1708_v15, %v1687_v12  ;;  %v1736_v4 = vpop.f32.mrf.mxu3 }
 0x3c1   : > { %v1813_v46 = vadd.f32 1.0, %v3471_v34  ;;  %v1761_v17 = vpop.f32.mrf.mxu1  ;;  %v1740_v8 = vadd.f32 %v1736_v4, %v1715_v50  ;;  %v4566_v50 = vld [vmem:[%s4937_s5 + $0x30] sm:$0xff] }
 0x3c2   : > { %v3275_v10 = vmul.f32 -1.442695, %v1712_v41  ;;  %v1767_v25 = vadd.f32 %v1761_v17, %v1742_v28 }
 0x3c3   : > { %v3473_v24 = vpop.eup %3472  ;;  %3476 = vrcp.f32 %v1813_v46  ;;  %v1826_v56 = vand.u32 2147483648, %v1813_v46  ;;  %v1824_v19 = vand.u32 2147483647, %v1813_v46  ;;  %vm1820_vm5 = vweird.f32 %v1813_v46 }
 0x3c4   : > { %v1778_v13 = vmul.f32 %v3473_v24, %v1775_v59  ;;  %v3475_v26 = vpop.eup %3474  ;;  %3478 = vpow2.f32 %v3275_v10  ;;  %v3276_v38 = vmul.f32 -1.442695, %v1767_v25  ;;  %vm1783_vm0 = vweird.f32 %v3473_v24 }
 0x3c5   : > { %v4496_v33 = vadd.f32 1.0, %v3475_v26  ;;  %vm4501_vm4 = vmor %vm1782_vm1, %vm1783_vm0  ;;  %v1827_v0 = vor.u32 1.1754944e-38, %v1826_v56  ;;  %vm1825_vm8 = vcmp.eq.f32.partialorder %v1824_v19, 8.507059e+37 }
 0x3c6   : > { %v1779_v27 = vsub.f32 1.0, %v1778_v13 }
 0x3c7   : > { %3480 = vrcp.f32 %v4496_v33  ;;  %vm1797_vm10 = vweird.f32 %v4496_v33 }
 0x3c8   : > { %v1780_v58 = vmul.f32 %v3473_v24, %v1779_v27  ;;  %3482 = vpow2.f32 %v3276_v38 }
 0x3c9   : > { %v3477_v40 = vpop.eup %3476  ;;  %v1764_v20 = vpop.f32.mrf.mxu1  ;;  %3484 = vtanh.f32 %v1739_v44 }
 0x3ca   : > { %v1816_v43 = vmul.f32 %v3477_v40, %v1813_v46  ;;  %v1781_v55 = vadd.f32 %v3473_v24, %v1780_v58  ;;  %v1768_v53 = vadd.f32 %v1764_v20, %v1743_v45  ;;  %v3479_v54 = vpop.eup %3478  ;;  %vm1821_vm2 = vweird.f32 %v3477_v40 }
 0x3cb   : > { %v4499_v39 = vadd.f32 1.0, %v3479_v54  ;;  %vm1822_vm6 = vmor %vm1820_vm5, %vm1821_vm2 }
 0x3cc   : > { %v1817_v52 = vsub.f32 1.0, %v1816_v43  ;;  %v3277_v42 = vmul.f32 -1.442695, %v1768_v53  ;;  %v1785_v61 = vsel %vm4501_vm4, %v3473_v24, %v1781_v55  ;;  %v1803_v24 = vand.u32 2147483648, %v4496_v33 }
 0x3cd   : > { %v3481_v21 = vpop.eup %3480  ;;  %3486 = vrcp.f32 %v4499_v39  ;;  %v1790_v62 = vsel %vm1787_vm7, %v1789_v63, %v1785_v61  ;;  %v1841_v25 = vand.u32 2147483648, %v4499_v39  ;;  %v1839_v27 = vand.u32 2147483647, %v4499_v39 }
 0x3ce   : > { %v1818_v57 = vmul.f32 %v3477_v40, %v1817_v52  ;;  %v3483_v23 = vpop.eup %3482  ;;  %v1793_v32 = vmul.f32 %v3481_v21, %v4496_v33  ;;  %3488 = vpow2.f32 %v3277_v42  ;;  %vm1798_vm9 = vweird.f32 %v3481_v21 }
 0x3cf   : > { %v4509_v2 = vadd.f32 1.0, %v3483_v23  ;;  %v3485_v7 = vpop.eup %3484  ;;  %vm4522_vm11 = vmor %vm1797_vm10, %vm1798_vm9  ;;  %vm1835_vm13 = vweird.f32 %v4499_v39  ;;  %v1842_v43 = vor.u32 1.1754944e-38, %v1841_v25  ;;  %vm1840_vm0 = vcmp.eq.f32.partialorder %v1839_v27, 8.507059e+37 }
 0x3d0   : > { %v1819_v3 = vadd.f32 %v3477_v40, %v1818_v57  ;;  %v1794_v60 = vsub.f32 1.0, %v1793_v32  ;;  %v1887_v12 = vmul.f32 %v3485_v7, %v1790_v62 }
 0x3d1   : > { %3490 = vrcp.f32 %v4509_v2  ;;  %v1866_v45 = vand.u32 2147483648, %v4509_v2  ;;  %v1864_v53 = vand.u32 2147483647, %v4509_v2  ;;  %vm1860_vm2 = vweird.f32 %v4509_v2 }
 0x3d2   : > { %v1823_v5 = vsel %vm1822_vm6, %v3477_v40, %v1819_v3  ;;  %v1795_v11 = vmul.f32 %v3481_v21, %v1794_v60  ;;  %3492 = vtanh.f32 %v1740_v8 }
 0x3d3   : > { %v1828_v6 = vsel %vm1825_vm8, %v1827_v0, %v1823_v5  ;;  %v3487_v34 = vpop.eup %3486  ;;  %v1867_v49 = vor.u32 1.1754944e-38, %v1866_v45  ;;  %vm1865_vm5 = vcmp.eq.f32.partialorder %v1864_v53, 8.507059e+37  ;;  %v4558_v5 = vld [vmem:[%s4937_s5 + $0x38] sm:$0xff] }
 0x3d4   : > { %v1885_v59 = vmul.f32 %v1828_v6, %v4448_v14  ;;  %v3489_v15 = vpop.eup %3488  ;;  %v1831_v46 = vmul.f32 %v3487_v34, %v4499_v39  ;;  %v1796_v41 = vadd.f32 %v3481_v21, %v1795_v11  ;;  %v1801_v14 = vand.u32 2147483647, %v4496_v33  ;;  %v1900_v11 = vld [vmem:[#allocation4 + $0x48] sm:$0xff] }
 0x3d5   : > { %v4517_v13 = vadd.f32 1.0, %v3489_v15  ;;  %vm1836_vm12 = vweird.f32 %v3487_v34  ;;  %v1804_v33 = vor.u32 1.1754944e-38, %v1803_v24 }
 0x3d6   : > { %v4514_v17 = vadd.f32 %v1887_v12, %v1885_v59  ;;  %v1832_v10 = vsub.f32 1.0, %v1831_v46  ;;  %v1800_v38 = vsel %vm4522_vm11, %v3481_v21, %v1796_v41  ;;  %vm1802_vm14 = vcmp.eq.f32.partialorder %v1801_v14, 8.507059e+37  ;;  %vm1837_vm15 = vmor %vm1835_vm13, %vm1836_vm12  ;;  %v1934_v12 = vld [vmem:[#allocation4 + $0xc8] sm:$0xff]  ;;  %v1989_v14 = vld [vmem:[#allocation4 + $0x1c0] sm:$0xff] }
 0x3d7   : > { %v3491_v28 = vpop.eup %3490  ;;  %3494 = vrcp.f32 %v4517_v13  ;;  %v1805_v44 = vsel %vm1802_vm14, %v1804_v33, %v1800_v38  ;;  %v1881_v63 = vand.u32 2147483648, %v4517_v13  ;;  %v1879_v3 = vand.u32 2147483647, %v4517_v13 }
 0x3d8   : > { %v1833_v1 = vmul.f32 %v3487_v34, %v1832_v10  ;;  %v1856_v58 = vmul.f32 %v3491_v28, %v4509_v2  ;;  %3496 = vtanh.f32 %v4514_v17  ;;  %v3493_v20 = vpop.eup %3492  ;;  %vm1861_vm1 = vweird.f32 %v3491_v28  ;;  %v4551_v2 = vld [vmem:[%s4937_s5 + $0x58] sm:$0xff] }
 0x3d9   : > { %v1888_v35 = vmul.f32 %v3493_v20, %v1805_v44  ;;  %vm1862_vm4 = vmor %vm1860_vm2, %vm1861_vm1  ;;  %vm1875_vm7 = vweird.f32 %v4517_v13  ;;  %v1882_v4 = vor.u32 1.1754944e-38, %v1881_v63  ;;  %vm1880_vm9 = vcmp.eq.f32.partialorder %v1879_v3, 8.507059e+37 }
 0x3da   : > { %v1834_v40 = vadd.f32 %v3487_v34, %v1833_v1  ;;  %v1857_v9 = vsub.f32 1.0, %v1856_v58  ;;  %v1961_v1 = vld [vmem:[#allocation4 + $0x140] sm:$0xff] }
 0x3dc   : > { %v1838_v55 = vsel %vm1837_vm15, %v3487_v34, %v1834_v40  ;;  %v1858_v51 = vmul.f32 %v3491_v28, %v1857_v9 }
 0x3dd   : > { %v3495_v54 = vpop.eup %3494  ;;  %v1843_v52 = vsel %vm1840_vm0, %v1842_v43, %v1838_v55 }
 0x3de   : > { %v1886_v56 = vmul.f32 %v1843_v52, %v4467_v36  ;;  %v1859_v39 = vadd.f32 %v3491_v28, %v1858_v51  ;;  %v1871_v42 = vmul.f32 %v3495_v54, %v4517_v13  ;;  %v3497_v57 = vpop.eup %3496  ;;  %vm1876_vm6 = vweird.f32 %v3495_v54 }
 0x3df   : > { %vm1877_vm8 = vmor %vm1875_vm7, %vm1876_vm6 }
 0x3e0   : > { %v4538_v19 = vadd.f32 %v1888_v35, %v1886_v56  ;;  %v1863_v21 = vsel %vm1862_vm4, %v3491_v28, %v1859_v39  ;;  %v1872_v61 = vsub.f32 1.0, %v1871_v42 }
 0x3e1   : > { %v1868_v23 = vsel %vm1865_vm5, %v1867_v49, %v1863_v21 }
 0x3e2   : > { %3498 = vtanh.f32 %v4538_v19  ;;  %v1873_v36 = vmul.f32 %v3495_v54, %v1872_v61  ;;  %v1893_v32 = vmul.f32 %v3497_v57, %v1868_v23  ;;  %v1990_v57 = vld [vmem:[#allocation4 + $0x1c8] sm:$0xff] }
 0x3e4   : > { %1896 = vst.msk [vmem:[#allocation5 + $0x30] sm:$0xff] %vm486_vm3, %v1893_v32  ;;  %3278 = vmatmul.msk.f32.vlgmr.msrb.gmra.mxu2 %vm486_vm3, %v1893_v32  ;;  %3280 = vmatmul.msk.f32.vlgmr.msrb.gmra.mxu3 %vm486_vm3, %v1893_v32  ;;  %v1874_v0 = vadd.f32 %v3495_v54, %v1873_v36 }
 0x3e5   : > { %3282 = vmatmul.msk.f32.vlgmr.msra.gmra.mxu1 %vm486_vm3, %v1893_v32  ;;  %2222 = vmatpush.msrb.mxu2 %v4551_v2 }
 0x3e6   : > { %v1878_v62 = vsel %vm1877_vm8, %v3495_v54, %v1874_v0  ;;  %2250 = vmatpush.msrb.mxu3 %v4336_v37  ;;  %2441 = vmatpush.msra.mxu1 %v4558_v5 }
 0x3e7   : > { %v1883_v60 = vsel %vm1880_vm9, %v1882_v4, %v1878_v62  ;;  %2223 = vmatpush.msrb.mxu2 %v4344_v16 }
 0x3e8   : > { %v3499_v6 = vpop.eup %3498  ;;  %2251 = vmatpush.msrb.mxu3 %v4350_v22  ;;  %2442 = vmatpush.msra.mxu1 %v4566_v50  ;;  %v1899_v22 = vld [vmem:[#allocation4 + $0x40] sm:$0xff] }
 0x3e9   : > { %v1894_v37 = vmul.f32 %v3499_v6, %v1883_v60  ;;  %2224 = vmatpush.msrb.mxu2 %v4357_v47 }
 0x3ea   : > { %2252 = vmatpush.msrb.mxu3 %v4363_v48  ;;  %2443 = vmatpush.msra.mxu1 %v4400_v30  ;;  %v1933_v30 = vld [vmem:[#allocation4 + $0xc0] sm:$0xff] }
 0x3eb   : > { %1897 = vst.msk [vmem:[#allocation5 + $0x38] sm:$0xff] %vm486_vm3, %v1894_v37  ;;  %2225 = vmatpush.msrb.mxu2 %v4375_v18 }
 0x3ec   : > { %3279 = vmatmul.msk.f32.gmra.mxu2 %vm486_vm3, %v1894_v37  ;;  %3281 = vmatmul.msk.f32.gmra.mxu3 %vm486_vm3, %v1894_v37 }
 0x3ed   : > { %3283 = vmatmul.msk.f32.gmra.mxu1 %vm486_vm3, %v1894_v37  ;;  %2253 = vmatpush.msrb.mxu3 %v4381_v29 }
 0x3ee   : > { %2444 = vmatpush.msra.mxu1 %v4406_v31 }
 0x3f4   : > { %3284 = vmatmul.msk.f32.vlgmr.msra.gmra.mxu2 %vm486_vm3, %v1893_v32 }
 0x3f5   : > { %2469 = vmatpush.msra.mxu2 %v4551_v2 }
 0x3f7   : > { %2470 = vmatpush.msra.mxu2 %v4344_v16 }
 0x3f9   : > { %2471 = vmatpush.msra.mxu2 %v4357_v47 }
 0x3fb   : > { %2472 = vmatpush.msra.mxu2 %v4375_v18 }
 0x3fc   : > { %3285 = vmatmul.msk.f32.gmra.mxu2 %vm486_vm3, %v1894_v37 }
 0x462   : > { %v1980_v25 = vpop.f32.mrf.mxu1 }
 0x463   : > { %v1986_v33 = vadd.f32 %v1980_v25, %v1961_v1 }
 0x467   : > { %v1924_v48 = vpop.f32.mrf.mxu2  ;;  %v1952_v7 = vpop.f32.mrf.mxu3 }
 0x468   : > { %v1930_v59 = vadd.f32 %v1924_v48, %v1899_v22  ;;  %v1958_v29 = vadd.f32 %v1952_v7, %v1933_v30 }
 0x46a   : > { %v3286_v8 = vmul.f32 -1.442695, %v1930_v59  ;;  %v3288_v31 = vmul.f32 -1.442695, %v1958_v29  ;;  %v1983_v22 = vpop.f32.mrf.mxu1 }
 0x46c   : > { %3500 = vpow2.f32 %v3286_v8  ;;  %v1962_v8 = vld [vmem:[#allocation4 + $0x148] sm:$0xff] }
 0x46d   : > { %3502 = vpow2.f32 %v3288_v31 }
 0x46f   : > { %v1927_v34 = vpop.f32.mrf.mxu2  ;;  %v1955_v16 = vpop.f32.mrf.mxu3 }
 0x470   : > { %v1931_v15 = vadd.f32 %v1927_v34, %v1900_v11  ;;  %v1959_v47 = vadd.f32 %v1955_v16, %v1934_v12  ;;  %v1987_v11 = vadd.f32 %v1983_v22, %v1962_v8  ;;  %v2146_v8 = vld [vmem:[#allocation4 + $0x50] sm:$0xff] }
 0x472   : > { %v3501_v46 = vpop.eup %3500  ;;  %v3287_v18 = vmul.f32 -1.442695, %v1931_v15  ;;  %v3289_v13 = vmul.f32 -1.442695, %v1959_v47 }
 0x473   : > { %v3503_v41 = vpop.eup %3502  ;;  %v2022_v24 = vadd.f32 1.0, %v3501_v46 }
 0x474   : > { %v2060_v10 = vadd.f32 1.0, %v3503_v41  ;;  %3504 = vpow2.f32 %v3287_v18 }
 0x475   : > { %3506 = vrcp.f32 %v2022_v24  ;;  %v2033_v51 = vand.u32 2147483647, %v2022_v24  ;;  %v2035_v53 = vand.u32 2147483648, %v2022_v24  ;;  %vm2029_vm12 = vweird.f32 %v2022_v24 }
 0x476   : > { %3508 = vrcp.f32 %v2060_v10  ;;  %v2073_v35 = vand.u32 2147483648, %v2060_v10  ;;  %v2071_v42 = vand.u32 2147483647, %v2060_v10  ;;  %vm2067_vm13 = vweird.f32 %v2060_v10 }
 0x477   : > { %3510 = vpow2.f32 %v3289_v13  ;;  %v2008_v28 = vpop.f32.mrf.mxu2  ;;  %vm2034_vm15 = vcmp.eq.f32.partialorder %v2033_v51, 8.507059e+37  ;;  %v2036_v23 = vor.u32 1.1754944e-38, %v2035_v53  ;;  %v2147_v13 = vld [vmem:[#allocation4 + $0x58] sm:$0xff] }
 0x478   : > { %v2014_v26 = vadd.f32 %v2008_v28, %v1989_v14  ;;  %v2074_v0 = vor.u32 1.1754944e-38, %v2073_v35  ;;  %vm2072_vm1 = vcmp.eq.f32.partialorder %v2071_v42, 8.507059e+37 }
 0x47a   : > { %v3505_v27 = vpop.eup %3504  ;;  %v3290_v38 = vmul.f32 -1.442695, %v2014_v26 }
 0x47b   : > { %v3507_v58 = vpop.eup %3506  ;;  %v4585_v40 = vadd.f32 1.0, %v3505_v27 }
 0x47c   : > { %v3509_v9 = vpop.eup %3508  ;;  %v2025_v43 = vmul.f32 %v3507_v58, %v2022_v24  ;;  %3512 = vpow2.f32 %v3290_v38  ;;  %vm2030_vm10 = vweird.f32 %v3507_v58 }
 0x47d   : > { %v3511_v44 = vpop.eup %3510  ;;  %v2063_v45 = vmul.f32 %v3509_v9, %v2060_v10  ;;  %3514 = vrcp.f32 %v4585_v40  ;;  %vm2068_vm11 = vweird.f32 %v3509_v9  ;;  %vm2031_vm14 = vmor %vm2029_vm12, %vm2030_vm10  ;;  %v2048_v12 = vand.u32 2147483647, %v4585_v40 }
 0x47e   : > { %v2026_v20 = vsub.f32 1.0, %v2025_v43  ;;  %v4588_v55 = vadd.f32 1.0, %v3511_v44  ;;  %3516 = vtanh.f32 %v1986_v33  ;;  %vm2069_vm0 = vmor %vm2067_vm13, %vm2068_vm11  ;;  %v2050_v16 = vand.u32 2147483648, %v4585_v40 }
 0x47f   : > { %v2064_v54 = vsub.f32 1.0, %v2063_v45  ;;  %v2011_v52 = vpop.f32.mrf.mxu2  ;;  %vm2044_vm4 = vweird.f32 %v4585_v40  ;;  %vm4609_vm7 = vcmp.eq.f32.partialorder %v2048_v12, 8.507059e+37 }
 0x480   : > { %v2027_v56 = vmul.f32 %v3507_v58, %v2026_v20  ;;  %3518 = vrcp.f32 %v4588_v55  ;;  %v2015_v61 = vadd.f32 %v2011_v52, %v1990_v57  ;;  %v2086_v46 = vand.u32 2147483647, %v4588_v55 }
 0x481   : > { %v2065_v39 = vmul.f32 %v3509_v9, %v2064_v54  ;;  %v2088_v18 = vand.u32 2147483648, %v4588_v55  ;;  %v2051_v25 = vor.u32 1.1754944e-38, %v2050_v16  ;;  %vm2082_vm8 = vweird.f32 %v4588_v55 }
 0x482   : > { %v3513_v49 = vpop.eup %3512  ;;  %v2028_v21 = vadd.f32 %v3507_v58, %v2027_v56  ;;  %v3291_v62 = vmul.f32 -1.442695, %v2015_v61  ;;  %vm2087_vm10 = vcmp.eq.f32.partialorder %v2086_v46, 8.507059e+37 }
 0x483   : > { %v3515_v63 = vpop.eup %3514  ;;  %v2066_v3 = vadd.f32 %v3509_v9, %v2065_v39  ;;  %v4591_v36 = vadd.f32 1.0, %v3513_v49  ;;  %v2089_v1 = vor.u32 1.1754944e-38, %v2088_v18 }
 0x484   : > { %v2032_v32 = vsel %vm2031_vm14, %v3507_v58, %v2028_v21  ;;  %v2040_v4 = vmul.f32 %v3515_v63, %v4585_v40  ;;  %v3517_v60 = vpop.eup %3516  ;;  %vm2045_vm2 = vweird.f32 %v3515_v63 }
 0x485   : > { %v2037_v6 = vsel %vm2034_vm15, %v2036_v23, %v2032_v32  ;;  %v2070_v37 = vsel %vm2069_vm0, %v3509_v9, %v2066_v3  ;;  %3520 = vrcp.f32 %v4591_v36  ;;  %vm4605_vm6 = vmor %vm2044_vm4, %vm2045_vm2  ;;  %v2111_v58 = vand.u32 2147483647, %v4591_v36  ;;  %v3651_v32 = vld [vmem:[%s4937_s5 + $0x28] sm:$0xff] }
 0x486   : > { %v3519_v48 = vpop.eup %3518  ;;  %v2075_v30 = vsel %vm2072_vm1, %v2074_v0, %v2070_v37  ;;  %v2041_v7 = vsub.f32 1.0, %v2040_v4  ;;  %v2134_v59 = vmul.f32 %v3517_v60, %v2037_v6  ;;  %3522 = vpow2.f32 %v3291_v62  ;;  %v3653_v4 = vld [vmem:[%s4937_s5 + $0x60] sm:$0xff] }
 0x487   : > { %v2132_v29 = vmul.f32 %v2075_v30, %v4514_v17  ;;  %v2078_v31 = vmul.f32 %v3519_v48, %v4588_v55  ;;  %vm2083_vm5 = vweird.f32 %v3519_v48  ;;  %3524 = vtanh.f32 %v1987_v11  ;;  %v3654_v60 = vld [vmem:[%s4937_s5 + $0x20] sm:$0xff]  ;;  %v2180_v30 = vld [vmem:[#allocation4 + $0xd0] sm:$0xff] }
 0x488   : > { %v2042_v34 = vmul.f32 %v3515_v63, %v2041_v7  ;;  %vm2084_vm9 = vmor %vm2082_vm8, %vm2083_vm5  ;;  %v2113_v40 = vand.u32 2147483648, %v4591_v36  ;;  %vm2107_vm12 = vweird.f32 %v4591_v36  ;;  %vm2112_vm14 = vcmp.eq.f32.partialorder %v2111_v58, 8.507059e+37  ;;  %v3655_v6 = vld [vmem:[%s4937_s5 + $0x40] sm:$0xff] }
 0x489   : > { %v2079_v15 = vsub.f32 1.0, %v2078_v31  ;;  %v4602_v24 = vadd.f32 %v2134_v59, %v2132_v29 }
 0x48a   : > { %v2043_v47 = vadd.f32 %v3515_v63, %v2042_v34  ;;  %v2114_v54 = vor.u32 1.1754944e-38, %v2113_v40 }
 0x48b   : > { %v3521_v41 = vpop.eup %3520  ;;  %v2080_v17 = vmul.f32 %v3519_v48, %v2079_v15  ;;  %3526 = vtanh.f32 %v4602_v24  ;;  %v2181_v15 = vld [vmem:[#allocation4 + $0xd8] sm:$0xff] }
 0x48c   : > { %v2103_v14 = vmul.f32 %v3521_v41, %v4591_v36  ;;  %v2047_v28 = vsel %vm4605_vm6, %v3515_v63, %v2043_v47  ;;  %v3523_v27 = vpop.eup %3522  ;;  %vm2108_vm11 = vweird.f32 %v3521_v41  ;;  %v3648_v63 = vld [vmem:[%s4937_s5 + $0x70] sm:$0xff] }
 0x48d   : > { %v2081_v26 = vadd.f32 %v3519_v48, %v2080_v17  ;;  %v2101_v9 = vadd.f32 1.0, %v3523_v27  ;;  %v2052_v43 = vsel %vm4609_vm7, %v2051_v25, %v2047_v28  ;;  %v3525_v20 = vpop.eup %3524  ;;  %vm2109_vm13 = vmor %vm2107_vm12, %vm2108_vm11  ;;  %v3649_v36 = vld [vmem:[%s4937_s5 + $0x50] sm:$0xff] }
 0x48e   : > { %v2104_v38 = vsub.f32 1.0, %v2103_v14  ;;  %v2135_v51 = vmul.f32 %v3525_v20, %v2052_v43 }
 0x48f   : > { %v2085_v33 = vsel %vm2084_vm9, %v3519_v48, %v2081_v26  ;;  %3528 = vrcp.f32 %v2101_v9  ;;  %v2128_v61 = vand.u32 2147483648, %v2101_v9  ;;  %v2126_v3 = vand.u32 2147483647, %v2101_v9 }
 0x490   : > { %v2090_v44 = vsel %vm2087_vm10, %v2089_v1, %v2085_v33  ;;  %v2105_v45 = vmul.f32 %v3521_v41, %v2104_v38  ;;  %vm2122_vm0 = vweird.f32 %v2101_v9  ;;  %v2236_v33 = vld [vmem:[#allocation4 + $0x1d0] sm:$0xff] }
 0x491   : > { %v2133_v53 = vmul.f32 %v2090_v44, %v4538_v19  ;;  %v3527_v56 = vpop.eup %3526  ;;  %v3647_v19 = vld [vmem:[%s4937_s5 + $0x78] sm:$0xff]  ;;  %v2129_v0 = vor.u32 1.1754944e-38, %v2128_v61  ;;  %vm2127_vm2 = vcmp.eq.f32.partialorder %v2126_v3, 8.507059e+37 }
 0x492   : > { %v2106_v55 = vadd.f32 %v3521_v41, %v2105_v45  ;;  %v2237_v61 = vld [vmem:[#allocation4 + $0x1d8] sm:$0xff] }
 0x493   : > { %v4624_v57 = vadd.f32 %v2135_v51, %v2133_v53  ;;  %v2208_v53 = vld [vmem:[#allocation4 + $0x150] sm:$0xff] }
 0x494   : > { %v2110_v52 = vsel %vm2109_vm13, %v3521_v41, %v2106_v55 }
 0x495   : > { %v2115_v35 = vsel %vm2112_vm14, %v2114_v54, %v2110_v52  ;;  %v3529_v42 = vpop.eup %3528  ;;  %3530 = vtanh.f32 %v4624_v57 }
 0x496   : > { %v2140_v39 = vmul.f32 %v3527_v56, %v2115_v35  ;;  %v2118_v49 = vmul.f32 %v3529_v42, %v2101_v9  ;;  %vm2123_vm15 = vweird.f32 %v3529_v42 }
 0x497   : > { %vm2124_vm1 = vmor %vm2122_vm0, %vm2123_vm15 }
 0x498   : > { %2143 = vst.msk [vmem:[#allocation5 + $0x40] sm:$0xff] %vm486_vm3, %v2140_v39  ;;  %3292 = vmatmul.msk.f32.vlgmr.msra.gmra.mxu3 %vm486_vm3, %v2140_v39  ;;  %3294 = vmatmul.msk.f32.vlgmr.msrb.gmra.mxu1 %vm486_vm3, %v2140_v39  ;;  %v2119_v21 = vsub.f32 1.0, %v2118_v49 }
 0x499   : > { %3296 = vmatmul.msk.f32.vlgmr.msrb.gmra.mxu2 %vm486_vm3, %v2140_v39  ;;  %2497 = vmatpush.msra.mxu3 %v3647_v19 }
 0x49a   : > { %2688 = vmatpush.msrb.mxu1 %v4558_v5  ;;  %2716 = vmatpush.msrb.mxu2 %v4551_v2  ;;  %v2120_v23 = vmul.f32 %v3529_v42, %v2119_v21  ;;  %v3650_v2 = vld [vmem:[%s4937_s5 + $0x68] sm:$0xff] }
 0x49b   : > { %2498 = vmatpush.msra.mxu3 %v3648_v63  ;;  %v3531_v37 = vpop.eup %3530 }
 0x49c   : > { %2689 = vmatpush.msrb.mxu1 %v4566_v50  ;;  %2717 = vmatpush.msrb.mxu2 %v3649_v36  ;;  %v2121_v5 = vadd.f32 %v3529_v42, %v2120_v23  ;;  %v3652_v50 = vld [vmem:[%s4937_s5 + $0x48] sm:$0xff] }
 0x49d   : > { %2499 = vmatpush.msra.mxu3 %v3650_v2 }
 0x49e   : > { %2690 = vmatpush.msrb.mxu1 %v3651_v32  ;;  %2718 = vmatpush.msrb.mxu2 %v3652_v50  ;;  %v2125_v62 = vsel %vm2124_vm1, %v3529_v42, %v2121_v5 }
 0x49f   : > { %2500 = vmatpush.msra.mxu3 %v3653_v4  ;;  %v2130_v22 = vsel %vm2127_vm2, %v2129_v0, %v2125_v62 }
 0x4a0   : > { %2691 = vmatpush.msrb.mxu1 %v3654_v60  ;;  %2719 = vmatpush.msrb.mxu2 %v3655_v6  ;;  %v2141_v48 = vmul.f32 %v3531_v37, %v2130_v22 }
 0x4a2   : > { %2144 = vst.msk [vmem:[#allocation5 + $0x48] sm:$0xff] %vm486_vm3, %v2141_v48  ;;  %3293 = vmatmul.msk.f32.gmra.mxu3 %vm486_vm3, %v2141_v48  ;;  %3295 = vmatmul.msk.f32.gmra.mxu1 %vm486_vm3, %v2141_v48 }
 0x4a3   : > { %3297 = vmatmul.msk.f32.gmra.mxu2 %vm486_vm3, %v2141_v48 }
 0x4aa   : > { %3298 = vmatmul.msk.f32.vlgmr.msrb.gmra.mxu3 %vm486_vm3, %v2140_v39 }
 0x4ab   : > { %2744 = vmatpush.msrb.mxu3 %v3647_v19 }
 0x4ad   : > { %2745 = vmatpush.msrb.mxu3 %v3648_v63 }
 0x4af   : > { %2746 = vmatpush.msrb.mxu3 %v3650_v2 }
 0x4b1   : > { %2747 = vmatpush.msrb.mxu3 %v3653_v4 }
 0x4b2   : > { %3299 = vmatmul.msk.f32.gmra.mxu3 %vm486_vm3, %v2141_v48 }
 0x515   : > { %v2199_v7 = vpop.f32.mrf.mxu1 }
 0x516   : > { %v2205_v59 = vadd.f32 %v2199_v7, %v2180_v30 }
 0x518   : > { %v3302_v29 = vmul.f32 -1.442695, %v2205_v59 }
 0x51a   : > { %3532 = vpow2.f32 %v3302_v29 }
 0x51b   : > { %v2171_v31 = vpop.f32.mrf.mxu3 }
 0x51c   : > { %v2177_v11 = vadd.f32 %v2171_v31, %v2146_v8  ;;  %v2227_v44 = vpop.f32.mrf.mxu2 }
 0x51d   : > { %v2233_v52 = vadd.f32 %v2227_v44, %v2208_v53 }
 0x51e   : > { %v3300_v34 = vmul.f32 -1.442695, %v2177_v11  ;;  %v2209_v11 = vld [vmem:[#allocation4 + $0x158] sm:$0xff] }
 0x51f   : > { %v2202_v47 = vpop.f32.mrf.mxu1 }
 0x520   : > { %v3533_v12 = vpop.eup %3532  ;;  %3534 = vpow2.f32 %v3300_v34  ;;  %v2206_v46 = vadd.f32 %v2202_v47, %v2181_v15 }
 0x521   : > { %v4667_v16 = vadd.f32 1.0, %v3533_v12 }
 0x522   : > { %v3303_v18 = vmul.f32 -1.442695, %v2206_v46 }
 0x523   : > { %3536 = vrcp.f32 %v4667_v16  ;;  %v2320_v23 = vand.u32 2147483648, %v4667_v16  ;;  %vm2314_vm8 = vweird.f32 %v4667_v16  ;;  %v2318_v5 = vand.u32 2147483647, %v4667_v16 }
 0x524   : > { %3538 = vpow2.f32 %v3303_v18 }
 0x525   : > { %v2174_v10 = vpop.f32.mrf.mxu3  ;;  %v2321_v22 = vor.u32 1.1754944e-38, %v2320_v23  ;;  %vm2319_vm11 = vcmp.eq.f32.partialorder %v2318_v5, 8.507059e+37 }
 0x526   : > { %v3535_v41 = vpop.eup %3534  ;;  %v2178_v14 = vadd.f32 %v2174_v10, %v2147_v13  ;;  %v2230_v7 = vpop.f32.mrf.mxu2 }
 0x527   : > { %v2269_v17 = vadd.f32 1.0, %v3535_v41  ;;  %v2234_v12 = vadd.f32 %v2230_v7, %v2209_v11 }
 0x528   : > { %v3301_v25 = vmul.f32 -1.442695, %v2178_v14 }
 0x529   : > { %v3537_v28 = vpop.eup %3536  ;;  %3540 = vrcp.f32 %v2269_v17  ;;  %v2282_v42 = vand.u32 2147483648, %v2269_v17  ;;  %vm2276_vm6 = vweird.f32 %v2269_v17  ;;  %v2280_v19 = vand.u32 2147483647, %v2269_v17 }
 0x52a   : > { %v2310_v26 = vmul.f32 %v3537_v28, %v4667_v16  ;;  %v3539_v27 = vpop.eup %3538  ;;  %3542 = vpow2.f32 %v3301_v25  ;;  %vm2315_vm5 = vweird.f32 %v3537_v28 }
 0x52b   : > { %v4671_v1 = vadd.f32 1.0, %v3539_v27  ;;  %vm4690_vm9 = vmor %vm2314_vm8, %vm2315_vm5  ;;  %v2283_v0 = vor.u32 1.1754944e-38, %v2282_v42  ;;  %vm2281_vm10 = vcmp.eq.f32.partialorder %v2280_v19, 8.507059e+37 }
 0x52c   : > { %v2311_v58 = vsub.f32 1.0, %v2310_v26 }
 0x52d   : > { %3544 = vrcp.f32 %v4671_v1  ;;  %v2255_v40 = vpop.f32.mrf.mxu3  ;;  %v2335_v47 = vand.u32 2147483648, %v4671_v1  ;;  %vm2329_vm0 = vweird.f32 %v4671_v1 }
 0x52e   : > { %v2261_v43 = vadd.f32 %v2255_v40, %v2236_v33  ;;  %v2312_v51 = vmul.f32 %v3537_v28, %v2311_v58 }
 0x52f   : > { %v3541_v38 = vpop.eup %3540 }
 0x530   : > { %v2272_v9 = vmul.f32 %v3541_v38, %v2269_v17  ;;  %v3543_v45 = vpop.eup %3542  ;;  %v3304_v55 = vmul.f32 -1.442695, %v2261_v43  ;;  %vm2277_vm4 = vweird.f32 %v3541_v38  ;;  %v2313_v21 = vadd.f32 %v3537_v28, %v2312_v51 }
 0x531   : > { %v4674_v54 = vadd.f32 1.0, %v3543_v45  ;;  %vm4682_vm7 = vmor %vm2276_vm6, %vm2277_vm4 }
 0x532   : > { %v2273_v20 = vsub.f32 1.0, %v2272_v9  ;;  %3546 = vpow2.f32 %v3304_v55  ;;  %v2317_v60 = vsel %vm4690_vm9, %v3537_v28, %v2313_v21 }
 0x533   : > { %v4676_v35 = vpop.eup %3544  ;;  %3548 = vrcp.f32 %v4674_v54  ;;  %v2322_v29 = vsel %vm2319_vm11, %v2321_v22, %v2317_v60  ;;  %vm2291_vm13 = vweird.f32 %v4674_v54  ;;  %v2297_v46 = vand.u32 2147483648, %v4674_v54 }
 0x534   : > { %v2274_v56 = vmul.f32 %v3541_v38, %v2273_v20  ;;  %v2325_v49 = vmul.f32 %v4676_v35, %v4671_v1  ;;  %3550 = vtanh.f32 %v2233_v52  ;;  %v2379_v15 = vmul.f32 %v2322_v29, %v4602_v24 }
 0x535   : > { %v2258_v63 = vpop.f32.mrf.mxu3  ;;  %vm2330_vm14 = vweird.f32 %v4676_v35  ;;  %v2295_v41 = vand.u32 2147483647, %v4674_v54  ;;  %v2333_v24 = vand.u32 2147483647, %v4671_v1  ;;  %v2298_v58 = vor.u32 1.1754944e-38, %v2297_v46 }
 0x536   : > { %v2275_v39 = vadd.f32 %v3541_v38, %v2274_v56  ;;  %v2262_v36 = vadd.f32 %v2258_v63, %v2237_v61  ;;  %v2326_v4 = vsub.f32 1.0, %v2325_v49  ;;  %vm4715_vm1 = vmor %vm2329_vm0, %vm2330_vm14 }
 0x537   : > { %vm2296_vm2 = vcmp.eq.f32.partialorder %v2295_v41, 8.507059e+37  ;;  %vm2334_vm4 = vcmp.eq.f32.partialorder %v2333_v24, 8.507059e+37  ;;  %v2455_v24 = vld [vmem:[#allocation4 + $0x160] sm:$0xff] }
 0x538   : > { %v2279_v2 = vsel %vm4682_vm7, %v3541_v38, %v2275_v39  ;;  %v3547_v32 = vpop.eup %3546  ;;  %v3305_v37 = vmul.f32 -1.442695, %v2262_v36  ;;  %v2327_v8 = vmul.f32 %v4676_v35, %v2326_v4  ;;  %v2336_v38 = vor.u32 1.1754944e-38, %v2335_v47 }
 0x539   : > { %v3549_v62 = vpop.eup %3548  ;;  %v2347_v6 = vadd.f32 1.0, %v3547_v32  ;;  %v2284_v48 = vsel %vm2281_vm10, %v2283_v0, %v2279_v2  ;;  %v2393_v0 = vld [vmem:[#allocation4 + $0x60] sm:$0xff] }
 0x53a   : > { %v2287_v30 = vmul.f32 %v3549_v62, %v4674_v54  ;;  %v3551_v59 = vpop.eup %3550  ;;  %vm2292_vm12 = vweird.f32 %v3549_v62  ;;  %v2328_v17 = vadd.f32 %v4676_v35, %v2327_v8 }
 0x53b   : > { %3552 = vrcp.f32 %v2347_v6  ;;  %v2381_v34 = vmul.f32 %v3551_v59, %v2284_v48  ;;  %vm4707_vm15 = vmor %vm2291_vm13, %vm2292_vm12  ;;  %v2360_v43 = vand.u32 2147483648, %v2347_v6  ;;  %v2358_v45 = vand.u32 2147483647, %v2347_v6 }
 0x53c   : > { %v2288_v31 = vsub.f32 1.0, %v2287_v30  ;;  %3554 = vpow2.f32 %v3305_v37  ;;  %v2332_v33 = vsel %vm4715_vm1, %v4676_v35, %v2328_v17  ;;  %vm2354_vm6 = vweird.f32 %v2347_v6  ;;  %v2483_v30 = vld [vmem:[#allocation4 + $0x1e0] sm:$0xff] }
 0x53d   : > { %v4705_v10 = vadd.f32 %v2381_v34, %v2379_v15  ;;  %3556 = vtanh.f32 %v2234_v12  ;;  %v2337_v55 = vsel %vm2334_vm4, %v2336_v38, %v2332_v33  ;;  %v2361_v54 = vor.u32 1.1754944e-38, %v2360_v43  ;;  %v2428_v34 = vld [vmem:[#allocation4 + $0xe8] sm:$0xff] }
 0x53e   : > { %v2289_v16 = vmul.f32 %v3549_v62, %v2288_v31  ;;  %v2380_v52 = vmul.f32 %v2337_v55, %v4624_v57  ;;  %vm2359_vm8 = vcmp.eq.f32.partialorder %v2358_v45, 8.507059e+37  ;;  %v2394_v31 = vld [vmem:[#allocation4 + $0x68] sm:$0xff] }
 0x53f   : > { %3558 = vtanh.f32 %v4705_v10 }
 0x540   : > { %v2290_v18 = vadd.f32 %v3549_v62, %v2289_v16 }
 0x541   : > { %v3553_v13 = vpop.eup %3552 }
 0x542   : > { %v2294_v28 = vsel %vm4707_vm15, %v3549_v62, %v2290_v18  ;;  %v2350_v25 = vmul.f32 %v3553_v13, %v2347_v6  ;;  %v3555_v26 = vpop.eup %3554  ;;  %vm2355_vm5 = vweird.f32 %v3553_v13  ;;  %v2427_v62 = vld [vmem:[#allocation4 + $0xe0] sm:$0xff] }
 0x543   : > { %v2348_v9 = vadd.f32 1.0, %v3555_v26  ;;  %v2299_v1 = vsel %vm2296_vm2, %v2298_v58, %v2294_v28  ;;  %v3557_v20 = vpop.eup %3556  ;;  %vm2356_vm7 = vmor %vm2354_vm6, %vm2355_vm5  ;;  %v2484_v28 = vld [vmem:[#allocation4 + $0x1e8] sm:$0xff] }
 0x544   : > { %v2351_v40 = vsub.f32 1.0, %v2350_v25  ;;  %v2382_v51 = vmul.f32 %v3557_v20, %v2299_v1 }
 0x545   : > { %3560 = vrcp.f32 %v2348_v9  ;;  %v3559_v35 = vpop.eup %3558  ;;  %v2375_v57 = vand.u32 2147483648, %v2348_v9  ;;  %v2373_v23 = vand.u32 2147483647, %v2348_v9  ;;  %vm2369_vm10 = vweird.f32 %v2348_v9 }
 0x546   : > { %v2352_v44 = vmul.f32 %v3553_v13, %v2351_v40  ;;  %v4724_v49 = vadd.f32 %v2382_v51, %v2380_v52 }
 0x547   : > { %v2376_v36 = vor.u32 1.1754944e-38, %v2375_v57  ;;  %vm2374_vm12 = vcmp.eq.f32.partialorder %v2373_v23, 8.507059e+37 }
 0x548   : > { %v2353_v53 = vadd.f32 %v3553_v13, %v2352_v44  ;;  %3562 = vtanh.f32 %v4724_v49 }
 0x54a   : > { %v2357_v56 = vsel %vm2356_vm7, %v3553_v13, %v2353_v53 }
 0x54b   : > { %v2362_v39 = vsel %vm2359_vm8, %v2361_v54, %v2357_v56  ;;  %v3561_v42 = vpop.eup %3560 }
 0x54c   : > { %v2387_v19 = vmul.f32 %v3559_v35, %v2362_v39  ;;  %v2365_v21 = vmul.f32 %v3561_v42, %v2348_v9  ;;  %vm2370_vm9 = vweird.f32 %v3561_v42 }
 0x54d   : > { %vm2371_vm11 = vmor %vm2369_vm10, %vm2370_vm9 }
 0x54e   : > { %2390 = vst.msk [vmem:[#allocation5 + $0x50] sm:$0xff] %vm486_vm3, %v2387_v19  ;;  %3306 = vmatmul.msk.f32.vlgmr.msra.gmra.mxu0 %vm486_vm3, %v2387_v19  ;;  %3308 = vmatmul.msk.f32.vlgmr.msra.gmra.mxu1 %vm486_vm3, %v2387_v19  ;;  %v2366_v61 = vsub.f32 1.0, %v2365_v21  ;;  %v3563_v5 = vpop.eup %3562  ;;  %v2909_v21 = vld [vmem:[%s4938_s6 + $0x18] sm:$0xff] }
 0x54f   : > { %3310 = vmatmul.msk.f32.vlgmr.msra.gmra.mxu2 %vm486_vm3, %v2387_v19  ;;  %3312 = vmatmul.msk.f32.vlgmr.msra.gmra.mxu3 %vm486_vm3, %v2387_v19 }
 0x550   : > { %v2367_v63 = vmul.f32 %v3561_v42, %v2366_v61  ;;  %v2908_v61 = vld [vmem:[%s4938_s6 + $0x10] sm:$0xff]  ;;  %2974 = vmatpush.msra.mxu0 %v2909_v21 }
 0x552   : > { %v2368_v3 = vadd.f32 %v3561_v42, %v2367_v63  ;;  %2975 = vmatpush.msra.mxu0 %v2908_v61 }
 0x554   : > { %v2372_v2 = vsel %vm2371_vm11, %v3561_v42, %v2368_v3 }
 0x555   : > { %v2377_v32 = vsel %vm2374_vm12, %v2376_v36, %v2372_v2 }
 0x556   : > { %v2388_v50 = vmul.f32 %v3563_v5, %v2377_v32  ;;  %v2907_v5 = vld [vmem:[%s4938_s6 + $0x8] sm:$0xff] }
 0x557   : > { %2976 = vmatpush.msra.mxu0 %v2907_v5  ;;  %v2894_v5 = vld [vmem:[#allocation5 + $0x20] sm:$0xff] }
 0x558   : > { %2391 = vst.msk [vmem:[#allocation5 + $0x58] sm:$0xff] %vm486_vm3, %v2388_v50  ;;  %3307 = vmatmul.msk.f32.gmra.mxu0 %vm486_vm3, %v2388_v50  ;;  %3309 = vmatmul.msk.f32.gmra.mxu1 %vm486_vm3, %v2388_v50 }
 0x559   : > { %3311 = vmatmul.msk.f32.gmra.mxu2 %vm486_vm3, %v2388_v50  ;;  %3313 = vmatmul.msk.f32.gmra.mxu3 %vm486_vm3, %v2388_v50 }
 0x5cb   : > { %v2418_v4 = vpop.f32.mrf.mxu0  ;;  %v2446_v60 = vpop.f32.mrf.mxu1 }
 0x5cc   : > { %v2424_v6 = vadd.f32 %v2418_v4, %v2393_v0  ;;  %v2452_v37 = vadd.f32 %v2446_v60, %v2427_v62 }
 0x5ce   : > { %v3314_v22 = vmul.f32 -1.442695, %v2424_v6  ;;  %v3316_v48 = vmul.f32 -1.442695, %v2452_v37  ;;  %v2906_v37 = vld [vmem:[%s4938_s6] sm:$0xff] }
 0x5cf   : > { %2977 = vmatpush.msra.mxu0 %v2906_v37 }
 0x5d0   : > { %3564 = vpow2.f32 %v3314_v22 }
 0x5d1   : > { %3566 = vpow2.f32 %v3316_v48 }
 0x5d2   : > { %v2502_v7 = vpop.f32.mrf.mxu3  ;;  %v2474_v41 = vpop.f32.mrf.mxu2 }
 0x5d3   : > { %v2508_v59 = vadd.f32 %v2502_v7, %v2483_v30  ;;  %v2480_v26 = vadd.f32 %v2474_v41, %v2455_v24  ;;  %v2456_v30 = vld [vmem:[#allocation4 + $0x168] sm:$0xff] }
 0x5d5   : > { %v3318_v29 = vmul.f32 -1.442695, %v2508_v59  ;;  %v2421_v11 = vpop.f32.mrf.mxu0  ;;  %v2449_v12 = vpop.f32.mrf.mxu1 }
 0x5d6   : > { %v3565_v8 = vpop.eup %3564  ;;  %v2425_v47 = vadd.f32 %v2421_v11, %v2394_v31  ;;  %v2453_v46 = vadd.f32 %v2449_v12, %v2428_v34 }
 0x5d7   : > { %v3567_v16 = vpop.eup %3566  ;;  %v2516_v15 = vadd.f32 1.0, %v3565_v8  ;;  %3568 = vpow2.f32 %v3318_v29 }
 0x5d8   : > { %v2554_v18 = vadd.f32 1.0, %v3567_v16  ;;  %v3315_v17 = vmul.f32 -1.442695, %v2425_v47  ;;  %v3317_v13 = vmul.f32 -1.442695, %v2453_v46 }
 0x5d9   : > { %3570 = vrcp.f32 %v2516_v15  ;;  %v2527_v55 = vand.u32 2147483647, %v2516_v15  ;;  %v2529_v51 = vand.u32 2147483648, %v2516_v15  ;;  %vm2523_vm0 = vweird.f32 %v2516_v15 }
 0x5da   : > { %3572 = vrcp.f32 %v2554_v18  ;;  %v2567_v20 = vand.u32 2147483648, %v2554_v18  ;;  %v2565_v35 = vand.u32 2147483647, %v2554_v18  ;;  %vm2561_vm15 = vweird.f32 %v2554_v18 }
 0x5db   : > { %3574 = vpow2.f32 %v3315_v17  ;;  %v2530_v57 = vor.u32 1.1754944e-38, %v2529_v51  ;;  %vm2528_vm4 = vcmp.eq.f32.partialorder %v2527_v55, 8.507059e+37 }
 0x5dc   : > { %v2505_v25 = vpop.f32.mrf.mxu3  ;;  %3576 = vpow2.f32 %v3317_v13  ;;  %v2568_v36 = vor.u32 1.1754944e-38, %v2567_v20  ;;  %vm2566_vm5 = vcmp.eq.f32.partialorder %v2565_v35, 8.507059e+37  ;;  %v2477_v4 = vpop.f32.mrf.mxu2 }
 0x5dd   : > { %v3569_v14 = vpop.eup %3568  ;;  %v2509_v38 = vadd.f32 %v2505_v25, %v2484_v28  ;;  %v2481_v29 = vadd.f32 %v2477_v4, %v2456_v30  ;;  %v2898_v4 = vld [vmem:[#allocation5 + $0x40] sm:$0xff] }
 0x5de   : > { %v4737_v27 = vadd.f32 1.0, %v3569_v14 }
 0x5df   : > { %v3571_v58 = vpop.eup %3570  ;;  %v3319_v43 = vmul.f32 -1.442695, %v2509_v38 }
 0x5e0   : > { %v3573_v33 = vpop.eup %3572  ;;  %v2519_v40 = vmul.f32 %v3571_v58, %v2516_v15  ;;  %3578 = vrcp.f32 %v4737_v27  ;;  %vm2524_vm13 = vweird.f32 %v3571_v58  ;;  %vm2601_vm6 = vweird.f32 %v4737_v27 }
 0x5e1   : > { %v2557_v9 = vmul.f32 %v3573_v33, %v2554_v18  ;;  %3580 = vtanh.f32 %v2480_v26  ;;  %v3575_v44 = vpop.eup %3574  ;;  %vm2562_vm14 = vweird.f32 %v3573_v33  ;;  %vm2525_vm1 = vmor %vm2523_vm0, %vm2524_vm13  ;;  %v2605_v15 = vand.u32 2147483647, %v4737_v27 }
 0x5e2   : > { %v2520_v1 = vsub.f32 1.0, %v2519_v40  ;;  %v3577_v53 = vpop.eup %3576  ;;  %v4740_v52 = vadd.f32 1.0, %v3575_v44  ;;  %3582 = vpow2.f32 %v3319_v43  ;;  %vm2563_vm2 = vmor %vm2561_vm15, %vm2562_vm14 }
 0x5e3   : > { %v2558_v45 = vsub.f32 1.0, %v2557_v9  ;;  %v4742_v39 = vadd.f32 1.0, %v3577_v53  ;;  %vm2606_vm13 = vcmp.eq.f32.partialorder %v2605_v15, 8.507059e+37 }
 0x5e4   : > { %v2521_v54 = vmul.f32 %v3571_v58, %v2520_v1  ;;  %3584 = vrcp.f32 %v4740_v52  ;;  %v2542_v46 = vand.u32 2147483647, %v4740_v52  ;;  %v2544_v18 = vand.u32 2147483648, %v4740_v52 }
 0x5e5   : > { %v2559_v56 = vmul.f32 %v3573_v33, %v2558_v45  ;;  %3586 = vrcp.f32 %v4742_v39  ;;  %v2582_v17 = vand.u32 2147483648, %v4742_v39  ;;  %v2580_v14 = vand.u32 2147483647, %v4742_v39 }
 0x5e6   : > { %v4744_v42 = vpop.eup %3578  ;;  %v2522_v19 = vadd.f32 %v3571_v58, %v2521_v54  ;;  %vm2576_vm11 = vweird.f32 %v4742_v39  ;;  %vm2538_vm12 = vweird.f32 %v4740_v52  ;;  %vm2543_vm15 = vcmp.eq.f32.partialorder %v2542_v46, 8.507059e+37 }
 0x5e7   : > { %v2560_v63 = vadd.f32 %v3573_v33, %v2559_v56  ;;  %v2597_v23 = vmul.f32 %v4744_v42, %v4737_v27  ;;  %v3581_v3 = vpop.eup %3580  ;;  %vm2602_vm7 = vweird.f32 %v4744_v42  ;;  %v2545_v38 = vor.u32 1.1754944e-38, %v2544_v18 }
 0x5e8   : > { %v2526_v2 = vsel %vm2525_vm1, %v3571_v58, %v2522_v19  ;;  %v3583_v62 = vpop.eup %3582  ;;  %vm4780_vm8 = vmor %vm2601_vm6, %vm2602_vm7  ;;  %v2583_v9 = vor.u32 1.1754944e-38, %v2582_v17  ;;  %vm2581_vm1 = vcmp.eq.f32.partialorder %v2580_v14, 8.507059e+37  ;;  %vm3027_vm7 = vcmask 15360  }
 0x5e9   : > { %v2531_v32 = vsel %vm2528_vm4, %v2530_v57, %v2526_v2  ;;  %v2564_v50 = vsel %vm2563_vm2, %v3573_v33, %v2560_v63  ;;  %v2598_v0 = vsub.f32 1.0, %v2597_v23  ;;  %v4765_v7 = vadd.f32 1.0, %v3583_v62  ;;  %v2890_v23 = vld [vmem:[#allocation5] sm:$0xff]  ;;  %v2893_v2 = vld [vmem:[#allocation5 + $0x18] sm:$0xff]  ;;  %v2899_v62 = vld [vmem:[#allocation5 + $0x48] sm:$0xff] }
 0x5ea   : > { %v2569_v60 = vsel %vm2566_vm5, %v2568_v36, %v2564_v50  ;;  %v2628_v6 = vmul.f32 %v3581_v3, %v2531_v32  ;;  %v3585_v59 = vpop.eup %3584  ;;  %v2891_v3 = vld [vmem:[#allocation5 + $0x8] sm:$0xff]  ;;  %v2892_v36 = vld [vmem:[#allocation5 + $0x10] sm:$0xff] }
 0x5eb   : > { %v2626_v22 = vmul.f32 %v2569_v60, %v4705_v10  ;;  %v2599_v48 = vmul.f32 %v4744_v42, %v2598_v0  ;;  %v3587_v8 = vpop.eup %3586  ;;  %v2534_v11 = vmul.f32 %v3585_v59, %v4740_v52  ;;  %3588 = vrcp.f32 %v4765_v7  ;;  %v2895_v32 = vld [vmem:[#allocation5 + $0x28] sm:$0xff]  ;;  %v2896_v50 = vld [vmem:[#allocation5 + $0x30] sm:$0xff]  ;;  %v2897_v0 = vld [vmem:[#allocation5 + $0x38] sm:$0xff] }
 0x5ec   : > { %v2607_v10 = vand.u32 2147483648, %v4737_v27  ;;  %v2572_v34 = vmul.f32 %v3587_v8, %v4742_v39  ;;  %vm2539_vm9 = vweird.f32 %v3585_v59  ;;  %vm2577_vm10 = vweird.f32 %v3587_v8  ;;  %v2900_v60 = vld [vmem:[#allocation5 + $0x50] sm:$0xff] }
 0x5ed   : > { %v4767_v31 = vadd.f32 %v2628_v6, %v2626_v22  ;;  %v2535_v12 = vsub.f32 1.0, %v2534_v11  ;;  %v2600_v16 = vadd.f32 %v4744_v42, %v2599_v48  ;;  %vm2540_vm14 = vmor %vm2538_vm12, %vm2539_vm9  ;;  %vm2616_vm4 = vweird.f32 %v4765_v7  ;;  %v2901_v6 = vld [vmem:[#allocation5 + $0x58] sm:$0xff]  ;;  %v2640_v48 = vld [vmem:[#allocation4 + $0x70] sm:$0xff] }
 0x5ee   : > { %v2573_v47 = vsub.f32 1.0, %v2572_v34  ;;  %v2608_v24 = vor.u32 1.1754944e-38, %v2607_v10  ;;  %vm2578_vm0 = vmor %vm2576_vm11, %vm2577_vm10  ;;  %v2730_v34 = vld [vmem:[#allocation4 + $0x1f0] sm:$0xff] }
 0x5ef   : > { %3590 = vtanh.f32 %v4767_v31  ;;  %v2536_v13 = vmul.f32 %v3585_v59, %v2535_v12  ;;  %v2604_v25 = vsel %vm4780_vm8, %v4744_v42, %v2600_v16  ;;  %v2622_v42 = vand.u32 2147483648, %v4765_v7 }
 0x5f0   : > { %3592 = vtanh.f32 %v2481_v29  ;;  %v2574_v28 = vmul.f32 %v3587_v8, %v2573_v47  ;;  %v2609_v43 = vsel %vm2606_vm13, %v2608_v24, %v2604_v25  ;;  %v2641_v24 = vld [vmem:[#allocation4 + $0x78] sm:$0xff] }
 0x5f1   : > { %v3589_v26 = vpop.eup %3588  ;;  %v2537_v27 = vadd.f32 %v3585_v59, %v2536_v13  ;;  %v2623_v21 = vor.u32 1.1754944e-38, %v2622_v42 }
 0x5f2   : > { %v2575_v58 = vadd.f32 %v3587_v8, %v2574_v28  ;;  %v2612_v33 = vmul.f32 %v3589_v26, %v4765_v7  ;;  %vm2617_vm2 = vweird.f32 %v3589_v26  ;;  %v2675_v28 = vld [vmem:[#allocation4 + $0xf8] sm:$0xff] }
 0x5f3   : > { %v2541_v1 = vsel %vm2540_vm14, %v3585_v59, %v2537_v27  ;;  %vm2618_vm5 = vmor %vm2616_vm4, %vm2617_vm2  ;;  %v2702_v27 = vld [vmem:[#allocation4 + $0x170] sm:$0xff] }
 0x5f4   : > { %v2546_v45 = vsel %vm2543_vm15, %v2545_v38, %v2541_v1  ;;  %v2579_v20 = vsel %vm2578_vm0, %v3587_v8, %v2575_v58  ;;  %v2613_v55 = vsub.f32 1.0, %v2612_v33 }
 0x5f5   : > { %v3591_v40 = vpop.eup %3590  ;;  %v2584_v53 = vsel %vm2581_vm1, %v2583_v9, %v2579_v20 }
 0x5f6   : > { %v3593_v44 = vpop.eup %3592  ;;  %v2634_v51 = vmul.f32 %v3591_v40, %v2609_v43  ;;  %v2627_v52 = vmul.f32 %v2584_v53, %v4724_v49  ;;  %v2614_v56 = vmul.f32 %v3589_v26, %v2613_v55  ;;  %v2620_v49 = vand.u32 2147483647, %v4765_v7  ;;  %v2674_v7 = vld [vmem:[#allocation4 + $0xf0] sm:$0xff]  ;;  %v2731_v53 = vld [vmem:[#allocation4 + $0x1f8] sm:$0xff] }
 0x5f7   : > { %v2629_v54 = vmul.f32 %v3593_v44, %v2546_v45  ;;  %v4828_v44 = vld [vmem:[%s4939_s7] ss:$0 sm:$0xff] }
 0x5f8   : > { %2637 = vst.msk [vmem:[#allocation5 + $0x60] sm:$0xff] %vm486_vm3, %v2634_v51  ;;  %3320 = vmatmul.msk.f32.vlgmr.msrb.gmra.mxu0 %vm486_vm3, %v2634_v51  ;;  %3322 = vmatmul.msk.f32.vlgmr.msrb.gmra.mxu1 %vm486_vm3, %v2634_v51  ;;  %v2615_v39 = vadd.f32 %v3589_v26, %v2614_v56  ;;  %vm2621_vm6 = vcmp.eq.f32.partialorder %v2620_v49, 8.507059e+37 }
 0x5f9   : > { %3324 = vmatmul.msk.f32.vlgmr.msrb.gmra.mxu2 %vm486_vm3, %v2634_v51  ;;  %3326 = vmatmul.msk.f32.vlgmr.msrb.gmra.mxu3 %vm486_vm3, %v2634_v51  ;;  %v4798_v35 = vadd.f32 %v2629_v54, %v2627_v52 }
 0x5fa   : > { %v2619_v19 = vsel %vm2618_vm5, %v3589_v26, %v2615_v39 }
 0x5fb   : > { %3594 = vtanh.f32 %v4798_v35  ;;  %v2624_v57 = vsel %vm2621_vm6, %v2623_v21, %v2619_v19 }
 0x5ff   : > { %v2902_v37 = vld [vmem:[#allocation5 + $0x60] sm:$0xff] }
 0x601   : > { %v3595_v61 = vpop.eup %3594 }
 0x602   : > { %v2635_v63 = vmul.f32 %v3595_v61, %v2624_v57 }
 0x604   : > { %2638 = vst.msk [vmem:[#allocation5 + $0x68] sm:$0xff] %vm486_vm3, %v2635_v63  ;;  %3321 = vmatmul.msk.f32.gmra.mxu0 %vm486_vm3, %v2635_v63  ;;  %3323 = vmatmul.msk.f32.gmra.mxu1 %vm486_vm3, %v2635_v63 }
 0x605   : > { %3325 = vmatmul.msk.f32.gmra.mxu2 %vm486_vm3, %v2635_v63  ;;  %3327 = vmatmul.msk.f32.gmra.mxu3 %vm486_vm3, %v2635_v63 }
 0x60b   : > { %v2903_v22 = vld [vmem:[#allocation5 + $0x68] sm:$0xff] }
 0x60c   : > { %3334 = vmatmul.msk.f32.vlgmr.msra.gmra.mxu0 %vm486_vm3, %v2890_v23 }
 0x614   : > { %3335 = vmatmul.msk.f32.gmra.mxu0 %vm486_vm3, %v2891_v3 }
 0x61c   : > { %3336 = vmatmul.msk.f32.gmra.mxu0 %vm486_vm3, %v2892_v36 }
 0x624   : > { %3337 = vmatmul.msk.f32.gmra.mxu0 %vm486_vm3, %v2893_v2 }
 0x62c   : > { %3338 = vmatmul.msk.f32.gmra.mxu0 %vm486_vm3, %v2894_v5 }
 0x634   : > { %3339 = vmatmul.msk.f32.gmra.mxu0 %vm486_vm3, %v2895_v32 }
 0x63c   : > { %3340 = vmatmul.msk.f32.gmra.mxu0 %vm486_vm3, %v2896_v50 }
 0x644   : > { %3341 = vmatmul.msk.f32.gmra.mxu0 %vm486_vm3, %v2897_v0 }
 0x64c   : > { %3342 = vmatmul.msk.f32.gmra.mxu0 %vm486_vm3, %v2898_v4 }
 0x654   : > { %3343 = vmatmul.msk.f32.gmra.mxu0 %vm486_vm3, %v2899_v62 }
 0x65c   : > { %3344 = vmatmul.msk.f32.gmra.mxu0 %vm486_vm3, %v2900_v60 }
 0x664   : > { %3345 = vmatmul.msk.f32.gmra.mxu0 %vm486_vm3, %v2901_v6 }
 0x66c   : > { %3346 = vmatmul.msk.f32.gmra.mxu0 %vm486_vm3, %v2902_v37 }
 0x674   : > { %3347 = vmatmul.msk.f32.gmra.mxu0 %vm486_vm3, %v2903_v22 }
 0x675   : > { %v2665_v30 = vpop.f32.mrf.mxu0  ;;  %v2693_v59 = vpop.f32.mrf.mxu1 }
 0x676   : > { %v2671_v29 = vadd.f32 %v2665_v30, %v2640_v48  ;;  %v2699_v8 = vadd.f32 %v2693_v59, %v2674_v7 }
 0x678   : > { %v3328_v11 = vmul.f32 -1.442695, %v2671_v29  ;;  %v3330_v10 = vmul.f32 -1.442695, %v2699_v8 }
 0x67a   : > { %3596 = vpow2.f32 %v3328_v11 }
 0x67b   : > { %3598 = vpow2.f32 %v3330_v10 }
 0x67c   : > { %v2749_v12 = vpop.f32.mrf.mxu3  ;;  %v2721_v14 = vpop.f32.mrf.mxu2 }
 0x67d   : > { %v2755_v16 = vadd.f32 %v2749_v12, %v2730_v34  ;;  %v2727_v58 = vadd.f32 %v2721_v14, %v2702_v27 }
 0x67f   : > { %v3332_v15 = vmul.f32 -1.442695, %v2755_v16 }
 0x680   : > { %v3597_v47 = vpop.eup %3596 }
 0x681   : > { %v3599_v46 = vpop.eup %3598  ;;  %v2763_v18 = vadd.f32 1.0, %v3597_v47  ;;  %3600 = vpow2.f32 %v3332_v15  ;;  %v2668_v17 = vpop.f32.mrf.mxu0 }
 0x682   : > { %v2801_v41 = vadd.f32 1.0, %v3599_v46  ;;  %v2696_v13 = vpop.f32.mrf.mxu1  ;;  %v2672_v25 = vadd.f32 %v2668_v17, %v2641_v24 }
 0x683   : > { %3602 = vrcp.f32 %v2763_v18  ;;  %v2700_v26 = vadd.f32 %v2696_v13, %v2675_v28  ;;  %v2774_v52 = vand.u32 2147483647, %v2763_v18  ;;  %v2776_v49 = vand.u32 2147483648, %v2763_v18 }
 0x684   : > { %3604 = vrcp.f32 %v2801_v41  ;;  %v3329_v33 = vmul.f32 -1.442695, %v2672_v25  ;;  %v2814_v42 = vand.u32 2147483648, %v2801_v41  ;;  %v2812_v61 = vand.u32 2147483647, %v2801_v41 }
 0x685   : > { %v3331_v9 = vmul.f32 -1.442695, %v2700_v26  ;;  %vm2770_vm10 = vweird.f32 %v2763_v18  ;;  %vm2808_vm11 = vweird.f32 %v2801_v41  ;;  %vm2775_vm13 = vcmp.eq.f32.partialorder %v2774_v52, 8.507059e+37 }
 0x686   : > { %3606 = vpow2.f32 %v3329_v33  ;;  %v2777_v32 = vor.u32 1.1754944e-38, %v2776_v49  ;;  %v2815_v62 = vor.u32 1.1754944e-38, %v2814_v42  ;;  %vm2813_vm15 = vcmp.eq.f32.partialorder %v2812_v61, 8.507059e+37 }
 0x687   : > { %v3601_v38 = vpop.eup %3600 }
 0x688   : > { %v4823_v40 = vadd.f32 1.0, %v3601_v38  ;;  %v2752_v43 = vpop.f32.mrf.mxu3  ;;  %v2724_v10 = vpop.f32.mrf.mxu2 }
 0x689   : > { %v3603_v1 = vpop.eup %3602  ;;  %v2979_v55 = vpop.f32.mrf.mxu0  ;;  %v2756_v56 = vadd.f32 %v2752_v43, %v2731_v53 }
 0x68a   : > { %v3605_v45 = vpop.eup %3604  ;;  %v2766_v20 = vmul.f32 %v3603_v1, %v2763_v18  ;;  %3608 = vrcp.f32 %v4823_v40  ;;  %v2980_v19 = vadd.f32 %v4828_v44, %v2979_v55  ;;  %vm2771_vm8 = vweird.f32 %v3603_v1  ;;  %v2703_v18 = vld [vmem:[#allocation4 + $0x178] sm:$0xff] }
 0x68b   : > { %v2804_v51 = vmul.f32 %v3605_v45, %v2801_v41  ;;  %3610 = vtanh.f32 %v2727_v58  ;;  %v3333_v57 = vmul.f32 -1.442695, %v2756_v56  ;;  %vm2809_vm9 = vweird.f32 %v3605_v45  ;;  %vm2772_vm12 = vmor %vm2770_vm10, %vm2771_vm8 }
 0x68c   : > { %v2767_v54 = vsub.f32 1.0, %v2766_v20  ;;  %3612 = vpow2.f32 %v3331_v9  ;;  %v3607_v63 = vpop.eup %3606  ;;  %3028 = vst.msk [vmem:[%s3726_s14] sm:$0xff] %vm3027_vm7, %v2980_v19  ;;  %vm2810_vm14 = vmor %vm2808_vm11, %vm2809_vm9  ;;  %v2854_v46 = vand.u32 2147483648, %v4823_v40  ;;  %v2728_v41 = vadd.f32 %v2724_v10, %v2703_v18 }
 0x68d   : > { %v2805_v39 = vsub.f32 1.0, %v2804_v51  ;;  %v4836_v2 = vadd.f32 1.0, %v3607_v63  ;;  %3614 = vpow2.f32 %v3333_v57  ;;  %vm2848_vm1 = vweird.f32 %v4823_v40 }
 0x68e   : > { %v2768_v21 = vmul.f32 %v3603_v1, %v2767_v54  ;;  %v2852_v17 = vand.u32 2147483647, %v4823_v40  ;;  %v2855_v38 = vor.u32 1.1754944e-38, %v2854_v46 }
 0x68f   : > { %v2806_v23 = vmul.f32 %v3605_v45, %v2805_v39  ;;  %3616 = vrcp.f32 %v4836_v2  ;;  %v2791_v25 = vand.u32 2147483648, %v4836_v2  ;;  %vm2785_vm6 = vweird.f32 %v4836_v2 }
 0x690   : > { %v4834_v3 = vpop.eup %3608  ;;  %v2769_v36 = vadd.f32 %v3603_v1, %v2768_v21  ;;  %vm2853_vm5 = vcmp.eq.f32.partialorder %v2852_v17, 8.507059e+37 }
 0x691   : > { %v3611_v5 = vpop.eup %3610  ;;  %v2807_v50 = vadd.f32 %v3605_v45, %v2806_v23  ;;  %v2844_v0 = vmul.f32 %v4834_v3, %v4823_v40  ;;  %v2982_v6 = vpop.f32.mrf.mxu0  ;;  %vm2849_vm0 = vweird.f32 %v4834_v3  ;;  %v2789_v40 = vand.u32 2147483647, %v4836_v2 }
 0x692   : > { %v3613_v4 = vpop.eup %3612  ;;  %v2773_v60 = vsel %vm2772_vm12, %v3603_v1, %v2769_v36  ;;  %v2983_v34 = vadd.f32 %v4828_v44, %v2982_v6  ;;  %vm4860_vm2 = vmor %vm2848_vm1, %vm2849_vm0  ;;  %v2792_v55 = vor.u32 1.1754944e-38, %v2791_v25 }
 0x693   : > { %v2778_v37 = vsel %vm2775_vm13, %v2777_v32, %v2773_v60  ;;  %v2811_v22 = vsel %vm2810_vm14, %v3605_v45, %v2807_v50  ;;  %v2845_v48 = vsub.f32 1.0, %v2844_v0  ;;  %v4842_v30 = vadd.f32 1.0, %v3613_v4  ;;  %v3615_v11 = vpop.eup %3614 }
 0x694   : > { %v2816_v7 = vsel %vm2813_vm15, %v2815_v62, %v2811_v22  ;;  %v2875_v59 = vmul.f32 %v3611_v5, %v2778_v37  ;;  %v4848_v16 = vadd.f32 1.0, %v3615_v11  ;;  %3029 = vst.msk [vmem:[%s3726_s14 + $0x8] sm:$0xff] %vm3027_vm7, %v2983_v34  ;;  %vm2790_vm10 = vcmp.eq.f32.partialorder %v2789_v40, 8.507059e+37 }
 0x695   : > { %v2873_v29 = vmul.f32 %v2816_v7, %v4767_v31  ;;  %v2846_v8 = vmul.f32 %v4834_v3, %v2845_v48  ;;  %3618 = vrcp.f32 %v4842_v30  ;;  %v3617_v15 = vpop.eup %3616  ;;  %v2829_v45 = vand.u32 2147483648, %v4842_v30 }
 0x696   : > { %v2781_v31 = vmul.f32 %v3617_v15, %v4836_v2  ;;  %vm2786_vm4 = vweird.f32 %v3617_v15  ;;  %v2827_v52 = vand.u32 2147483647, %v4842_v30  ;;  %vm2823_vm11 = vweird.f32 %v4842_v30 }
 0x697   : > { %v2877_v12 = vadd.f32 %v2875_v59, %v2873_v29  ;;  %v2847_v47 = vadd.f32 %v4834_v3, %v2846_v8  ;;  %vm2787_vm9 = vmor %vm2785_vm6, %vm2786_vm4  ;;  %v2830_v61 = vor.u32 1.1754944e-38, %v2829_v45  ;;  %v2869_v4 = vand.u32 2147483648, %v4848_v16 }
 0x698   : > { %v2782_v28 = vsub.f32 1.0, %v2781_v31  ;;  %vm2828_vm13 = vcmp.eq.f32.partialorder %v2827_v52, 8.507059e+37  ;;  %vm2863_vm15 = vweird.f32 %v4848_v16  ;;  %v2867_v60 = vand.u32 2147483647, %v4848_v16 }
 0x699   : > { %3620 = vtanh.f32 %v2877_v12  ;;  %2888 = vst.msk [vmem:[#allocation3] sm:$0xff] %vm486_vm3, %v2877_v12  ;;  %v2985_v13 = vpop.f32.mrf.mxu0  ;;  %v2851_v27 = vsel %vm4860_vm2, %v4834_v3, %v2847_v47  ;;  %v2870_v37 = vor.u32 1.1754944e-38, %v2869_v4 }
 0x69a   : > { %3622 = vrcp.f32 %v4848_v16  ;;  %v2986_v26 = vadd.f32 %v4828_v44, %v2985_v13  ;;  %v2783_v33 = vmul.f32 %v3617_v15, %v2782_v28  ;;  %v2856_v43 = vsel %vm2853_vm5, %v2855_v38, %v2851_v27 }
 0x69b   : > { %v3619_v14 = vpop.eup %3618  ;;  %3624 = vtanh.f32 %v2728_v41  ;;  %vm2868_vm1 = vcmp.eq.f32.partialorder %v2867_v60, 8.507059e+37 }
 0x69c   : > { %v2819_v58 = vmul.f32 %v3619_v14, %v4842_v30  ;;  %3030 = vst.msk [vmem:[%s3726_s14 + $0x10] sm:$0xff] %vm3027_vm7, %v2986_v26  ;;  %v2784_v20 = vadd.f32 %v3617_v15, %v2783_v33  ;;  %vm2824_vm8 = vweird.f32 %v3619_v14 }
 0x69d   : > { %vm2825_vm12 = vmor %vm2823_vm11, %vm2824_vm8 }
 0x69e   : > { %v2820_v9 = vsub.f32 1.0, %v2819_v58  ;;  %v2788_v56 = vsel %vm2787_vm9, %v3617_v15, %v2784_v20 }
 0x69f   : > { %v3621_v1 = vpop.eup %3620  ;;  %v2793_v42 = vsel %vm2790_vm10, %v2792_v55, %v2788_v56 }
 0x6a0   : > { %v3623_v51 = vpop.eup %3622  ;;  %v2881_v53 = vmul.f32 %v3621_v1, %v2856_v43  ;;  %v2821_v54 = vmul.f32 %v3619_v14, %v2820_v9 }
 0x6a1   : > { %v2859_v39 = vmul.f32 %v3623_v51, %v4848_v16  ;;  %v2988_v19 = vpop.f32.mrf.mxu0  ;;  %v3625_v21 = vpop.eup %3624  ;;  %vm2864_vm14 = vweird.f32 %v3623_v51 }
 0x6a2   : > { %2884 = vst.msk [vmem:[#allocation5 + $0x70] sm:$0xff] %vm486_vm3, %v2881_v53  ;;  %v2822_v49 = vadd.f32 %v3619_v14, %v2821_v54  ;;  %v2989_v63 = vadd.f32 %v4828_v44, %v2988_v19  ;;  %v2876_v3 = vmul.f32 %v3625_v21, %v2793_v42  ;;  %vm2865_vm0 = vmor %vm2863_vm15, %vm2864_vm14 }
 0x6a3   : > { %2886 = vst.msk [vmem:[#allocation2] sm:$0xff] %vm486_vm3, %v2881_v53  ;;  %v2860_v57 = vsub.f32 1.0, %v2859_v39 }
 0x6a4   : > { %v2826_v23 = vsel %vm2825_vm12, %v3619_v14, %v2822_v49  ;;  %3031 = vst.msk [vmem:[%s3726_s14 + $0x18] sm:$0xff] %vm3027_vm7, %v2989_v63 }
 0x6a5   : > { %v2831_v36 = vsel %vm2828_vm13, %v2830_v61, %v2826_v23  ;;  %v2861_v2 = vmul.f32 %v3623_v51, %v2860_v57 }
 0x6a6   : > { %v2874_v5 = vmul.f32 %v2831_v36, %v4798_v35 }
 0x6a7   : > { %v2862_v50 = vadd.f32 %v3623_v51, %v2861_v2 }
 0x6a8   : > { %v2878_v32 = vadd.f32 %v2876_v3, %v2874_v5 }
 0x6a9   : > { %v2904_v0 = vld [vmem:[#allocation5 + $0x70] sm:$0xff]  ;;  %v2991_v62 = vpop.f32.mrf.mxu0  ;;  %v2866_v35 = vsel %vm2865_vm0, %v3623_v51, %v2862_v50 }
 0x6aa   : > { %3626 = vtanh.f32 %v2878_v32  ;;  %2889 = vst.msk [vmem:[#allocation3 + $0x8] sm:$0xff] %vm486_vm3, %v2878_v32  ;;  %3348 = vmatmul.msk.f32.gmra.mxu0 %vm486_vm3, %v2904_v0  ;;  %v2992_v6 = vadd.f32 %v4828_v44, %v2991_v62  ;;  %v2871_v48 = vsel %vm2868_vm1, %v2870_v37, %v2866_v35 }
 0x6ac   : > { %3032 = vst.msk [vmem:[%s3726_s14 + $0x20] sm:$0xff] %vm3027_vm7, %v2992_v6 }
 0x6b0   : > { %v3627_v22 = vpop.eup %3626 }
 0x6b1   : > { %v2882_v30 = vmul.f32 %v3627_v22, %v2871_v48  ;;  %v2994_v7 = vpop.f32.mrf.mxu0 }
 0x6b2   : > { %v2995_v59 = vadd.f32 %v4828_v44, %v2994_v7 }
 0x6b3   : > { %2885 = vst.msk [vmem:[#allocation5 + $0x78] sm:$0xff] %vm486_vm3, %v2882_v30 }
 0x6b4   : > { %2887 = vst.msk [vmem:[#allocation2 + $0x8] sm:$0xff] %vm486_vm3, %v2882_v30 }
 0x6b5   : > { %3033 = vst.msk [vmem:[%s3726_s14 + $0x28] sm:$0xff] %vm3027_vm7, %v2995_v59 }
 0x6b9   : > { %v2997_v8 = vpop.f32.mrf.mxu0 }
 0x6ba   : > { %v2905_v29 = vld [vmem:[#allocation5 + $0x78] sm:$0xff]  ;;  %v2998_v11 = vadd.f32 %v4828_v44, %v2997_v8 }
 0x6bb   : > { %3349 = vmatmul.msk.f32.gmra.mxu0 %vm486_vm3, %v2905_v29 }
 0x6bc   : > { %3034 = vst.msk [vmem:[%s3726_s14 + $0x30] sm:$0xff] %vm3027_vm7, %v2998_v11 }
 0x6c1   : > { %v3000_v10 = vpop.f32.mrf.mxu0 }
 0x6c2   : > { %v3001_v34 = vadd.f32 %v4828_v44, %v3000_v10 }
 0x6c4   : > { %3035 = vst.msk [vmem:[%s3726_s14 + $0x38] sm:$0xff] %vm3027_vm7, %v3001_v34 }
 0x6c9   : > { %v3003_v12 = vpop.f32.mrf.mxu0 }
 0x6ca   : > { %v3004_v16 = vadd.f32 %v4828_v44, %v3003_v12 }
 0x6cc   : > { %3036 = vst.msk [vmem:[%s3726_s14 + $0x40] sm:$0xff] %vm3027_vm7, %v3004_v16 }
 0x6d1   : > { %v3006_v15 = vpop.f32.mrf.mxu0 }
 0x6d2   : > { %v3007_v47 = vadd.f32 %v4828_v44, %v3006_v15 }
 0x6d4   : > { %3037 = vst.msk [vmem:[%s3726_s14 + $0x48] sm:$0xff] %vm3027_vm7, %v3007_v47 }
 0x6d9   : > { %v3009_v46 = vpop.f32.mrf.mxu0 }
 0x6da   : > { %v3010_v18 = vadd.f32 %v4828_v44, %v3009_v46 }
 0x6dc   : > { %3038 = vst.msk [vmem:[%s3726_s14 + $0x50] sm:$0xff] %vm3027_vm7, %v3010_v18 }
 0x6e1   : > { %v3012_v31 = vpop.f32.mrf.mxu0 }
 0x6e2   : > { %v3013_v41 = vadd.f32 %v4828_v44, %v3012_v31 }
 0x6e4   : > { %3039 = vst.msk [vmem:[%s3726_s14 + $0x58] sm:$0xff] %vm3027_vm7, %v3013_v41 }
 0x6e9   : > { %v3015_v17 = vpop.f32.mrf.mxu0 }
 0x6ea   : > { %v3016_v13 = vadd.f32 %v4828_v44, %v3015_v17 }
 0x6ec   : > { %3040 = vst.msk [vmem:[%s3726_s14 + $0x60] sm:$0xff] %vm3027_vm7, %v3016_v13 }
 0x6f1   : > { %v3018_v14 = vpop.f32.mrf.mxu0 }
 0x6f2   : > { %v3019_v24 = vadd.f32 %v4828_v44, %v3018_v14 }
 0x6f4   : > { %3041 = vst.msk [vmem:[%s3726_s14 + $0x68] sm:$0xff] %vm3027_vm7, %v3019_v24 }
 0x727   : > { %v3021_v28 = vpop.f32.mrf.mxu0 }
 0x728   : > { %v3022_v25 = vadd.f32 %v4828_v44, %v3021_v28 }
 0x72a   : > { %3042 = vst.msk [vmem:[%s3726_s14 + $0x70] sm:$0xff] %vm3027_vm7, %v3022_v25 }
 0x738   : > { %v3024_v26 = vpop.f32.mrf.mxu0 }
 0x739   : > { %v3025_v27 = vadd.f32 %v4828_v44, %v3024_v26 }
 0x73b   : > { %3043 = vst.msk [vmem:[%s3726_s14 + $0x78] sm:$0xff] %vm3027_vm7, %v3025_v27 }
 0x73c PF: > { %s18_s27 = sadd.s32 1, %s3662_s27  }
 0x73d   : > { %p15_p5 = scmp.ge.s32.totalorder %s18_s27, 6  }
 0x73f   :  { %17 = sbr.rel (!%p15_p5) target bundleno = 1 (0x1), region = 133 }

</bundles_post_ra>
